<compile_context>
chip_gen: v7x
topology: tpu7x:2x2x1
jax: 0.10.0
libtpu: 0.0.40
codegen_flags: <defaults>
</compile_context>

<pallas_src>
import functools

import jax
import jax.numpy as jnp
from jax.experimental import pallas as pl
from jax.experimental.pallas import tpu as pltpu


# ---------------------------------------------------------------------------
# tanh-approximate GELU (matches PyTorch nn.GELU(approximate='tanh'),
# |err| vs exact erf-GELU ~1e-3, inside the model tolerance).
# ---------------------------------------------------------------------------
_GELU_C = 0.7978845608028654  # sqrt(2/pi)


def _gelu_tanh(x):
    return 0.5 * x * (1.0 + jnp.tanh(_GELU_C * (x + 0.044715 * (x * x * x))))


def default_act_dtype():
    """Elementwise (GELU) dtype: bf16 on bf16-VPU chips (v6e/v7x), f32 on v5e."""
    try:
        kind = jax.devices()[0].device_kind.lower()
    except Exception:
        return "float32"
    for old in ("v2", "v3", "v4", "v5"):
        if old in kind:
            return "float32"
    return "bfloat16"


# ---------------------------------------------------------------------------
# Pallas kernel: forward for one packed block of TB graphs per grid step.
#   x_ref   : (TB*N, d_state)      bf16   packed node features
#   coef_ref: (TB*N, 3)            f32    chain stencil [c_self, c_up, c_dn]
#   w1_ref  : (d_state, H)         bf16
#   wsq_ref : (4, H, H)            bf16   [w2, aw2, vw1, vw2]
#   wag_ref : (H, 2H)              bf16   [aw1 | gw1]  (fused head RHS)
#   aw3_ref : (H, d_action)        bf16
#   wrow_ref: (2, H)               f32    [gw2^T ; vw3^T]  (VPU/XLU row dots)
#   b128_ref: (7, H)               f32    [b1, b2, ab1, ab2, gb1, vb1, vb2]
#   bsm_ref : (1, d_action + 2)    f32    [ab3 | gb2 | vb3]
# outputs:
#   am_ref  : (TB*N, d_action)     f32    per-node action mean
#   val_ref : (TB, 1)              f32    per-graph value
# ---------------------------------------------------------------------------
def _ac_kernel(x_ref, coef_ref, w1_ref, wsq_ref, wag_ref, aw3_ref, wrow_ref,
               b128_ref, bsm_ref, am_ref, val_ref, *, n_nodes, act_dtype):
    f32 = jnp.float32
    bf16 = jnp.bfloat16

    tbn = x_ref.shape[0]
    tb = tbn // n_nodes
    hidden = b128_ref.shape[1]
    d_action = aw3_ref.shape[1]

    b = b128_ref[...]              # (7, H)          f32
    bs = bsm_ref[...]              # (1, d_action+2) f32
    wr = wrow_ref[...]             # (2, H)          f32
    coef = coef_ref[...]           # (TB*N, 3)       f32
    c_self = coef[:, 0:1]
    c_up = coef[:, 1:2]
    c_dn = coef[:, 2:3]

    def mm(lhs, rhs):
        # bf16 MXU operands, f32 accumulation.
        return jnp.dot(lhs.astype(bf16), rhs.astype(bf16),
                       preferred_element_type=f32)

    def gelu(y):
        # bf16 elementwise math on v6e/v7x (next matmul casts to bf16 anyway),
        # f32 on v5e.
        return _gelu_tanh(y.astype(act_dtype))

    def chain_agg(h):
        # D^-1/2 (A+I) D^-1/2 @ h for per-graph chain graphs, as a roll stencil
        # (XLU rolls + VPU FMAs; graph-boundary mixing zeroed by coefficients).
        up = pltpu.roll(h, shift=1, axis=0)          # row i <- row i-1
        dn = pltpu.roll(h, shift=tbn - 1, axis=0)    # row i <- row i+1
        return c_self * h + c_up * up + c_dn * dn

    # --- GCN layer 1: A_hat @ (X W1) + b1, GELU ------------------------------
    h = gelu(chain_agg(mm(x_ref[...], w1_ref[...])) + b[0:1, :])

    # --- LayerNorm over features (no affine, eps=1e-5), single-pass variance -
    hf = h.astype(f32)
    mu = jnp.mean(hf, axis=-1, keepdims=True)
    ex2 = jnp.mean(hf * hf, axis=-1, keepdims=True)
    hn = (hf - mu) * jax.lax.rsqrt(ex2 - mu * mu + 1e-5)

    # --- GCN layer 2 + GELU ---------------------------------------------------
    h2 = gelu(chain_agg(mm(hn, wsq_ref[0])) + b[1:2, :])        # (TB*N, H)

    # --- fused actor-head-1 / gate-MLP-1 matmul (shared LHS h2) ---------------
    ag = mm(h2, wag_ref[...])                                    # (TB*N, 2H)
    a1 = gelu(ag[:, :hidden] + b[2:3, :])
    g = gelu(ag[:, hidden:] + b[4:5, :])

    # --- actor head (per node) -------------------------------------------------
    a2 = gelu(mm(a1, wsq_ref[1]) + b[3:4, :])
    am_ref[...] = mm(a2, aw3_ref[...]) + bs[:, :d_action]        # (TB*N, d_action)

    # --- attentional aggregation: gate -> per-graph softmax -> weighted sum ----
    gate = jnp.sum(g.astype(f32) * wr[0:1, :], axis=-1, keepdims=True) \
        + bs[:, d_action:d_action + 1]                           # (TB*N, 1)
    gate3 = gate.reshape(tb, n_nodes, 1)
    h2_3 = h2.astype(f32).reshape(tb, n_nodes, hidden)
    gate3 = gate3 - jnp.max(gate3, axis=1, keepdims=True)
    e = jnp.exp(gate3)
    inv = pl.reciprocal(jnp.sum(e, axis=1, keepdims=True), approx=True)
    emb = jnp.sum((e * inv) * h2_3, axis=1)                      # (TB, H)

    # --- value head (per graph) -------------------------------------------------
    v1 = gelu(mm(emb, wsq_ref[2]) + b[5:6, :])
    v2 = gelu(mm(v1, wsq_ref[3]) + b[6:7, :])
    val_ref[...] = (jnp.sum(v2.astype(f32) * wr[1:2, :], axis=-1, keepdims=True)
                    + bs[:, d_action + 1:d_action + 2])          # (TB, 1)


# ---------------------------------------------------------------------------
# Host-side helpers (all one-time prep, hoisted out of the per-call path).
# ---------------------------------------------------------------------------
def chain_adj_norm(n_nodes):
    """D^{-1/2} (A + I) D^{-1/2} for an undirected chain graph (GCNConv default)."""
    A = jnp.zeros((n_nodes, n_nodes), jnp.float32)
    idx = jnp.arange(n_nodes - 1)
    A = A.at[idx, idx + 1].set(1.0)
    A = A.at[idx + 1, idx].set(1.0)
    A = A + jnp.eye(n_nodes, dtype=jnp.float32)
    deg = jnp.sum(A, axis=1)
    dinv = 1.0 / jnp.sqrt(deg)
    return A * dinv[:, None] * dinv[None, :]


def chain_stencil_coef(A_hat, n_nodes, tb):
    """Per-row stencil coefficients [c_self, c_up, c_dn], tiled for TB graphs.

    c_up / c_dn are zero at graph boundaries so the in-kernel rolls never mix
    different graphs (including the padded graphs of the last block)."""
    diag = jnp.diagonal(A_hat)                                       # A[i, i]
    up = jnp.concatenate([jnp.zeros((1,)), jnp.diagonal(A_hat, offset=-1)])  # A[i, i-1]
    dn = jnp.concatenate([jnp.diagonal(A_hat, offset=1), jnp.zeros((1,))])   # A[i, i+1]
    coef = jnp.stack([diag, up, dn], axis=1)                         # (N, 3)
    return jnp.tile(coef, (tb, 1)).astype(jnp.float32)               # (TB*N, 3)


def init_params(key, d_state, d_action, hidden_dim=128):
    assert hidden_dim == 128, "parameter packing assumes hidden_dim == 128"
    ks = jax.random.split(key, 11)

    def lin(k, fan_in, fan_out):
        kw, kb = jax.random.split(k)
        w = jax.random.normal(kw, (fan_in, fan_out), jnp.float32) * (1.0 / jnp.sqrt(fan_in))
        b = jax.random.normal(kb, (1, fan_out), jnp.float32) * 0.01
        return w, b

    p = {}
    p["w1"], p["b1"] = lin(ks[0], d_state, hidden_dim)      # gcn1
    p["w2"], p["b2"] = lin(ks[1], hidden_dim, hidden_dim)   # gcn2
    p["aw1"], p["ab1"] = lin(ks[2], hidden_dim, 128)        # actor head
    p["aw2"], p["ab2"] = lin(ks[3], 128, 128)
    p["aw3"], p["ab3"] = lin(ks[4], 128, d_action)
    p["gw1"], p["gb1"] = lin(ks[5], hidden_dim, 128)        # attention gate MLP
    p["gw2"], p["gb2"] = lin(ks[6], 128, 1)
    p["vw1"], p["vb1"] = lin(ks[7], hidden_dim, 128)        # value head
    p["vw2"], p["vb2"] = lin(ks[8], 128, 128)
    p["vw3"], p["vb3"] = lin(ks[9], 128, 1)
    # log_action_std is only used for (host-side) Normal sampling.
    p["log_action_std"] = jnp.full((d_action,), -0.5, jnp.float32)
    return p


def pack_inputs(params, A_hat, n_nodes, tb):
    """One-time packing of weights/biases + chain-stencil coefficients."""
    bf16 = jnp.bfloat16
    f32 = jnp.float32
    p = params
    return dict(
        coef=chain_stencil_coef(A_hat, n_nodes, tb),                        # (TB*N, 3)
        w1=p["w1"].astype(bf16),                                            # (d_state, H)
        wsq=jnp.stack([p["w2"], p["aw2"], p["vw1"], p["vw2"]]).astype(bf16),  # (4, H, H)
        w_ag=jnp.concatenate([p["aw1"], p["gw1"]], axis=1).astype(bf16),    # (H, 2H)
        aw3=p["aw3"].astype(bf16),                                          # (H, d_action)
        wrow=jnp.concatenate([p["gw2"].T, p["vw3"].T], axis=0).astype(f32),  # (2, H)
        b128=jnp.concatenate([p["b1"], p["b2"], p["ab1"], p["ab2"],
                              p["gb1"], p["vb1"], p["vb2"]], axis=0).astype(f32),  # (7, H)
        bsm=jnp.concatenate([p["ab3"], p["gb2"], p["vb3"]], axis=1).astype(f32),   # (1, d_action+2)
    )


@functools.partial(jax.jit, static_argnames=("tb", "act_dtype"))
def get_action_and_value(state, packed, tb=16, act_dtype="float32"):
    """state: (B, N, d_state) -> (action_mean (B, N*d_action), value (B, 1))."""
    B, N, d_state = state.shape
    H = packed["b128"].shape[1]
    d_action = packed["aw3"].shape[1]
    assert packed["coef"].shape[0] == tb * N
    adt = jnp.dtype(act_dtype)

    G = -(-B // tb)                 # grid length (kept even for v7x's 2 TCs)
    B_pad = G * tb
    tbn = tb * N

    # Pack TB graphs per grid step; pad batch to a multiple of TB with zeros.
    x = state.astype(jnp.bfloat16)
    if B_pad != B:
        x = jnp.concatenate(
            [x, jnp.zeros((B_pad - B, N, d_state), jnp.bfloat16)], axis=0)
    x = x.reshape(B_pad * N, d_state)

    def full_spec(arr):
        nd = arr.ndim
        return pl.BlockSpec(arr.shape, lambda b, _nd=nd: (0,) * _nd)

    in_specs = [pl.BlockSpec((tbn, d_state), lambda b: (b, 0)),
                full_spec(packed["coef"]), full_spec(packed["w1"]),
                full_spec(packed["wsq"]), full_spec(packed["w_ag"]),
                full_spec(packed["aw3"]), full_spec(packed["wrow"]),
                full_spec(packed["b128"]), full_spec(packed["bsm"])]
    out_specs = (pl.BlockSpec((tbn, d_action), lambda b: (b, 0)),
                 pl.BlockSpec((tb, 1), lambda b: (b, 0)))
    out_shape = (jax.ShapeDtypeStruct((B_pad * N, d_action), jnp.float32),
                 jax.ShapeDtypeStruct((B_pad, 1), jnp.float32))

    # Advisory cost estimate for XLA's scheduler.
    flops = G * int(2 * tbn * (d_state * H + 4 * H * H + H * d_action)   # MXU
                    + 4 * tb * H * H                                     # value head
                    + 2 * (5 * tbn * H) * 2                              # stencil x2 layers
                    + 2 * (tbn * H + tb * H))                            # row dots
    transc = G * int(5 * tbn * H + 2 * tb * H + 2 * tbn + tb)
    bytes_acc = int(x.size * 2
                    + (packed["wsq"].size + packed["w1"].size
                       + packed["w_ag"].size + packed["aw3"].size) * 2
                    + (packed["wrow"].size + packed["b128"].size
                       + packed["bsm"].size + packed["coef"].size) * 4
                    + B_pad * N * d_action * 4 + B_pad * 4)

    kernel = functools.partial(_ac_kernel, n_nodes=N, act_dtype=adt)
    am, val = pl.pallas_call(
        kernel,
        grid=(G,),
        in_specs=in_specs,
        out_specs=out_specs,
        out_shape=out_shape,
        compiler_params=pltpu.CompilerParams(
            dimension_semantics=("parallel",),
            vmem_limit_bytes=32 * 1024 * 1024),
        cost_estimate=pl.CostEstimate(flops=flops, transcendentals=transc,
                                      bytes_accessed=bytes_acc),
    )(x, packed["coef"], packed["w1"], packed["wsq"], packed["w_ag"],
      packed["aw3"], packed["wrow"], packed["b128"], packed["bsm"])

    action_mean = am.reshape(B_pad, N * d_action)[:B]    # matches .flatten(start_dim=1)
    value = val[:B]
    return action_mean, value


# ---------------------------------------------------------------------------
# Pure-JAX reference mirroring the kernel math (same bf16 operands / f32 acc,
# same GELU dtype) but using the dense normalized adjacency so the in-kernel
# roll stencil is validated against the true graph aggregation.
# ---------------------------------------------------------------------------
def _reference(state, A_hat, params, act_dtype):
    bf16, f32 = jnp.bfloat16, jnp.float32
    hp = jax.lax.Precision.HIGHEST
    p = params

    def mm(a, w):
        return jnp.einsum("...ij,jk->...ik", a.astype(bf16), w.astype(bf16),
                          preferred_element_type=f32)

    def gelu(y):
        return _gelu_tanh(y.astype(act_dtype)).astype(f32)

    def agg(h):  # dense f32 aggregation (reference for the chain stencil)
        return jnp.einsum("mn,bnh->bmh", A_hat, h, precision=hp)

    x = state
    h = gelu(agg(mm(x, p["w1"])) + p["b1"])
    mu = h.mean(-1, keepdims=True)
    var = ((h - mu) ** 2).mean(-1, keepdims=True)
    h = (h - mu) * jax.lax.rsqrt(var + 1e-5)
    h2 = gelu(agg(mm(h, p["w2"])) + p["b2"])
    a = gelu(mm(h2, p["aw1"]) + p["ab1"])
    a = gelu(mm(a, p["aw2"]) + p["ab2"])
    am = mm(a, p["aw3"]) + p["ab3"]
    g = gelu(mm(h2, p["gw1"]) + p["gb1"])
    gate = jnp.sum(g * p["gw2"][:, 0], axis=-1, keepdims=True) + p["gb2"][0, 0]
    w_att = jax.nn.softmax(gate, axis=1)
    emb = jnp.sum(w_att * h2, axis=1)
    v = gelu(mm(emb, p["vw1"]) + p["vb1"])
    v = gelu(mm(v, p["vw2"]) + p["vb2"])
    v = jnp.sum(v * p["vw3"][:, 0], axis=-1, keepdims=True) + p["vb3"][0, 0]
    return am.reshape(state.shape[0], -1), v


if __name__ == "__main__":
    B, N, d_state, d_action, hidden = 20, 8, 4, 2, 128
    TB = 16   # 128-row blocks, grid = ceil(20/16) = 2 (use TB=32 on v6e/v7x for B >> 20)

    key = jax.random.PRNGKey(0)
    k_state, k_params = jax.random.split(key)
    state = jax.random.normal(k_state, (B, N, d_state), jnp.float32)
    params = init_params(k_params, d_state, d_action, hidden)
    A_hat = chain_adj_norm(N)

    act_dtype = default_act_dtype()              # bf16 GELU on v6e/v7x, f32 on v5e
    packed = pack_inputs(params, A_hat, N, TB)   # one-time packing (hoisted)

    action_mean, value = get_action_and_value(state, packed, tb=TB, act_dtype=act_dtype)
    jax.block_until_ready((action_mean, value))

    ref_am, ref_v = _reference(state, A_hat, params, jnp.dtype(act_dtype))
    assert action_mean.shape == (B, N * d_action) and value.shape == (B, 1)
    assert jnp.allclose(action_mean, ref_am, atol=2e-2, rtol=2e-2), \
        float(jnp.max(jnp.abs(action_mean - ref_am)))
    assert jnp.allclose(value, ref_v, atol=2e-2, rtol=2e-2), \
        float(jnp.max(jnp.abs(value - ref_v)))

    print("KERNEL_OK")
</pallas_src>

<mosaic_0001>
module attributes {stable_mosaic.version = 11 : i64} {
  func.func @_ac_kernel(%arg0: i32, %arg1: memref<128x4xbf16, #tpu.memory_space<vmem>>, %arg2: memref<128x3xf32, #tpu.memory_space<vmem>>, %arg3: memref<4x128xbf16, #tpu.memory_space<vmem>>, %arg4: memref<4x128x128xbf16, #tpu.memory_space<vmem>>, %arg5: memref<128x256xbf16, #tpu.memory_space<vmem>>, %arg6: memref<128x2xbf16, #tpu.memory_space<vmem>>, %arg7: memref<2x128xf32, #tpu.memory_space<vmem>>, %arg8: memref<7x128xf32, #tpu.memory_space<vmem>>, %arg9: memref<1x4xf32, #tpu.memory_space<vmem>>, %arg10: memref<128x2xf32, #tpu.memory_space<vmem>>, %arg11: memref<16x1xf32, #tpu.memory_space<vmem>>) attributes {dimension_semantics = [#tpu.dimension_semantics<parallel>], iteration_bounds = array<i64: 2>, scalar_prefetch = 0 : i64, scratch_operands = 0 : i64, tpu.core_type = #tpu.core_type<tc>, window_params = [{transform_indices = @transform_0, window_bounds = array<i64: 128, 4>}, {pipeline_mode = #tpu.pipeline_mode<synchronous>, transform_indices = @transform_1, window_bounds = array<i64: 128, 3>}, {pipeline_mode = #tpu.pipeline_mode<synchronous>, transform_indices = @transform_2, window_bounds = array<i64: 4, 128>}, {pipeline_mode = #tpu.pipeline_mode<synchronous>, transform_indices = @transform_3, window_bounds = array<i64: 4, 128, 128>}, {pipeline_mode = #tpu.pipeline_mode<synchronous>, transform_indices = @transform_4, window_bounds = array<i64: 128, 256>}, {pipeline_mode = #tpu.pipeline_mode<synchronous>, transform_indices = @transform_5, window_bounds = array<i64: 128, 2>}, {pipeline_mode = #tpu.pipeline_mode<synchronous>, transform_indices = @transform_6, window_bounds = array<i64: 2, 128>}, {pipeline_mode = #tpu.pipeline_mode<synchronous>, transform_indices = @transform_7, window_bounds = array<i64: 7, 128>}, {pipeline_mode = #tpu.pipeline_mode<synchronous>, transform_indices = @transform_8, window_bounds = array<i64: 1, 4>}, {transform_indices = @transform_9, window_bounds = array<i64: 128, 2>}, {transform_indices = @transform_10, window_bounds = array<i64: 16, 1>}]} {
    %c0 = arith.constant 0 : index
    %c0_0 = arith.constant 0 : index
    %0 = vector.load %arg8[%c0, %c0_0] : memref<7x128xf32, #tpu.memory_space<vmem>>, vector<7x128xf32>
    %c0_1 = arith.constant 0 : index
    %c0_2 = arith.constant 0 : index
    %1 = vector.load %arg9[%c0_1, %c0_2] : memref<1x4xf32, #tpu.memory_space<vmem>>, vector<1x4xf32>
    %c0_3 = arith.constant 0 : index
    %c0_4 = arith.constant 0 : index
    %2 = vector.load %arg7[%c0_3, %c0_4] : memref<2x128xf32, #tpu.memory_space<vmem>>, vector<2x128xf32>
    %c0_5 = arith.constant 0 : index
    %c0_6 = arith.constant 0 : index
    %3 = vector.load %arg2[%c0_5, %c0_6] : memref<128x3xf32, #tpu.memory_space<vmem>>, vector<128x3xf32>
    %4 = vector.extract_strided_slice %3 {offsets = [0, 0], sizes = [128, 1], strides = [1, 1]} : vector<128x3xf32> to vector<128x1xf32>
    %5 = vector.extract_strided_slice %3 {offsets = [0, 1], sizes = [128, 1], strides = [1, 1]} : vector<128x3xf32> to vector<128x1xf32>
    %6 = vector.extract_strided_slice %3 {offsets = [0, 2], sizes = [128, 1], strides = [1, 1]} : vector<128x3xf32> to vector<128x1xf32>
    %c0_7 = arith.constant 0 : index
    %c0_8 = arith.constant 0 : index
    %7 = vector.load %arg1[%c0_7, %c0_8] : memref<128x4xbf16, #tpu.memory_space<vmem>>, vector<128x4xbf16>
    %c0_9 = arith.constant 0 : index
    %c0_10 = arith.constant 0 : index
    %8 = vector.load %arg3[%c0_9, %c0_10] : memref<4x128xbf16, #tpu.memory_space<vmem>>, vector<4x128xbf16>
    %cst = arith.constant dense<0.000000e+00> : vector<128x128xf32>
    %9 = tpu.matmul %7, %8, %cst {dimension_numbers = #tpu.dot_dimension_numbers<[1], [0], [0], [1], [0, 0, 1, 1], [], []>} : vector<128x4xbf16>, vector<4x128xbf16>, vector<128x128xf32> -> vector<128x128xf32>
    %c1_i32 = arith.constant 1 : i32
    %10 = tpu.dynamic_rotate %9 by %c1_i32 dim 0 : vector<128x128xf32>, i32 -> vector<128x128xf32>
    %c127_i32 = arith.constant 127 : i32
    %11 = tpu.dynamic_rotate %9 by %c127_i32 dim 0 : vector<128x128xf32>, i32 -> vector<128x128xf32>
    %12 = vector.broadcast %4 : vector<128x1xf32> to vector<128x128xf32>
    %13 = arith.mulf %12, %9 : vector<128x128xf32>
    %14 = vector.broadcast %5 : vector<128x1xf32> to vector<128x128xf32>
    %15 = arith.mulf %14, %10 : vector<128x128xf32>
    %16 = arith.addf %13, %15 : vector<128x128xf32>
    %17 = vector.broadcast %6 : vector<128x1xf32> to vector<128x128xf32>
    %18 = arith.mulf %17, %11 : vector<128x128xf32>
    %19 = arith.addf %16, %18 : vector<128x128xf32>
    %20 = vector.extract_strided_slice %0 {offsets = [0, 0], sizes = [1, 128], strides = [1, 1]} : vector<7x128xf32> to vector<1x128xf32>
    %21 = vector.broadcast %20 : vector<1x128xf32> to vector<128x128xf32>
    %22 = arith.addf %19, %21 : vector<128x128xf32>
    %23 = arith.truncf %22 : vector<128x128xf32> to vector<128x128xbf16>
    %cst_11 = arith.constant 5.000000e-01 : bf16
    %24 = vector.broadcast %cst_11 : bf16 to vector<128x128xbf16>
    %25 = arith.mulf %24, %23 : vector<128x128xbf16>
    %26 = arith.mulf %23, %23 : vector<128x128xbf16>
    %27 = arith.mulf %26, %23 : vector<128x128xbf16>
    %cst_12 = arith.constant 4.467770e-02 : bf16
    %28 = vector.broadcast %cst_12 : bf16 to vector<128x128xbf16>
    %29 = arith.mulf %28, %27 : vector<128x128xbf16>
    %30 = arith.addf %23, %29 : vector<128x128xbf16>
    %cst_13 = arith.constant 7.968750e-01 : bf16
    %31 = vector.broadcast %cst_13 : bf16 to vector<128x128xbf16>
    %32 = arith.mulf %31, %30 : vector<128x128xbf16>
    %33 = math.tanh %32 : vector<128x128xbf16>
    %cst_14 = arith.constant 1.000000e+00 : bf16
    %34 = vector.broadcast %cst_14 : bf16 to vector<128x128xbf16>
    %35 = arith.addf %34, %33 : vector<128x128xbf16>
    %36 = arith.mulf %25, %35 : vector<128x128xbf16>
    %37 = arith.extf %36 : vector<128x128xbf16> to vector<128x128xf32>
    %cst_15 = arith.constant dense<0.000000e+00> : vector<128xf32>
    %38 = vector.multi_reduction <add>, %37, %cst_15 [1] : vector<128x128xf32> to vector<128xf32>
    %39 = vector.shape_cast %38 : vector<128xf32> to vector<128x1xf32>
    %cst_16 = arith.constant 1.280000e+02 : f32
    %40 = vector.broadcast %cst_16 : f32 to vector<128x1xf32>
    %41 = arith.divf %39, %40 : vector<128x1xf32>
    %42 = arith.mulf %37, %37 : vector<128x128xf32>
    %cst_17 = arith.constant dense<0.000000e+00> : vector<128xf32>
    %43 = vector.multi_reduction <add>, %42, %cst_17 [1] : vector<128x128xf32> to vector<128xf32>
    %44 = vector.shape_cast %43 : vector<128xf32> to vector<128x1xf32>
    %cst_18 = arith.constant 1.280000e+02 : f32
    %45 = vector.broadcast %cst_18 : f32 to vector<128x1xf32>
    %46 = arith.divf %44, %45 : vector<128x1xf32>
    %47 = vector.broadcast %41 : vector<128x1xf32> to vector<128x128xf32>
    %48 = arith.subf %37, %47 : vector<128x128xf32>
    %49 = arith.mulf %41, %41 : vector<128x1xf32>
    %50 = arith.subf %46, %49 : vector<128x1xf32>
    %cst_19 = arith.constant 9.99999974E-6 : f32
    %51 = vector.broadcast %cst_19 : f32 to vector<128x1xf32>
    %52 = arith.addf %50, %51 : vector<128x1xf32>
    %53 = math.rsqrt %52 : vector<128x1xf32>
    %54 = vector.broadcast %53 : vector<128x1xf32> to vector<128x128xf32>
    %55 = arith.mulf %48, %54 : vector<128x128xf32>
    %c0_20 = arith.constant 0 : index
    %c0_21 = arith.constant 0 : index
    %c0_22 = arith.constant 0 : index
    %56 = vector.load %arg4[%c0_20, %c0_21, %c0_22] : memref<4x128x128xbf16, #tpu.memory_space<vmem>>, vector<1x128x128xbf16>
    %57 = vector.shape_cast %56 : vector<1x128x128xbf16> to vector<128x128xbf16>
    %58 = arith.truncf %55 : vector<128x128xf32> to vector<128x128xbf16>
    %cst_23 = arith.constant dense<0.000000e+00> : vector<128x128xf32>
    %59 = tpu.matmul %58, %57, %cst_23 {dimension_numbers = #tpu.dot_dimension_numbers<[1], [0], [0], [1], [0, 0, 1, 1], [], []>} : vector<128x128xbf16>, vector<128x128xbf16>, vector<128x128xf32> -> vector<128x128xf32>
    %c1_i32_24 = arith.constant 1 : i32
    %60 = tpu.dynamic_rotate %59 by %c1_i32_24 dim 0 : vector<128x128xf32>, i32 -> vector<128x128xf32>
    %c127_i32_25 = arith.constant 127 : i32
    %61 = tpu.dynamic_rotate %59 by %c127_i32_25 dim 0 : vector<128x128xf32>, i32 -> vector<128x128xf32>
    %62 = vector.broadcast %4 : vector<128x1xf32> to vector<128x128xf32>
    %63 = arith.mulf %62, %59 : vector<128x128xf32>
    %64 = vector.broadcast %5 : vector<128x1xf32> to vector<128x128xf32>
    %65 = arith.mulf %64, %60 : vector<128x128xf32>
    %66 = arith.addf %63, %65 : vector<128x128xf32>
    %67 = vector.broadcast %6 : vector<128x1xf32> to vector<128x128xf32>
    %68 = arith.mulf %67, %61 : vector<128x128xf32>
    %69 = arith.addf %66, %68 : vector<128x128xf32>
    %70 = vector.extract_strided_slice %0 {offsets = [1, 0], sizes = [1, 128], strides = [1, 1]} : vector<7x128xf32> to vector<1x128xf32>
    %71 = vector.broadcast %70 : vector<1x128xf32> to vector<128x128xf32>
    %72 = arith.addf %69, %71 : vector<128x128xf32>
    %73 = arith.truncf %72 : vector<128x128xf32> to vector<128x128xbf16>
    %cst_26 = arith.constant 5.000000e-01 : bf16
    %74 = vector.broadcast %cst_26 : bf16 to vector<128x128xbf16>
    %75 = arith.mulf %74, %73 : vector<128x128xbf16>
    %76 = arith.mulf %73, %73 : vector<128x128xbf16>
    %77 = arith.mulf %76, %73 : vector<128x128xbf16>
    %cst_27 = arith.constant 4.467770e-02 : bf16
    %78 = vector.broadcast %cst_27 : bf16 to vector<128x128xbf16>
    %79 = arith.mulf %78, %77 : vector<128x128xbf16>
    %80 = arith.addf %73, %79 : vector<128x128xbf16>
    %cst_28 = arith.constant 7.968750e-01 : bf16
    %81 = vector.broadcast %cst_28 : bf16 to vector<128x128xbf16>
    %82 = arith.mulf %81, %80 : vector<128x128xbf16>
    %83 = math.tanh %82 : vector<128x128xbf16>
    %cst_29 = arith.constant 1.000000e+00 : bf16
    %84 = vector.broadcast %cst_29 : bf16 to vector<128x128xbf16>
    %85 = arith.addf %84, %83 : vector<128x128xbf16>
    %86 = arith.mulf %75, %85 : vector<128x128xbf16>
    %c0_30 = arith.constant 0 : index
    %c0_31 = arith.constant 0 : index
    %87 = vector.load %arg5[%c0_30, %c0_31] : memref<128x256xbf16, #tpu.memory_space<vmem>>, vector<128x256xbf16>
    %cst_32 = arith.constant dense<0.000000e+00> : vector<128x256xf32>
    %88 = tpu.matmul %86, %87, %cst_32 {dimension_numbers = #tpu.dot_dimension_numbers<[1], [0], [0], [1], [0, 0, 1, 1], [], []>} : vector<128x128xbf16>, vector<128x256xbf16>, vector<128x256xf32> -> vector<128x256xf32>
    %89 = vector.extract_strided_slice %88 {offsets = [0, 0], sizes = [128, 128], strides = [1, 1]} : vector<128x256xf32> to vector<128x128xf32>
    %90 = vector.extract_strided_slice %0 {offsets = [2, 0], sizes = [1, 128], strides = [1, 1]} : vector<7x128xf32> to vector<1x128xf32>
    %91 = vector.broadcast %90 : vector<1x128xf32> to vector<128x128xf32>
    %92 = arith.addf %89, %91 : vector<128x128xf32>
    %93 = arith.truncf %92 : vector<128x128xf32> to vector<128x128xbf16>
    %cst_33 = arith.constant 5.000000e-01 : bf16
    %94 = vector.broadcast %cst_33 : bf16 to vector<128x128xbf16>
    %95 = arith.mulf %94, %93 : vector<128x128xbf16>
    %96 = arith.mulf %93, %93 : vector<128x128xbf16>
    %97 = arith.mulf %96, %93 : vector<128x128xbf16>
    %cst_34 = arith.constant 4.467770e-02 : bf16
    %98 = vector.broadcast %cst_34 : bf16 to vector<128x128xbf16>
    %99 = arith.mulf %98, %97 : vector<128x128xbf16>
    %100 = arith.addf %93, %99 : vector<128x128xbf16>
    %cst_35 = arith.constant 7.968750e-01 : bf16
    %101 = vector.broadcast %cst_35 : bf16 to vector<128x128xbf16>
    %102 = arith.mulf %101, %100 : vector<128x128xbf16>
    %103 = math.tanh %102 : vector<128x128xbf16>
    %cst_36 = arith.constant 1.000000e+00 : bf16
    %104 = vector.broadcast %cst_36 : bf16 to vector<128x128xbf16>
    %105 = arith.addf %104, %103 : vector<128x128xbf16>
    %106 = arith.mulf %95, %105 : vector<128x128xbf16>
    %107 = vector.extract_strided_slice %88 {offsets = [0, 128], sizes = [128, 128], strides = [1, 1]} : vector<128x256xf32> to vector<128x128xf32>
    %108 = vector.extract_strided_slice %0 {offsets = [4, 0], sizes = [1, 128], strides = [1, 1]} : vector<7x128xf32> to vector<1x128xf32>
    %109 = vector.broadcast %108 : vector<1x128xf32> to vector<128x128xf32>
    %110 = arith.addf %107, %109 : vector<128x128xf32>
    %111 = arith.truncf %110 : vector<128x128xf32> to vector<128x128xbf16>
    %cst_37 = arith.constant 5.000000e-01 : bf16
    %112 = vector.broadcast %cst_37 : bf16 to vector<128x128xbf16>
    %113 = arith.mulf %112, %111 : vector<128x128xbf16>
    %114 = arith.mulf %111, %111 : vector<128x128xbf16>
    %115 = arith.mulf %114, %111 : vector<128x128xbf16>
    %cst_38 = arith.constant 4.467770e-02 : bf16
    %116 = vector.broadcast %cst_38 : bf16 to vector<128x128xbf16>
    %117 = arith.mulf %116, %115 : vector<128x128xbf16>
    %118 = arith.addf %111, %117 : vector<128x128xbf16>
    %cst_39 = arith.constant 7.968750e-01 : bf16
    %119 = vector.broadcast %cst_39 : bf16 to vector<128x128xbf16>
    %120 = arith.mulf %119, %118 : vector<128x128xbf16>
    %121 = math.tanh %120 : vector<128x128xbf16>
    %cst_40 = arith.constant 1.000000e+00 : bf16
    %122 = vector.broadcast %cst_40 : bf16 to vector<128x128xbf16>
    %123 = arith.addf %122, %121 : vector<128x128xbf16>
    %124 = arith.mulf %113, %123 : vector<128x128xbf16>
    %c1 = arith.constant 1 : index
    %c0_41 = arith.constant 0 : index
    %c0_42 = arith.constant 0 : index
    %125 = vector.load %arg4[%c1, %c0_41, %c0_42] : memref<4x128x128xbf16, #tpu.memory_space<vmem>>, vector<1x128x128xbf16>
    %126 = vector.shape_cast %125 : vector<1x128x128xbf16> to vector<128x128xbf16>
    %cst_43 = arith.constant dense<0.000000e+00> : vector<128x128xf32>
    %127 = tpu.matmul %106, %126, %cst_43 {dimension_numbers = #tpu.dot_dimension_numbers<[1], [0], [0], [1], [0, 0, 1, 1], [], []>} : vector<128x128xbf16>, vector<128x128xbf16>, vector<128x128xf32> -> vector<128x128xf32>
    %128 = vector.extract_strided_slice %0 {offsets = [3, 0], sizes = [1, 128], strides = [1, 1]} : vector<7x128xf32> to vector<1x128xf32>
    %129 = vector.broadcast %128 : vector<1x128xf32> to vector<128x128xf32>
    %130 = arith.addf %127, %129 : vector<128x128xf32>
    %131 = arith.truncf %130 : vector<128x128xf32> to vector<128x128xbf16>
    %cst_44 = arith.constant 5.000000e-01 : bf16
    %132 = vector.broadcast %cst_44 : bf16 to vector<128x128xbf16>
    %133 = arith.mulf %132, %131 : vector<128x128xbf16>
    %134 = arith.mulf %131, %131 : vector<128x128xbf16>
    %135 = arith.mulf %134, %131 : vector<128x128xbf16>
    %cst_45 = arith.constant 4.467770e-02 : bf16
    %136 = vector.broadcast %cst_45 : bf16 to vector<128x128xbf16>
    %137 = arith.mulf %136, %135 : vector<128x128xbf16>
    %138 = arith.addf %131, %137 : vector<128x128xbf16>
    %cst_46 = arith.constant 7.968750e-01 : bf16
    %139 = vector.broadcast %cst_46 : bf16 to vector<128x128xbf16>
    %140 = arith.mulf %139, %138 : vector<128x128xbf16>
    %141 = math.tanh %140 : vector<128x128xbf16>
    %cst_47 = arith.constant 1.000000e+00 : bf16
    %142 = vector.broadcast %cst_47 : bf16 to vector<128x128xbf16>
    %143 = arith.addf %142, %141 : vector<128x128xbf16>
    %144 = arith.mulf %133, %143 : vector<128x128xbf16>
    %c0_48 = arith.constant 0 : index
    %c0_49 = arith.constant 0 : index
    %145 = vector.load %arg6[%c0_48, %c0_49] : memref<128x2xbf16, #tpu.memory_space<vmem>>, vector<128x2xbf16>
    %cst_50 = arith.constant dense<0.000000e+00> : vector<128x2xf32>
    %146 = tpu.matmul %144, %145, %cst_50 {dimension_numbers = #tpu.dot_dimension_numbers<[1], [0], [0], [1], [0, 0, 1, 1], [], []>} : vector<128x128xbf16>, vector<128x2xbf16>, vector<128x2xf32> -> vector<128x2xf32>
    %147 = vector.extract_strided_slice %1 {offsets = [0, 0], sizes = [1, 2], strides = [1, 1]} : vector<1x4xf32> to vector<1x2xf32>
    %148 = vector.broadcast %147 : vector<1x2xf32> to vector<128x2xf32>
    %149 = arith.addf %146, %148 : vector<128x2xf32>
    %c0_51 = arith.constant 0 : index
    %c0_52 = arith.constant 0 : index
    %150 = vector.load %arg10[%c0_51, %c0_52] : memref<128x2xf32, #tpu.memory_space<vmem>>, vector<128x2xf32>
    tpu.vector_store %arg10[%c0_51, %c0_52], %149 {strides = array<i32>} : memref<128x2xf32, #tpu.memory_space<vmem>>, vector<128x2xf32>,
    %151 = arith.extf %124 : vector<128x128xbf16> to vector<128x128xf32>
    %152 = vector.extract_strided_slice %2 {offsets = [0, 0], sizes = [1, 128], strides = [1, 1]} : vector<2x128xf32> to vector<1x128xf32>
    %153 = vector.broadcast %152 : vector<1x128xf32> to vector<128x128xf32>
    %154 = arith.mulf %151, %153 : vector<128x128xf32>
    %cst_53 = arith.constant dense<0.000000e+00> : vector<128xf32>
    %155 = vector.multi_reduction <add>, %154, %cst_53 [1] : vector<128x128xf32> to vector<128xf32>
    %156 = vector.shape_cast %155 : vector<128xf32> to vector<128x1xf32>
    %157 = vector.extract_strided_slice %1 {offsets = [0, 2], sizes = [1, 1], strides = [1, 1]} : vector<1x4xf32> to vector<1x1xf32>
    %158 = vector.broadcast %157 : vector<1x1xf32> to vector<128x1xf32>
    %159 = arith.addf %156, %158 : vector<128x1xf32>
    %160 = vector.shape_cast %159 : vector<128x1xf32> to vector<16x8x1xf32>
    %161 = arith.extf %86 : vector<128x128xbf16> to vector<128x128xf32>
    %162 = vector.shape_cast %161 : vector<128x128xf32> to vector<16x8x128xf32>
    %cst_54 = arith.constant dense<0xFF800000> : vector<16x1xf32>
    %163 = vector.multi_reduction <maximumf>, %160, %cst_54 [1] : vector<16x8x1xf32> to vector<16x1xf32>
    %164 = vector.shape_cast %163 : vector<16x1xf32> to vector<16x1x1xf32>
    %165 = vector.broadcast %164 : vector<16x1x1xf32> to vector<16x8x1xf32>
    %166 = arith.subf %160, %165 : vector<16x8x1xf32>
    %167 = math.exp %166 : vector<16x8x1xf32>
    %cst_55 = arith.constant dense<0.000000e+00> : vector<16x1xf32>
    %168 = vector.multi_reduction <add>, %167, %cst_55 [1] : vector<16x8x1xf32> to vector<16x1xf32>
    %169 = vector.shape_cast %168 : vector<16x1xf32> to vector<16x1x1xf32>
    %170 = tpu.reciprocal %169 {approx = true} : vector<16x1x1xf32> -> vector<16x1x1xf32>
    %171 = vector.broadcast %170 : vector<16x1x1xf32> to vector<16x8x1xf32>
    %172 = arith.mulf %167, %171 : vector<16x8x1xf32>
    %173 = vector.broadcast %172 : vector<16x8x1xf32> to vector<16x8x128xf32>
    %174 = arith.mulf %173, %162 : vector<16x8x128xf32>
    %cst_56 = arith.constant dense<0.000000e+00> : vector<16x128xf32>
    %175 = vector.multi_reduction <add>, %174, %cst_56 [1] : vector<16x8x128xf32> to vector<16x128xf32>
    %c2 = arith.constant 2 : index
    %c0_57 = arith.constant 0 : index
    %c0_58 = arith.constant 0 : index
    %176 = vector.load %arg4[%c2, %c0_57, %c0_58] : memref<4x128x128xbf16, #tpu.memory_space<vmem>>, vector<1x128x128xbf16>
    %177 = vector.shape_cast %176 : vector<1x128x128xbf16> to vector<128x128xbf16>
    %178 = arith.truncf %175 : vector<16x128xf32> to vector<16x128xbf16>
    %cst_59 = arith.constant dense<0.000000e+00> : vector<16x128xf32>
    %179 = tpu.matmul %178, %177, %cst_59 {dimension_numbers = #tpu.dot_dimension_numbers<[1], [0], [0], [1], [0, 0, 1, 1], [], []>} : vector<16x128xbf16>, vector<128x128xbf16>, vector<16x128xf32> -> vector<16x128xf32>
    %180 = vector.extract_strided_slice %0 {offsets = [5, 0], sizes = [1, 128], strides = [1, 1]} : vector<7x128xf32> to vector<1x128xf32>
    %181 = vector.broadcast %180 : vector<1x128xf32> to vector<16x128xf32>
    %182 = arith.addf %179, %181 : vector<16x128xf32>
    %183 = arith.truncf %182 : vector<16x128xf32> to vector<16x128xbf16>
    %cst_60 = arith.constant 5.000000e-01 : bf16
    %184 = vector.broadcast %cst_60 : bf16 to vector<16x128xbf16>
    %185 = arith.mulf %184, %183 : vector<16x128xbf16>
    %186 = arith.mulf %183, %183 : vector<16x128xbf16>
    %187 = arith.mulf %186, %183 : vector<16x128xbf16>
    %cst_61 = arith.constant 4.467770e-02 : bf16
    %188 = vector.broadcast %cst_61 : bf16 to vector<16x128xbf16>
    %189 = arith.mulf %188, %187 : vector<16x128xbf16>
    %190 = arith.addf %183, %189 : vector<16x128xbf16>
    %cst_62 = arith.constant 7.968750e-01 : bf16
    %191 = vector.broadcast %cst_62 : bf16 to vector<16x128xbf16>
    %192 = arith.mulf %191, %190 : vector<16x128xbf16>
    %193 = math.tanh %192 : vector<16x128xbf16>
    %cst_63 = arith.constant 1.000000e+00 : bf16
    %194 = vector.broadcast %cst_63 : bf16 to vector<16x128xbf16>
    %195 = arith.addf %194, %193 : vector<16x128xbf16>
    %196 = arith.mulf %185, %195 : vector<16x128xbf16>
    %c3 = arith.constant 3 : index
    %c0_64 = arith.constant 0 : index
    %c0_65 = arith.constant 0 : index
    %197 = vector.load %arg4[%c3, %c0_64, %c0_65] : memref<4x128x128xbf16, #tpu.memory_space<vmem>>, vector<1x128x128xbf16>
    %198 = vector.shape_cast %197 : vector<1x128x128xbf16> to vector<128x128xbf16>
    %cst_66 = arith.constant dense<0.000000e+00> : vector<16x128xf32>
    %199 = tpu.matmul %196, %198, %cst_66 {dimension_numbers = #tpu.dot_dimension_numbers<[1], [0], [0], [1], [0, 0, 1, 1], [], []>} : vector<16x128xbf16>, vector<128x128xbf16>, vector<16x128xf32> -> vector<16x128xf32>
    %200 = vector.extract_strided_slice %0 {offsets = [6, 0], sizes = [1, 128], strides = [1, 1]} : vector<7x128xf32> to vector<1x128xf32>
    %201 = vector.broadcast %200 : vector<1x128xf32> to vector<16x128xf32>
    %202 = arith.addf %199, %201 : vector<16x128xf32>
    %203 = arith.truncf %202 : vector<16x128xf32> to vector<16x128xbf16>
    %cst_67 = arith.constant 5.000000e-01 : bf16
    %204 = vector.broadcast %cst_67 : bf16 to vector<16x128xbf16>
    %205 = arith.mulf %204, %203 : vector<16x128xbf16>
    %206 = arith.mulf %203, %203 : vector<16x128xbf16>
    %207 = arith.mulf %206, %203 : vector<16x128xbf16>
    %cst_68 = arith.constant 4.467770e-02 : bf16
    %208 = vector.broadcast %cst_68 : bf16 to vector<16x128xbf16>
    %209 = arith.mulf %208, %207 : vector<16x128xbf16>
    %210 = arith.addf %203, %209 : vector<16x128xbf16>
    %cst_69 = arith.constant 7.968750e-01 : bf16
    %211 = vector.broadcast %cst_69 : bf16 to vector<16x128xbf16>
    %212 = arith.mulf %211, %210 : vector<16x128xbf16>
    %213 = math.tanh %212 : vector<16x128xbf16>
    %cst_70 = arith.constant 1.000000e+00 : bf16
    %214 = vector.broadcast %cst_70 : bf16 to vector<16x128xbf16>
    %215 = arith.addf %214, %213 : vector<16x128xbf16>
    %216 = arith.mulf %205, %215 : vector<16x128xbf16>
    %217 = arith.extf %216 : vector<16x128xbf16> to vector<16x128xf32>
    %218 = vector.extract_strided_slice %2 {offsets = [1, 0], sizes = [1, 128], strides = [1, 1]} : vector<2x128xf32> to vector<1x128xf32>
    %219 = vector.broadcast %218 : vector<1x128xf32> to vector<16x128xf32>
    %220 = arith.mulf %217, %219 : vector<16x128xf32>
    %cst_71 = arith.constant dense<0.000000e+00> : vector<16xf32>
    %221 = vector.multi_reduction <add>, %220, %cst_71 [1] : vector<16x128xf32> to vector<16xf32>
    %222 = vector.shape_cast %221 : vector<16xf32> to vector<16x1xf32>
    %223 = vector.extract_strided_slice %1 {offsets = [0, 3], sizes = [1, 1], strides = [1, 1]} : vector<1x4xf32> to vector<1x1xf32>
    %224 = vector.broadcast %223 : vector<1x1xf32> to vector<16x1xf32>
    %225 = arith.addf %222, %224 : vector<16x1xf32>
    %c0_72 = arith.constant 0 : index
    %c0_73 = arith.constant 0 : index
    %226 = vector.load %arg11[%c0_72, %c0_73] : memref<16x1xf32, #tpu.memory_space<vmem>>, vector<16x1xf32>
    tpu.vector_store %arg11[%c0_72, %c0_73], %225 {strides = array<i32>} : memref<16x1xf32, #tpu.memory_space<vmem>>, vector<16x1xf32>,
    return
  }
  func.func @transform_0(%arg0: i32) -> (i32, i32) {
    %c0_i32 = arith.constant 0 : i32
    %c0_i32_0 = arith.constant 0 : i32
    return %arg0, %c0_i32 : i32, i32
  }
  func.func @transform_1(%arg0: i32) -> (i32, i32) {
    %c0_i32 = arith.constant 0 : i32
    %c0_i32_0 = arith.constant 0 : i32
    %c0_i32_1 = arith.constant 0 : i32
    return %c0_i32, %c0_i32_0 : i32, i32
  }
  func.func @transform_2(%arg0: i32) -> (i32, i32) {
    %c0_i32 = arith.constant 0 : i32
    %c0_i32_0 = arith.constant 0 : i32
    %c0_i32_1 = arith.constant 0 : i32
    return %c0_i32, %c0_i32_0 : i32, i32
  }
  func.func @transform_3(%arg0: i32) -> (i32, i32, i32) {
    %c0_i32 = arith.constant 0 : i32
    %c0_i32_0 = arith.constant 0 : i32
    %c0_i32_1 = arith.constant 0 : i32
    %c0_i32_2 = arith.constant 0 : i32
    return %c0_i32, %c0_i32_0, %c0_i32_1 : i32, i32, i32
  }
  func.func @transform_4(%arg0: i32) -> (i32, i32) {
    %c0_i32 = arith.constant 0 : i32
    %c0_i32_0 = arith.constant 0 : i32
    %c0_i32_1 = arith.constant 0 : i32
    return %c0_i32, %c0_i32_0 : i32, i32
  }
  func.func @transform_5(%arg0: i32) -> (i32, i32) {
    %c0_i32 = arith.constant 0 : i32
    %c0_i32_0 = arith.constant 0 : i32
    %c0_i32_1 = arith.constant 0 : i32
    return %c0_i32, %c0_i32_0 : i32, i32
  }
  func.func @transform_6(%arg0: i32) -> (i32, i32) {
    %c0_i32 = arith.constant 0 : i32
    %c0_i32_0 = arith.constant 0 : i32
    %c0_i32_1 = arith.constant 0 : i32
    return %c0_i32, %c0_i32_0 : i32, i32
  }
  func.func @transform_7(%arg0: i32) -> (i32, i32) {
    %c0_i32 = arith.constant 0 : i32
    %c0_i32_0 = arith.constant 0 : i32
    %c0_i32_1 = arith.constant 0 : i32
    return %c0_i32, %c0_i32_0 : i32, i32
  }
  func.func @transform_8(%arg0: i32) -> (i32, i32) {
    %c0_i32 = arith.constant 0 : i32
    %c0_i32_0 = arith.constant 0 : i32
    %c0_i32_1 = arith.constant 0 : i32
    return %c0_i32, %c0_i32_0 : i32, i32
  }
  func.func @transform_9(%arg0: i32) -> (i32, i32) {
    %c0_i32 = arith.constant 0 : i32
    %c0_i32_0 = arith.constant 0 : i32
    return %arg0, %c0_i32 : i32, i32
  }
  func.func @transform_10(%arg0: i32) -> (i32, i32) {
    %c0_i32 = arith.constant 0 : i32
    %c0_i32_0 = arith.constant 0 : i32
    return %arg0, %c0_i32 : i32, i32
  }
}

</mosaic_0001>

<bundles_post_ra>
// kernel: get_action_and_value.1
= control target key start
LH: loop header
LB: loop body
LE: loop exit
PB: predicated region body
PF: predicated region fallthrough
CT: control target
= control target key end

     0   :  { %s4267_s13 = smov 0   ;;  %s5839_s0 = inlined_call_operand.vmem [shape: bf16[256,4], index: 0, kind: input, shape index: {}]   ;;  %s5840_s1 = inlined_call_operand.vmem [shape: f32[128,3], index: 1, kind: input, shape index: {}]   ;;  %s5841_s2 = inlined_call_operand.vmem [shape: bf16[4,128], index: 2, kind: input, shape index: {}]   ;;  %s5842_s3 = inlined_call_operand.vmem [shape: bf16[4,128,128], index: 3, kind: input, shape index: {}]   ;;  %s5843_s4 = inlined_call_operand.vmem [shape: bf16[128,256], index: 4, kind: input, shape index: {}]   ;;  %s5844_s5 = inlined_call_operand.vmem [shape: bf16[128,2], index: 5, kind: input, shape index: {}]   ;;  %s5845_s6 = inlined_call_operand.vmem [shape: f32[2,128], index: 6, kind: input, shape index: {}]   ;;  %s5846_s7 = inlined_call_operand.vmem [shape: f32[7,128], index: 7, kind: input, shape index: {}]   ;;  %s5847_s8 = inlined_call_operand.vmem [shape: f32[1,4], index: 8, kind: input, shape index: {}]   ;;  %s5848_s9 = inlined_call_operand.vmem [shape: f32[256,2], index: 9, kind: output, shape index: {0}]   ;;  %s5849_s10 = inlined_call_operand.vmem [shape: f32[32,1], index: 10, kind: output, shape index: {1}]  }
   0x1 LB: > { %s3540_s14 = sadd.s32 4294967295, %s4204_s13   ;;  %p3544_p0 = scmp.ge.s32.totalorder %s4204_s13, 1  ;;  %s4204_s13 = sphi %s4267_s13, %s21_s13  }
   0x2   : > { %p316_p1 = scmp.lt.s32.totalorder %s4204_s13, 3 }
   0x4   : > { %p317_p2 = pnand %p3544_p0, %p316_p1 }
   0x6   : > { %320 = sbr.rel (%p317_p2) target bundleno = 2201 (0x899), region = 56 }
   0xd   : > { %v385_v0 = vld [vmem:[%s5840_s1] sm:$0xff]  ;;  %vm483_vm0 = vcmask 1041408   ;;  %v4206_v2 = vmov 1   ;;  %s3545_s19 = sshll.u32 %s3540_s14, 4  ;;  %v386_v4 = vld [vmem:[%s5840_s1 + $0x8] sm:$0xff]  ;;  %v4207_v5 = vmov 2   ;;  %v600_v58 = vlaneseq }
   0xe   : > { %v417_v1 = vld [vmem:[%s5841_s2] sm:$0x3]  ;;  %3918 = vset.pattern.permute.xlu1 %v4206_v2  ;;  %p360_p3 = scmp.lt.s32.totalorder %s3545_s19, 31  ;;  %3922 = vset.pattern.permute.xlu0 %v4207_v5  ;;  %vm458_vm1 = vcmask 31744   ;;  %v388_v7 = vld [vmem:[%s5840_s1 + $0x18] sm:$0xff]  ;;  %v5850_v11 = vmov 0  }
   0xf   : > { %3903 = vmatprep.subr.msk.bf16.mxu0 %vm483_vm0, %v417_v1  ;;  %v485_v3 = vsel %vm483_vm0, %v417_v1, 0  ;;  %749 = vperm.xlu1 %3918, %v385_v0   ;;  %v389_v6 = vld [vmem:[%s5840_s1 + $0x20] sm:$0xff]  ;;  %v392_v8 = vld [vmem:[%s5840_s1 + $0x38] sm:$0xff]  ;;  %v394_v13 = vld [vmem:[%s5840_s1 + $0x48] sm:$0xff]  ;;  %v4438_v61 = vshrl.u32 %v600_v58, 7  ;;  %vm2617_vm4 = vcmask 23568  }
  0x10   : > { %3750 = vmatpush3.bf16.msra.mxu0 %v485_v3  ;;  %s5965_s19 = smov (!%p360_p3, %s3545_s19), 31  ;;  %849 = vperm.xlu0 %3922, %v386_v4   ;;  %v387_v16 = vld [vmem:[%s5840_s1 + $0x10] sm:$0xff]  ;;  %v390_v19 = vld [vmem:[%s5840_s1 + $0x28] sm:$0xff]  ;;  %v397_v23 = vld [vmem:[%s5840_s1 + $0x60] sm:$0xff]  ;;  %vm4210_vm5 = vmmov 0   ;;  %vm3183_vm6 = vcmask 1041409  }
  0x11   : > { %s3546_s24 = sshll.u32 %s5965_s19, 2  ;;  %v395_v21 = vld [vmem:[%s5840_s1 + $0x50] sm:$0xff]  ;;  %v393_v24 = vld [vmem:[%s5840_s1 + $0x40] sm:$0xff]  ;;  %v398_v25 = vld [vmem:[%s5840_s1 + $0x68] sm:$0xff]  ;;  %vm602_vm2 = vcmp.lt.s32.totalorder %v4438_v61, 1  ;;  %vm635_vm3 = vcmp.lt.s32.totalorder %v4438_v61, 7 }
  0x12   : > { %s4300_s29 = scalar_lea.vmem %s5839_s0, %s3546_s24  ;;  %v391_v22 = vld [vmem:[%s5840_s1 + $0x30] sm:$0xff]  ;;  %v396_v27 = vld [vmem:[%s5840_s1 + $0x58] sm:$0xff]  ;;  %v5854_v3 = vsub.s32 0, %v4438_v61  ;;  %vm3185_vm7 = vcmask 1042434   ;;  %vm3187_vm8 = vcmask 1043459   ;;  %vm3189_vm9 = vcmask 1044484  }
  0x13   : > { %753 = vperm.xlu1 %3918, %v386_v4   ;;  %v3941_v9 = vld [vmem:[%s4300_s29] sm:$0xff]   ;;  %v3942_v10 = vld [vmem:[%s4300_s29 + $0x8] sm:$0xff]   ;;  %v3943_v12 = vld [vmem:[%s4300_s29 + $0x10] sm:$0xff]   ;;  %vm3191_vm10 = vcmask 1045509   ;;  %vm3193_vm11 = vcmask 1046534   ;;  %vm3195_vm12 = vcmask 1047559  }
  0x14   : > { %861 = vperm.xlu0 %3922, %v389_v6   ;;  %3751 = vmatprep.mubr.msk.bf16.mxu0 %vm458_vm1, %v3941_v9  ;;  %v3944_v14 = vld [vmem:[%s4300_s29 + $0x18] sm:$0xff]   ;;  %v3945_v15 = vld [vmem:[%s4300_s29 + $0x20] sm:$0xff]   ;;  %v3946_v17 = vld [vmem:[%s4300_s29 + $0x28] sm:$0xff]   ;;  %s3548_s24 = sshll.u32 %s5965_s19, 3  ;;  %vm2500_vm13 = vcmask 15360   ;;  %s4211_s11 = smov 125  }
  0x15   : > { %3752 = vmatmul.mubr.msk.bf16.vlgmr.msra.gmra.mrb[0].mxu0 %vm458_vm1, %v3942_v10  ;;  %v3947_v18 = vld [vmem:[%s4300_s29 + $0x30] sm:$0xff]   ;;  %v3948_v20 = vld [vmem:[%s4300_s29 + $0x38] sm:$0xff]   ;;  %s5733_s27 = scalar_lea.vmem %s5848_s9, %s3548_s24  ;;  %s3549_s12 = sshll.u32 %s3540_s14, 1  ;;  %vm3447_vm14 = vcmask 7168  }
  0x16   : > { %3755 = vmatprep.mubr.msk.bf16.mxu0 %vm458_vm1, %v3943_v12  ;;  %v399_v26 = vld [vmem:[%s5840_s1 + $0x70] sm:$0xff]  ;;  %v400_v28 = vld [vmem:[%s5840_s1 + $0x78] sm:$0xff]  ;;  %p372_p4 = scmp.lt.s32.totalorder %s3549_s12, 3 }
  0x17   : > { %3919 = vset.pattern.permute.xlu1 %v5850_v11 }
  0x18   : > { %669 = vperm.xlu1 %3919, %v388_v7   ;;  %873 = vperm.xlu0 %3922, %v392_v8   ;;  %s5967_s12 = smov (!%p372_p4, %s3549_s12), 3 }
  0x19   : > { %s3550_s15 = sshll.u32 %s5967_s12, 3 }
  0x1a   : > { %s375_s18 = scalar_lea.vmem %s5849_s10, %s3550_s15 }
  0x1c   : > { %3920 = vset.pattern.permute.xlu1 %v4206_v2  ;;  %881 = vperm.xlu0 %3922, %v394_v13  }
  0x1d   : > { %761 = vperm.xlu1 %3920, %v388_v7   ;;  %3756 = vmatmul.mubr.msk.bf16.gmra.mrb[4].mxu0 %vm458_vm1, %v3944_v14 }
  0x1e   : > { %3759 = vmatprep.mubr.msk.bf16.mxu0 %vm458_vm1, %v3945_v15 }
  0x20   : > { %3933 = vset.pattern.permute.xlu0 %v5850_v11 }
  0x21   : > { %3921 = vset.pattern.permute.xlu1 %v4207_v5  ;;  %654 = vperm.xlu0 %3933, %v385_v0  }
  0x22   : > { %845 = vperm.xlu1 %3921, %v385_v0  }
  0x25   : > { %659 = vperm.xlu0 %3933, %v386_v4   ;;  %3760 = vmatmul.mubr.msk.bf16.gmra.mrb[8].mxu0 %vm458_vm1, %v3946_v17 }
  0x26   : > { %853 = vperm.xlu1 %3921, %v387_v16   ;;  %3763 = vmatprep.mubr.msk.bf16.mxu0 %vm458_vm1, %v3947_v18 }
  0x29   : > { %664 = vperm.xlu0 %3933, %v387_v16  }
  0x2a   : > { %857 = vperm.xlu1 %3921, %v388_v7  }
  0x2d   : > { %674 = vperm.xlu0 %3933, %v389_v6   ;;  %3764 = vmatmul.mubr.msk.bf16.gmra.mrb[12].mxu0 %vm458_vm1, %v3948_v20  ;;  %v382_v20 = vld [vmem:[%s5846_s7] sm:$0x7f] }
  0x2e   : > { %3923 = vset.pattern.permute.xlu1 %v5850_v11  ;;  %1806 = vmatprep.mubr.bf16.mxu0 %v5850_v11 }
  0x2f   : > { %679 = vperm.xlu1 %3923, %v390_v19  }
  0x31   : > { %699 = vperm.xlu0 %3933, %v394_v13  }
  0x33   : > { %3924 = vset.pattern.permute.xlu1 %v4206_v2 }
  0x34   : > { %765 = vperm.xlu1 %3924, %v389_v6  }
  0x35   : > { %704 = vperm.xlu0 %3933, %v395_v21  }
  0x38   : > { %3925 = vset.pattern.permute.xlu1 %v5850_v11 }
  0x39   : > { %684 = vperm.xlu1 %3925, %v391_v22   ;;  %714 = vperm.xlu0 %3933, %v397_v23  }
  0x3d   : > { %689 = vperm.xlu1 %3925, %v392_v8   ;;  %3934 = vset.pattern.permute.xlu0 %v4206_v2 }
  0x3e   : > { %757 = vperm.xlu0 %3934, %v387_v16  }
  0x41   : > { %3926 = vset.pattern.permute.xlu1 %v4206_v2 }
  0x42   : > { %777 = vperm.xlu1 %3926, %v392_v8   ;;  %769 = vperm.xlu0 %3934, %v390_v19  }
  0x46   : > { %3927 = vset.pattern.permute.xlu1 %v4207_v5  ;;  %773 = vperm.xlu0 %3934, %v391_v22  }
  0x47   : > { %865 = vperm.xlu1 %3927, %v390_v19  }
  0x4a   : > { %789 = vperm.xlu0 %3934, %v395_v21  }
  0x4b   : > { %869 = vperm.xlu1 %3927, %v391_v22  }
  0x4e   : > { %801 = vperm.xlu0 %3934, %v398_v25  }
  0x4f   : > { %3928 = vset.pattern.permute.xlu1 %v5850_v11 }
  0x50   : > { %694 = vperm.xlu1 %3928, %v393_v24  }
  0x52   : > { %805 = vperm.xlu0 %3934, %v399_v26  }
  0x54   : > { %3929 = vset.pattern.permute.xlu1 %v4206_v2 }
  0x55   : > { %781 = vperm.xlu1 %3929, %v393_v24  }
  0x56   : > { %3939 = vset.pattern.permute.xlu0 %v4207_v5 }
  0x57   : > { %893 = vperm.xlu0 %3939, %v397_v23  }
  0x59   : > { %785 = vperm.xlu1 %3929, %v394_v13  }
  0x5b   : > { %905 = vperm.xlu0 %3939, %v400_v28  }
  0x5d   : > { %3930 = vset.pattern.permute.xlu1 %v5850_v11 }
  0x5e   : > { %709 = vperm.xlu1 %3930, %v396_v27  }
  0x62   : > { %3931 = vset.pattern.permute.xlu1 %v4206_v2 }
  0x63   : > { %793 = vperm.xlu1 %3931, %v396_v27  }
  0x67   : > { %3932 = vset.pattern.permute.xlu1 %v4207_v5 }
  0x68   : > { %877 = vperm.xlu1 %3932, %v393_v24  }
  0x6c   : > { %885 = vperm.xlu1 %3932, %v395_v21  }
  0x70   : > { %889 = vperm.xlu1 %3932, %v396_v27  }
  0x74   : > { %3935 = vset.pattern.permute.xlu1 %v5850_v11 }
  0x75   : > { %719 = vperm.xlu1 %3935, %v398_v25  }
  0x79   : > { %3936 = vset.pattern.permute.xlu1 %v4206_v2 }
  0x7a   : > { %797 = vperm.xlu1 %3936, %v397_v23  }
  0x7e   : > { %3937 = vset.pattern.permute.xlu1 %v5850_v11 }
  0x7f   : > { %724 = vperm.xlu1 %3937, %v399_v26  }
  0x83   : > { %729 = vperm.xlu1 %3937, %v400_v28  }
  0x87   : > { %3938 = vset.pattern.permute.xlu1 %v4206_v2 }
  0x88   : > { %809 = vperm.xlu1 %3938, %v400_v28  }
  0x8c   : > { %3940 = vset.pattern.permute.xlu1 %v4207_v5 }
  0x8d   : > { %897 = vperm.xlu1 %3940, %v398_v25  }
  0x8e   : > { %v4376_v29 = vpop.permute.xlu1 %749 }
  0x8f   : > { %5890 = vst [vmem:[#allocation2_spill] sm:$0xff] %v4376_v29  ;;  %v4390_v36 = vpop.permute.xlu0 %849 }
  0x90   : > { %5894 = vst [vmem:[#allocation6_spill] sm:$0xff] %v4390_v36 }
  0x91   : > { %901 = vperm.xlu1 %3940, %v399_v26  }
  0x92   : > { %v4378_v30 = vpop.permute.xlu1 %753 }
  0x93   : > { %v4394_v38 = vpop.permute.xlu0 %861 }
  0x97   : > { %v4380_v31 = vpop.permute.xlu1 %669  ;;  %v4398_v40 = vpop.permute.xlu0 %873 }
  0x98   : > { %5896 = vst [vmem:[#allocation8_spill] sm:$0xff] %v4398_v40 }
  0x9b   : > { %v4402_v42 = vpop.permute.xlu0 %881 }
  0x9c   : > { %v4382_v32 = vpop.permute.xlu1 %761  ;;  %5898 = vst [vmem:[#allocation10_spill] sm:$0xff] %v4402_v42 }
  0xa0   : > { %v4408_v45 = vpop.permute.xlu0 %654 }
  0xa1   : > { %v4384_v33 = vpop.permute.xlu1 %845  ;;  %5900 = vst [vmem:[#allocation12_spill] sm:$0xff] %v4408_v45 }
  0xa2   : > { %5891 = vst [vmem:[#allocation3_spill] sm:$0xff] %v4384_v33 }
  0xa4   : > { %v4412_v47 = vpop.permute.xlu0 %659 }
  0xa5   : > { %v4386_v34 = vpop.permute.xlu1 %853 }
  0xa6   : > { %5892 = vst [vmem:[#allocation4_spill] sm:$0xff] %v4386_v34 }
  0xa8   : > { %v4416_v49 = vpop.permute.xlu0 %664 }
  0xa9   : > { %v4388_v35 = vpop.permute.xlu1 %857 }
  0xaa   : > { %5893 = vst [vmem:[#allocation5_spill] sm:$0xff] %v4388_v35 }
  0xac   : > { %v4420_v51 = vpop.permute.xlu0 %674 }
  0xad   : > { %5902 = vst [vmem:[#allocation14_spill] sm:$0xff] %v4420_v51 }
  0xae   : > { %v4392_v37 = vpop.permute.xlu1 %679 }
  0xb0   : > { %v4426_v54 = vpop.permute.xlu0 %699 }
  0xb3   : > { %v4396_v39 = vpop.permute.xlu1 %765 }
  0xb4   : > { %5895 = vst [vmem:[#allocation7_spill] sm:$0xff] %v4396_v39  ;;  %v4430_v56 = vpop.permute.xlu0 %704 }
  0xb5   : > { %5906 = vst [vmem:[#allocation18_spill] sm:$0xff] %v4430_v56 }
  0xb8   : > { %v4400_v41 = vpop.permute.xlu1 %684  ;;  %v4434_v59 = vpop.permute.xlu0 %714 }
  0xb9   : > { %5897 = vst [vmem:[#allocation9_spill] sm:$0xff] %v4400_v41  ;;  %5907 = vst [vmem:[#allocation19_spill] sm:$0xff] %v4434_v59 }
  0xbc   : > { %v4404_v43 = vpop.permute.xlu1 %689 }
  0xbd   : > { %5899 = vst [vmem:[#allocation11_spill] sm:$0xff] %v4404_v43  ;;  %v4440_v62 = vpop.permute.xlu0 %757 }
  0xc1   : > { %v4406_v44 = vpop.permute.xlu1 %777  ;;  %v4453_v15 = vpop.permute.xlu0 %769 }
  0xc2   : > { %5911 = vst [vmem:[#allocation23_spill] sm:$0xff] %v4453_v15 }
  0xc6   : > { %v4410_v46 = vpop.permute.xlu1 %865 }
  0xca   : > { %v4414_v48 = vpop.permute.xlu1 %869 }
  0xcb   : > { %5901 = vst [vmem:[#allocation13_spill] sm:$0xff] %v4414_v48 }
  0xcf   : > { %v4418_v50 = vpop.permute.xlu1 %694 }
  0xd4   : > { %v4422_v52 = vpop.permute.xlu1 %781 }
  0xd5   : > { %5903 = vst [vmem:[#allocation15_spill] sm:$0xff] %v4422_v52 }
  0xd8   : > { %v4424_v53 = vpop.permute.xlu1 %785 }
  0xd9   : > { %5904 = vst [vmem:[#allocation16_spill] sm:$0xff] %v4424_v53 }
  0xdd   : > { %v4428_v55 = vpop.permute.xlu1 %709 }
  0xde   : > { %5905 = vst [vmem:[#allocation17_spill] sm:$0xff] %v4428_v55 }
  0xe2   : > { %v4432_v57 = vpop.permute.xlu1 %793 }
  0xe7   : > { %v4436_v60 = vpop.permute.xlu1 %877 }
  0xe8   : > { %5908 = vst [vmem:[#allocation20_spill] sm:$0xff] %v4436_v60  ;;  %v3753_v63 = vpop.f32.mrb[0].mxu0 }
  0xe9   : > { %v4444_v1 = vpop.f32.mrb[1].mxu0  ;;  %v586_v4 = vrot.slane %v3753_v63, 7  ;;  %v621_v5 = vrot.slane %v3753_v63, 1  ;;  %v734_v9 = vmul.f32 %v3753_v63, %v4416_v49 }
  0xea   : > { %v3754_v2 = vpop.f32.mrb[2].mxu0  ;;  %v5853_v10 = vrot.slane %v4444_v1, 7  ;;  %v5852_v16 = vrot.slane %v4444_v1, 1  ;;  %v4482_v58 = vmul.f32 %v4408_v45, %v4444_v1 }
  0xeb   : > { %v4442_v0 = vpop.permute.xlu1 %885  ;;  %v587_v6 = vrot.slane %v3754_v2, 7  ;;  %v622_v7 = vrot.slane %v3754_v2, 1  ;;  %v524_v8 = vpop.f32.mrb[3].mxu0  ;;  %v735_v19 = vmul.f32 %v3754_v2, %v4380_v31 }
  0xec   : > { %5909 = vst [vmem:[#allocation21_spill] sm:$0xff] %v4442_v0  ;;  %v585_v12 = vrot.slane %v524_v8, 7  ;;  %v620_v13 = vrot.slane %v524_v8, 1  ;;  %v733_v24 = vmul.f32 %v4412_v47, %v524_v8 }
  0xed   : > { %v615_v17 = vsel %vm602_vm2, %v586_v4, %v587_v6  ;;  %v648_v18 = vsel %vm635_vm3, %v621_v5, %v622_v7 }
  0xee   : > { %v815_v21 = vmul.f32 %v4382_v32, %v615_v17  ;;  %v616_v22 = vsel %vm602_vm2, %v585_v12, %v586_v4  ;;  %v617_v23 = vsel %vm602_vm2, %v5853_v10, %v585_v12  ;;  %v649_v25 = vsel %vm635_vm3, %v620_v13, %v621_v5  ;;  %v4495_v10 = vpop.permute.xlu0 %773 }
  0xef   : > { %v4451_v14 = vpop.permute.xlu1 %889  ;;  %v650_v26 = vsel %vm635_vm3, %v5852_v16, %v620_v13  ;;  %v813_v27 = vmul.f32 %v4378_v30, %v617_v23  ;;  %v814_v28 = vmul.f32 %v4440_v62, %v616_v22  ;;  %v910_v2 = vmul.f32 %v4386_v34, %v648_v18  ;;  %5913 = vst [vmem:[#allocation25_spill] sm:$0xff] %v4495_v10 }
  0xf0   : > { %5910 = vst [vmem:[#allocation22_spill] sm:$0xff] %v4451_v14  ;;  %v831_v63 = vadd.f32 %v815_v21, %v735_v19  ;;  %v4487_v4 = vrot.slane %v382_v20, %v5854_v3  ;;  %v3757_v5 = vpop.f32.mrb[4].mxu0  ;;  %v4490_v13 = vmul.f32 %v4384_v33, %v650_v26  ;;  %v909_v17 = vmul.f32 %v4390_v36, %v649_v25 }
  0xf1   : > { %v829_v8 = vadd.f32 %v813_v27, %v733_v24  ;;  %v830_v12 = vadd.f32 %v814_v28, %v734_v9  ;;  %v537_v22 = vpop.f32.mrb[5].mxu0  ;;  %v590_v11 = vrot.slane %v3757_v5, 7  ;;  %v625_v16 = vrot.slane %v3757_v5, 1 }
  0xf2   : > { %v588_v19 = vrot.slane %v537_v22, 7  ;;  %v623_v21 = vrot.slane %v537_v22, 1  ;;  %v3758_v18 = vpop.f32.mrb[6].mxu0  ;;  %v738_v26 = vmul.f32 %v3757_v5, %v4400_v41  ;;  %v736_v45 = vmul.f32 %v4420_v51, %v537_v22 }
  0xf3   : > { %v4497_v20 = vadd.f32 %v909_v17, %v829_v8  ;;  %v926_v3 = vadd.f32 %v910_v2, %v830_v12  ;;  %v591_v24 = vrot.slane %v3758_v18, 7  ;;  %v626_v9 = vrot.slane %v3758_v18, 1  ;;  %v540_v27 = vpop.f32.mrb[7].mxu0 }
  0xf4   : > { %v4493_v23 = vpop.permute.xlu1 %719  ;;  %v614_v25 = vsel %vm602_vm2, %v587_v6, %v588_v19  ;;  %v647_v28 = vsel %vm635_vm3, %v622_v7, %v623_v21  ;;  %v589_v33 = vrot.slane %v540_v27, 7  ;;  %v739_v2 = vmul.f32 %v3758_v18, %v4404_v43 }
  0xf5   : > { %5912 = vst [vmem:[#allocation24_spill] sm:$0xff] %v4493_v23  ;;  %v816_v36 = vmul.f32 %v4396_v39, %v614_v25  ;;  %v911_v8 = vmul.f32 %v4388_v35, %v647_v28  ;;  %v611_v12 = vsel %vm602_vm2, %v590_v11, %v591_v24  ;;  %v644_v5 = vsel %vm635_vm3, %v625_v16, %v626_v9 }
  0xf6   : > { %v612_v6 = vsel %vm602_vm2, %v589_v33, %v590_v11  ;;  %v613_v7 = vsel %vm602_vm2, %v588_v19, %v589_v33  ;;  %v946_v22 = vadd.f32 %v4487_v4, %v926_v3  ;;  %v819_v18 = vmul.f32 %v4406_v44, %v611_v12  ;;  %v4523_v11 = vpop.permute.xlu0 %789 }
  0xf7   : > { %v832_v25 = vadd.f32 %v816_v36, %v736_v45  ;;  %v927_v28 = vadd.f32 %v911_v8, %v831_v63  ;;  %v624_v43 = vrot.slane %v540_v27, 1  ;;  %v737_v35 = vmul.f32 %v4392_v37, %v540_v27  ;;  %5915 = vst [vmem:[#allocation27_spill] sm:$0xff] %v4523_v11 }
  0xf8   : > { %v817_v39 = vmul.f32 %v4453_v15, %v613_v7  ;;  %v818_v51 = vmul.f32 %v4495_v10, %v612_v6  ;;  %v3761_v41 = vpop.f32.mrb[8].mxu0  ;;  %v835_v19 = vadd.f32 %v819_v18, %v739_v2  ;;  %v914_v34 = vmul.f32 %v4414_v48, %v644_v5 }
  0xf9   : > { %v4516_v17 = vpop.permute.xlu1 %797  ;;  %v947_v33 = vadd.f32 %v4487_v4, %v927_v28  ;;  %v594_v3 = vrot.slane %v3761_v41, 7  ;;  %v553_v36 = vpop.f32.mrb[9].mxu0  ;;  %v645_v45 = vsel %vm635_vm3, %v624_v43, %v625_v16  ;;  %v646_v63 = vsel %vm635_vm3, %v623_v21, %v624_v43 }
  0xfa   : > { %5914 = vst [vmem:[#allocation26_spill] sm:$0xff] %v4516_v17  ;;  %v833_v27 = vadd.f32 %v817_v39, %v737_v35  ;;  %v834_v8 = vadd.f32 %v818_v51, %v738_v26  ;;  %v4531_v12 = vpop.f32.mrb[10].mxu0  ;;  %v912_v7 = vmul.f32 %v4394_v38, %v646_v63  ;;  %v913_v2 = vmul.f32 %v4410_v46, %v645_v45 }
  0xfb   : > { %v4533_v6 = vpack.c.bf16 %v947_v33, %v946_v22  ;;  %v629_v28 = vrot.slane %v3761_v41, 1  ;;  %v556_v5 = vpop.f32.mrb[11].mxu0  ;;  %v742_v16 = vmul.f32 %v3761_v41, %v4430_v56  ;;  %v592_v10 = vrot.slane %v553_v36, 7  ;;  %v4549_v41 = vpop.permute.xlu0 %801 }
  0xfc   : > { %v930_v48 = vadd.f32 %v914_v34, %v834_v8  ;;  %v627_v15 = vrot.slane %v553_v36, 1  ;;  %v928_v43 = vadd.f32 %v912_v7, %v832_v25  ;;  %v929_v35 = vadd.f32 %v913_v2, %v833_v27  ;;  %5917 = vst [vmem:[#allocation29_spill] sm:$0xff] %v4549_v41 }
  0xfd   : > { %v595_v39 = vrot.slane %v4531_v12, 7  ;;  %v630_v51 = vrot.slane %v4531_v12, 1  ;;  %v610_v21 = vsel %vm602_vm2, %v591_v24, %v592_v10  ;;  %v740_v22 = vmul.f32 %v4418_v50, %v553_v36 }
  0xfe   : > { %v4537_v18 = vpop.permute.xlu1 %724  ;;  %v643_v26 = vsel %vm635_vm3, %v626_v9, %v627_v15  ;;  %v743_v34 = vmul.f32 %v4531_v12, %v4428_v55  ;;  %v948_v25 = vadd.f32 %v4487_v4, %v928_v43  ;;  %v949_v33 = vadd.f32 %v4487_v4, %v929_v35 }
  0xff   : > { %5916 = vst [vmem:[#allocation28_spill] sm:$0xff] %v4537_v18  ;;  %v820_v45 = vmul.f32 %v4422_v52, %v610_v21  ;;  %v915_v63 = vmul.f32 %v4398_v40, %v643_v26  ;;  %v607_v24 = vsel %vm602_vm2, %v594_v3, %v595_v39  ;;  %v640_v9 = vsel %vm635_vm3, %v629_v28, %v630_v51 }
 0x100   : > { %v593_v36 = vrot.slane %v556_v5, 7  ;;  %v628_v8 = vrot.slane %v556_v5, 1  ;;  %v4561_v12 = vpop.f32.mrb[12].mxu0  ;;  %v4563_v7 = vpack.c.bf16 %v949_v33, %v948_v25  ;;  %v823_v35 = vmul.f32 %v4432_v57, %v607_v24 }
 0x101   : > { %v836_v2 = vadd.f32 %v820_v45, %v740_v22  ;;  %v931_v43 = vadd.f32 %v915_v63, %v835_v19  ;;  %v569_v21 = vpop.f32.mrb[13].mxu0  ;;  %v950_v26 = vadd.f32 %v4487_v4, %v930_v48  ;;  %v918_v19 = vmul.f32 %v4442_v0, %v640_v9 }
 0x102   : > { %v4555_v27 = vpop.permute.xlu1 %729  ;;  %v608_v56 = vsel %vm602_vm2, %v593_v36, %v594_v3  ;;  %v609_v55 = vsel %vm602_vm2, %v592_v10, %v593_v36  ;;  %v641_v40 = vsel %vm635_vm3, %v628_v8, %v629_v28  ;;  %v3766_v52 = vpop.f32.mrb[14].mxu0  ;;  %v839_v33 = vadd.f32 %v823_v35, %v743_v34 }
 0x103   : > { %5918 = vst [vmem:[#allocation30_spill] sm:$0xff] %v4555_v27  ;;  %v951_v25 = vadd.f32 %v4487_v4, %v931_v43  ;;  %v642_v22 = vsel %vm635_vm3, %v627_v15, %v628_v8  ;;  %v572_v45 = vpop.f32.mrb[15].mxu0  ;;  %v741_v48 = vmul.f32 %v4426_v54, %v556_v5  ;;  %v821_v3 = vmul.f32 %v4424_v53, %v609_v55  ;;  %v4583_v28 = vpop.permute.xlu0 %805 }
 0x104   : > { %v822_v63 = vmul.f32 %v4523_v11, %v608_v56  ;;  %v916_v10 = vmul.f32 %v4436_v60, %v642_v22  ;;  %5920 = vst [vmem:[#allocation32_spill] sm:$0xff] %v4583_v28  ;;  %v917_v34 = vmul.f32 %v4402_v42, %v641_v40  ;;  %v598_v9 = vrot.slane %v4561_v12, 7 }
 0x105   : > { %v4585_v36 = vpack.c.bf16 %v951_v25, %v950_v26  ;;  %v633_v15 = vrot.slane %v4561_v12, 1  ;;  %v837_v8 = vadd.f32 %v821_v3, %v741_v48  ;;  %v596_v55 = vrot.slane %v569_v21, 7 }
 0x106   : > { %v838_v5 = vadd.f32 %v822_v63, %v742_v16  ;;  %v932_v43 = vadd.f32 %v916_v10, %v836_v2  ;;  %v746_v56 = vmul.f32 %v4561_v12, %v4537_v18  ;;  %v631_v35 = vrot.slane %v569_v21, 1 }
 0x107   : > { %v4581_v24 = vpop.permute.xlu1 %809  ;;  %v744_v22 = vmul.f32 %v4434_v59, %v569_v21  ;;  %v599_v60 = vrot.slane %v3766_v52, 7  ;;  %v933_v0 = vadd.f32 %v917_v34, %v837_v8  ;;  %v606_v40 = vsel %vm602_vm2, %v595_v39, %v596_v55  ;;  %v4596_v11 = vpop.permute.xlu0 %893 }
 0x108   : > { %5919 = vst [vmem:[#allocation31_spill] sm:$0xff] %v4581_v24  ;;  %v934_v26 = vadd.f32 %v918_v19, %v838_v5  ;;  %v634_v25 = vrot.slane %v3766_v52, 1  ;;  %v952_v42 = vadd.f32 %v4487_v4, %v932_v43  ;;  %5921 = vst [vmem:[#allocation33_spill] sm:$0xff] %v4596_v11  ;;  %v639_v16 = vsel %vm635_vm3, %v630_v51, %v631_v35 }
 0x109   : > { %v824_v2 = vmul.f32 %v4516_v17, %v606_v40  ;;  %v5922_v12 = vrot.slane %v4444_v1, 7  ;;  %v953_v19 = vadd.f32 %v4487_v4, %v933_v0  ;;  %v919_v39 = vmul.f32 %v4451_v14, %v639_v16 }
 0x10a   : > { %v747_v3 = vmul.f32 %v3766_v52, %v4555_v27  ;;  %v597_v34 = vrot.slane %v572_v45, 7  ;;  %v632_v51 = vrot.slane %v572_v45, 1  ;;  %v745_v8 = vmul.f32 %v4493_v23, %v572_v45 }
 0x10b   : > { %v618_v21 = vsel %vm602_vm2, %v599_v60, %v5922_v12  ;;  %v840_v10 = vadd.f32 %v824_v2, %v744_v22  ;;  %v4612_v5 = vpack.c.bf16 %v953_v19, %v952_v42  ;;  %v935_v43 = vadd.f32 %v919_v39, %v839_v33 }
 0x10c   : > { %v4605_v48 = vpop.permute.xlu1 %897  ;;  %v812_v63 = vmul.f32 %v4376_v29, %v618_v21  ;;  %v5924_v12 = vrot.slane %v4444_v1, 1  ;;  %v954_v16 = vadd.f32 %v4487_v4, %v934_v26  ;;  %v604_v52 = vsel %vm602_vm2, %v597_v34, %v598_v9  ;;  %v4632_v26 = vpop.permute.xlu0 %905 }
 0x10d   : > { %5923 = vst [vmem:[#allocation34_spill] sm:$0xff] %v4605_v48  ;;  %v605_v22 = vsel %vm602_vm2, %v596_v55, %v597_v34  ;;  %v638_v42 = vsel %vm635_vm3, %v631_v35, %v632_v51  ;;  %v955_v33 = vadd.f32 %v4487_v4, %v935_v43  ;;  %5926 = vst [vmem:[#allocation36_spill] sm:$0xff] %v4632_v26 }
 0x10e   : > { %v828_v40 = vadd.f32 %v812_v63, %v4482_v58  ;;  %v651_v0 = vsel %vm635_vm3, %v634_v25, %v5924_v12  ;;  %v825_v1 = vmul.f32 %v4549_v41, %v605_v22  ;;  %v920_v45 = vmul.f32 %v4596_v11, %v638_v42 }
 0x10f   : > { %v603_v21 = vsel %vm602_vm2, %v598_v9, %v599_v60  ;;  %v637_v55 = vsel %vm635_vm3, %v632_v51, %v633_v15  ;;  %v636_v35 = vsel %vm635_vm3, %v633_v15, %v634_v25  ;;  %v826_v19 = vmul.f32 %v4583_v28, %v604_v52 }
 0x110   : > { %v924_v58 = vadd.f32 %v4490_v13, %v828_v40  ;;  %v4630_v2 = vpop.permute.xlu1 %901  ;;  %v4641_v13 = vpack.c.bf16 %v955_v33, %v954_v16  ;;  %v841_v39 = vadd.f32 %v825_v1, %v745_v8  ;;  %v936_v63 = vadd.f32 %v920_v45, %v840_v10 }
 0x111   : > { %5925 = vst [vmem:[#allocation35_spill] sm:$0xff] %v4630_v2  ;;  %v827_v34 = vmul.f32 %v4581_v24, %v603_v21  ;;  %v921_v43 = vmul.f32 %v4605_v48, %v637_v55  ;;  %v842_v40 = vadd.f32 %v826_v19, %v746_v56  ;;  %v922_v12 = vmul.f32 %v4630_v2, %v636_v35 }
 0x112   : > { %v944_v60 = vadd.f32 %v4487_v4, %v924_v58  ;;  %v923_v9 = vmul.f32 %v4632_v26, %v651_v0  ;;  %v977_v15 = vmul.bf16 %v4533_v6, %v4533_v6  ;;  %v978_v10 = vmul.bf16 %v4563_v7, %v4563_v7 }
 0x113   : > { %v843_v25 = vadd.f32 %v827_v34, %v747_v3  ;;  %v937_v51 = vadd.f32 %v921_v43, %v841_v39  ;;  %v938_v16 = vadd.f32 %v922_v12, %v842_v40  ;;  %v945_v8 = vadd.f32 %v4487_v4, %v4497_v20 }
 0x114   : > { %v956_v56 = vadd.f32 %v4487_v4, %v936_v63  ;;  %v985_v52 = vmul.bf16 %v977_v15, %v4533_v6  ;;  %v979_v22 = vmul.bf16 %v4585_v36, %v4585_v36  ;;  %v986_v33 = vmul.bf16 %v978_v10, %v4563_v7 }
 0x115   : > { %v939_v0 = vadd.f32 %v923_v9, %v843_v25  ;;  %v957_v42 = vadd.f32 %v4487_v4, %v937_v51  ;;  %v958_v3 = vadd.f32 %v4487_v4, %v938_v16  ;;  %v4662_v45 = vpack.c.bf16 %v945_v8, %v944_v60 }
 0x116   : > { %v993_v58 = vmul.bf16 1027030327, %v985_v52  ;;  %v987_v1 = vmul.bf16 %v979_v22, %v4585_v36  ;;  %v994_v55 = vmul.bf16 1027030327, %v986_v33  ;;  %v980_v43 = vmul.bf16 %v4612_v5, %v4612_v5 }
 0x117   : > { %v959_v20 = vadd.f32 %v4487_v4, %v939_v0  ;;  %v4665_v21 = vpack.c.bf16 %v957_v42, %v956_v56  ;;  %v976_v60 = vmul.bf16 %v4662_v45, %v4662_v45  ;;  %v981_v10 = vmul.bf16 %v4641_v13, %v4641_v13 }
 0x118   : > { %v1001_v35 = vadd.bf16 %v993_v58, %v4533_v6  ;;  %v1002_v39 = vadd.bf16 %v994_v55, %v4563_v7  ;;  %v995_v34 = vmul.bf16 1027030327, %v987_v1  ;;  %v988_v4 = vmul.bf16 %v980_v43, %v4612_v5 }
 0x119   : > { %v4668_v19 = vpack.c.bf16 %v959_v20, %v958_v3  ;;  %v984_v25 = vmul.bf16 %v976_v60, %v4662_v45  ;;  %v969_v56 = vmul.bf16 1056980736, %v4533_v6  ;;  %v989_v33 = vmul.bf16 %v981_v10, %v4641_v13 }
 0x11a   : > { %v1009_v63 = vmul.bf16 1061961548, %v1001_v35  ;;  %v1010_v40 = vmul.bf16 1061961548, %v1002_v39  ;;  %v1003_v12 = vadd.bf16 %v995_v34, %v4585_v36  ;;  %v996_v15 = vmul.bf16 1027030327, %v988_v4 }
 0x11b   : > { %v992_v16 = vmul.bf16 1027030327, %v984_v25  ;;  %v970_v55 = vmul.bf16 1056980736, %v4563_v7  ;;  %v997_v35 = vmul.bf16 1027030327, %v989_v33 }
 0x11c   : > { %4013 = vtanh.bf16 %v1009_v63  ;;  %v1011_v9 = vmul.bf16 1061961548, %v1003_v12  ;;  %v1004_v51 = vadd.bf16 %v996_v15, %v4612_v5  ;;  %v971_v15 = vmul.bf16 1056980736, %v4585_v36 }
 0x11d   : > { %4015 = vtanh.bf16 %v1010_v40  ;;  %v1000_v3 = vadd.bf16 %v992_v16, %v4662_v45  ;;  %v982_v40 = vmul.bf16 %v4665_v21, %v4665_v21  ;;  %v1005_v12 = vadd.bf16 %v997_v35, %v4641_v13 }
 0x11e   : > { %4017 = vtanh.bf16 %v1011_v9  ;;  %v1012_v42 = vmul.bf16 1061961548, %v1004_v51  ;;  %v983_v9 = vmul.bf16 %v4668_v19, %v4668_v19  ;;  %v972_v33 = vmul.bf16 1056980736, %v4612_v5 }
 0x11f   : > { %v1008_v6 = vmul.bf16 1061961548, %v1000_v3  ;;  %v1013_v25 = vmul.bf16 1061961548, %v1005_v12  ;;  %v990_v51 = vmul.bf16 %v982_v40, %v4665_v21 }
 0x120   : > { %4019 = vtanh.bf16 %v1012_v42 }
 0x121   : > { %4021 = vtanh.bf16 %v1008_v6 }
 0x122   : > { %4023 = vtanh.bf16 %v1013_v25 }
 0x127   : > { %v4014_v8 = vpop.eup %4013 }
 0x128   : > { %v1025_v52 = vadd.bf16 1065369472, %v4014_v8  ;;  %v4016_v22 = vpop.eup %4015 }
 0x129   : > { %v1026_v20 = vadd.bf16 1065369472, %v4016_v22  ;;  %v4018_v43 = vpop.eup %4017  ;;  %v991_v22 = vmul.bf16 %v983_v9, %v4668_v19 }
 0x12a   : > { %v1033_v0 = vmul.bf16 %v1025_v52, %v969_v56  ;;  %v1027_v60 = vadd.bf16 1065369472, %v4018_v43  ;;  %v998_v52 = vmul.bf16 1027030327, %v990_v51 }
 0x12b   : > { %v1034_v34 = vmul.bf16 %v1026_v20, %v970_v55  ;;  %v4020_v56 = vpop.eup %4019  ;;  %v999_v55 = vmul.bf16 1027030327, %v991_v22 }
 0x12c   : > { %v4684_v58 = vunpack.c.h.bf16 %v1033_v0  ;;  %v4686_v1 = vunpack.c.l.bf16 %v1033_v0  ;;  %v1035_v8 = vmul.bf16 %v1027_v60, %v971_v15  ;;  %v1028_v42 = vadd.bf16 1065369472, %v4020_v56  ;;  %v4022_v3 = vpop.eup %4021 }
 0x12d   : > { %v4698_v7 = vunpack.c.h.bf16 %v1034_v34  ;;  %v4700_v4 = vunpack.c.l.bf16 %v1034_v34  ;;  %v1006_v20 = vadd.bf16 %v998_v52, %v4665_v21  ;;  %v968_v34 = vmul.bf16 1056980736, %v4662_v45  ;;  %v4024_v9 = vpop.eup %4023 }
 0x12e   : > { %1062 = vadd.xlane.f32.xlu1 %v4684_v58  ;;  %1060 = vadd.xlane.f32.xlu0 %v4686_v1  ;;  %v1108_v39 = vmul.f32 %v4684_v58, %v4684_v58  ;;  %v1107_v63 = vmul.f32 %v4686_v1, %v4686_v1  ;;  %v4713_v0 = vunpack.c.h.bf16 %v1035_v8  ;;  %v4715_v36 = vunpack.c.l.bf16 %v1035_v8 }
 0x12f   : > { %v1110_v16 = vmul.f32 %v4698_v7, %v4698_v7  ;;  %v1109_v10 = vmul.f32 %v4700_v4, %v4700_v4  ;;  %v1014_v43 = vmul.bf16 1061961548, %v1006_v20  ;;  %v1007_v40 = vadd.bf16 %v999_v55, %v4668_v19 }
 0x130   : > { %v1112_v6 = vmul.f32 %v4713_v0, %v4713_v0  ;;  %v1111_v35 = vmul.f32 %v4715_v36, %v4715_v36  ;;  %v1029_v45 = vadd.bf16 1065369472, %v4024_v9 }
 0x131   : > { %4025 = vtanh.bf16 %v1014_v43  ;;  %v1015_v15 = vmul.bf16 1061961548, %v1007_v40  ;;  %v3951_v40 = vld [vmem:[%s5842_s3 + $0x10] sm:$0xff]  }
 0x132   : > { %1127 = vadd.xlane.f32.xlu1 %v1108_v39  ;;  %1125 = vadd.xlane.f32.xlu0 %v1107_v63  ;;  %v1036_v39 = vmul.bf16 %v1028_v42, %v972_v33  ;;  %v1024_v63 = vadd.bf16 1065369472, %v4022_v3  ;;  %v3949_v3 = vld [vmem:[%s5842_s3] sm:$0xff]  }
 0x133   : > { %4027 = vtanh.bf16 %v1015_v15  ;;  %3767 = vmatprep.subr.bf16.mxu1 %v3949_v3 }
 0x134   : > { %v4727_v12 = vunpack.c.h.bf16 %v1036_v39  ;;  %v4729_v5 = vunpack.c.l.bf16 %v1036_v39  ;;  %v1032_v60 = vmul.bf16 %v1024_v63, %v968_v34  ;;  %3768 = vmatpush3.bf16.msra.mxu1 %v3949_v3 }
 0x136   : > { %1066 = vadd.xlane.f32.xlu1 %v4698_v7  ;;  %1064 = vadd.xlane.f32.xlu0 %v4700_v4  ;;  %v4733_v25 = vunpack.c.h.bf16 %v1032_v60  ;;  %v4735_v51 = vunpack.c.l.bf16 %v1032_v60  ;;  %v1113_v33 = vmul.f32 %v4729_v5, %v4729_v5  ;;  %v975_v60 = vmul.bf16 1056980736, %v4668_v19  ;;  %v3953_v19 = vld [vmem:[%s5842_s3 + $0x20] sm:$0xff]  }
 0x138   : > { %v1105_v8 = vmul.f32 %v4735_v51, %v4735_v51 }
 0x13a   : > { %1131 = vadd.xlane.f32.xlu1 %v1110_v16  ;;  %1129 = vadd.xlane.f32.xlu0 %v1109_v10  ;;  %v973_v16 = vmul.bf16 1056980736, %v4641_v13  ;;  %v1106_v10 = vmul.f32 %v4733_v25, %v4733_v25  ;;  %v1114_v13 = vmul.f32 %v4727_v12, %v4727_v12 }
 0x13c   : > { %v1037_v56 = vmul.bf16 %v1029_v45, %v973_v16  ;;  %v4026_v42 = vpop.eup %4025  ;;  %v3952_v45 = vld [vmem:[%s5842_s3 + $0x18] sm:$0xff]  }
 0x13d   : > { %v1030_v20 = vadd.bf16 1065369472, %v4026_v42  ;;  %v3954_v42 = vld [vmem:[%s5842_s3 + $0x28] sm:$0xff]  }
 0x13e   : > { %1070 = vadd.xlane.f32.xlu1 %v4713_v0  ;;  %1068 = vadd.xlane.f32.xlu0 %v4715_v36  ;;  %v4744_v52 = vunpack.c.h.bf16 %v1037_v56  ;;  %v4746_v22 = vunpack.c.l.bf16 %v1037_v56  ;;  %v4028_v55 = vpop.eup %4027 }
 0x13f   : > { %v1031_v43 = vadd.bf16 1065369472, %v4028_v55 }
 0x140   : > { %v1116_v39 = vmul.f32 %v4744_v52, %v4744_v52  ;;  %v1115_v63 = vmul.f32 %v4746_v22, %v4746_v22 }
 0x141   : > { %v1039_v15 = vmul.bf16 %v1031_v43, %v975_v60 }
 0x142   : > { %1135 = vadd.xlane.f32.xlu1 %v1112_v6  ;;  %1133 = vadd.xlane.f32.xlu0 %v1111_v35  ;;  %v3950_v6 = vld [vmem:[%s5842_s3 + $0x8] sm:$0xff]   ;;  %v974_v35 = vmul.bf16 1056980736, %v4665_v21 }
 0x143   : > { %3769 = vmatprep.subr.bf16.mxu1 %v3950_v6  ;;  %v4778_v16 = vunpack.c.h.bf16 %v1039_v15 }
 0x144   : > { %v1038_v34 = vmul.bf16 %v1030_v20, %v974_v35  ;;  %3770 = vmatpush3.bf16.msra.mxu1 %v3950_v6  ;;  %v3956_v20 = vld [vmem:[%s5842_s3 + $0x38] sm:$0xff]  }
 0x145   : > { %3771 = vmatprep.subr.bf16.mxu1 %v3951_v40  ;;  %v1120_v3 = vmul.f32 %v4778_v16, %v4778_v16 }
 0x146   : > { %1074 = vadd.xlane.f32.xlu1 %v4727_v12  ;;  %1072 = vadd.xlane.f32.xlu0 %v4729_v5  ;;  %v4769_v21 = vunpack.c.h.bf16 %v1038_v34  ;;  %v4771_v9 = vunpack.c.l.bf16 %v1038_v34 }
 0x148   : > { %3772 = vmatpush3.bf16.msra.mxu1 %v3951_v40  ;;  %v1117_v56 = vmul.f32 %v4771_v9, %v4771_v9 }
 0x149   : > { %3773 = vmatprep.subr.bf16.mxu1 %v3952_v45 }
 0x14a   : > { %1058 = vadd.xlane.f32.xlu0 %v4733_v25  ;;  %1056 = vadd.xlane.f32.xlu1 %v4735_v51 }
 0x14c   : > { %3774 = vmatpush3.bf16.msra.mxu1 %v3952_v45 }
 0x14d   : > { %3775 = vmatprep.subr.bf16.mxu1 %v3953_v19 }
 0x14e   : > { %1123 = vadd.xlane.f32.xlu1 %v1106_v10  ;;  %1121 = vadd.xlane.f32.xlu0 %v1105_v8  ;;  %v4780_v10 = vunpack.c.l.bf16 %v1039_v15  ;;  %v1118_v8 = vmul.f32 %v4769_v21, %v4769_v21 }
 0x150   : > { %3776 = vmatpush3.bf16.msra.mxu1 %v3953_v19 }
 0x151   : > { %3777 = vmatprep.subr.bf16.mxu1 %v3954_v42 }
 0x152   : > { %1078 = vadd.xlane.f32.xlu1 %v4744_v52  ;;  %1076 = vadd.xlane.f32.xlu0 %v4746_v22 }
 0x154   : > { %3778 = vmatpush3.bf16.msra.mxu1 %v3954_v42 }
 0x156   : > { %1139 = vadd.xlane.f32.xlu1 %v1114_v13  ;;  %1137 = vadd.xlane.f32.xlu0 %v1113_v33  ;;  %v1119_v13 = vmul.f32 %v4780_v10, %v4780_v10  ;;  %v3955_v33 = vld [vmem:[%s5842_s3 + $0x30] sm:$0xff]  }
 0x157   : > { %3779 = vmatprep.subr.bf16.mxu1 %v3955_v33 }
 0x158   : > { %3780 = vmatpush3.bf16.msra.mxu1 %v3955_v33 }
 0x159   : > { %3781 = vmatprep.subr.bf16.mxu1 %v3956_v20 }
 0x15a   : > { %1143 = vadd.xlane.f32.xlu1 %v1116_v39  ;;  %1141 = vadd.xlane.f32.xlu0 %v1115_v63 }
 0x15c   : > { %3782 = vmatpush3.bf16.msra.mxu1 %v3956_v20 }
 0x15e   : > { %1082 = vadd.xlane.f32.xlu1 %v4769_v21  ;;  %1080 = vadd.xlane.f32.xlu0 %v4771_v9 }
 0x162   : > { %1086 = vadd.xlane.f32.xlu1 %v4778_v16  ;;  %1084 = vadd.xlane.f32.xlu0 %v4780_v10 }
 0x166   : > { %1147 = vadd.xlane.f32.xlu1 %v1118_v8  ;;  %1145 = vadd.xlane.f32.xlu0 %v1117_v56 }
 0x16a   : > { %1151 = vadd.xlane.f32.xlu1 %v1120_v3  ;;  %1149 = vadd.xlane.f32.xlu0 %v1119_v13 }
 0x1bb   : > { %v1063_v55 = vpop.xlane.xlu1 %1062  ;;  %v1061_v6 = vpop.xlane.xlu0 %1060 }
 0x1bc   : > { %v4804_v45 = vmul.f32 0.0078125, %v1063_v55  ;;  %v4806_v56 = vmul.f32 0.0078125, %v1061_v6 }
 0x1be   : > { %v1188_v33 = vmul.f32 %v4804_v45, %v4804_v45  ;;  %v1187_v55 = vmul.f32 %v4806_v56, %v4806_v56  ;;  %v1172_v53 = vsub.f32 %v4684_v58, %v4804_v45 }
 0x1bf   : > { %v1128_v35 = vpop.xlane.xlu1 %1127  ;;  %v1126_v39 = vpop.xlane.xlu0 %1125 }
 0x1c0   : > { %v1156_v42 = vmul.f32 0.0078125, %v1128_v35  ;;  %v1155_v13 = vmul.f32 0.0078125, %v1126_v39 }
 0x1c2   : > { %v1204_v28 = vsub.f32 %v1156_v42, %v1188_v33  ;;  %v1203_v35 = vsub.f32 %v1155_v13, %v1187_v55 }
 0x1c3   : > { %v1067_v63 = vpop.xlane.xlu1 %1066  ;;  %v1065_v34 = vpop.xlane.xlu0 %1064 }
 0x1c4   : > { %v4808_v3 = vmul.f32 0.0078125, %v1067_v63  ;;  %v4812_v20 = vmul.f32 0.0078125, %v1065_v34  ;;  %v1220_v18 = vadd.f32 1e-05, %v1204_v28  ;;  %v1219_v42 = vadd.f32 1e-05, %v1203_v35 }
 0x1c6   : > { %v1190_v6 = vmul.f32 %v4808_v3, %v4808_v3  ;;  %v1189_v39 = vmul.f32 %v4812_v20, %v4812_v20  ;;  %4029 = vrsqrt.f32 %v1220_v18 }
 0x1c7   : > { %v1132_v43 = vpop.xlane.xlu1 %1131  ;;  %v1130_v40 = vpop.xlane.xlu0 %1129  ;;  %4031 = vrsqrt.f32 %v1219_v42 }
 0x1c8   : > { %v1158_v48 = vmul.f32 0.0078125, %v1132_v43  ;;  %v1157_v41 = vmul.f32 0.0078125, %v1130_v40 }
 0x1ca   : > { %v1206_v63 = vsub.f32 %v1158_v48, %v1190_v6  ;;  %v1205_v24 = vsub.f32 %v1157_v41, %v1189_v39 }
 0x1cb   : > { %v1071_v60 = vpop.xlane.xlu1 %1070  ;;  %v1069_v15 = vpop.xlane.xlu0 %1068 }
 0x1cc   : > { %v4824_v29 = vmul.f32 0.0078125, %v1071_v60  ;;  %v1222_v33 = vadd.f32 1e-05, %v1206_v63  ;;  %v4826_v27 = vmul.f32 0.0078125, %v1069_v15  ;;  %v1221_v28 = vadd.f32 1e-05, %v1205_v24 }
 0x1ce   : > { %v1192_v41 = vmul.f32 %v4824_v29, %v4824_v29  ;;  %4033 = vrsqrt.f32 %v1222_v33 }
 0x1cf   : > { %v1136_v19 = vpop.xlane.xlu1 %1135  ;;  %v1134_v8 = vpop.xlane.xlu0 %1133  ;;  %4035 = vrsqrt.f32 %v1221_v28 }
 0x1d0   : > { %v1160_v40 = vmul.f32 0.0078125, %v1136_v19  ;;  %v1159_v60 = vmul.f32 0.0078125, %v1134_v8  ;;  %v1191_v19 = vmul.f32 %v4826_v27, %v4826_v27 }
 0x1d2   : > { %v1208_v39 = vsub.f32 %v1160_v40, %v1192_v41 }
 0x1d3   : > { %v1075_v11 = vpop.xlane.xlu1 %1074  ;;  %v1073_v2 = vpop.xlane.xlu0 %1072 }
 0x1d4   : > { %v4836_v17 = vmul.f32 0.0078125, %v1075_v11  ;;  %v1224_v8 = vadd.f32 1e-05, %v1208_v39 }
 0x1d6   : > { %v1194_v40 = vmul.f32 %v4836_v17, %v4836_v17 }
 0x1d7   : > { %v1059_v23 = vpop.xlane.xlu0 %1058  ;;  %v1057_v26 = vpop.xlane.xlu1 %1056 }
 0x1d8   : > { %v4820_v34 = vmul.f32 0.0078125, %v1059_v23  ;;  %v4822_v43 = vmul.f32 0.0078125, %v1057_v26 }
 0x1da   : > { %v1186_v48 = vmul.f32 %v4820_v34, %v4820_v34  ;;  %v1185_v23 = vmul.f32 %v4822_v43, %v4822_v43 }
 0x1db   : > { %v1124_v13 = vpop.xlane.xlu1 %1123  ;;  %v1122_v55 = vpop.xlane.xlu0 %1121 }
 0x1dc   : > { %v1154_v6 = vmul.f32 0.0078125, %v1124_v13  ;;  %v1153_v26 = vmul.f32 0.0078125, %v1122_v55  ;;  %v4838_v13 = vmul.f32 0.0078125, %v1073_v2  ;;  %v1207_v55 = vsub.f32 %v1159_v60, %v1191_v19  ;;  %v4030_v60 = vpop.eup %4029 }
 0x1dd   : > { %v4032_v39 = vpop.eup %4031 }
 0x1de   : > { %v1202_v15 = vsub.f32 %v1154_v6, %v1186_v48  ;;  %v1201_v35 = vsub.f32 %v1153_v26, %v1185_v23  ;;  %v1193_v11 = vmul.f32 %v4838_v13, %v4838_v13  ;;  %v1223_v26 = vadd.f32 1e-05, %v1207_v55 }
 0x1df   : > { %v1079_v63 = vpop.xlane.xlu1 %1078  ;;  %v1077_v14 = vpop.xlane.xlu0 %1076 }
 0x1e0   : > { %v1218_v18 = vadd.f32 1e-05, %v1202_v15  ;;  %v1217_v24 = vadd.f32 1e-05, %v1201_v35  ;;  %v4840_v42 = vmul.f32 0.0078125, %v1079_v63  ;;  %v4842_v33 = vmul.f32 0.0078125, %v1077_v14 }
 0x1e2   : > { %4037 = vrsqrt.f32 %v1218_v18  ;;  %v1196_v15 = vmul.f32 %v4840_v42, %v4840_v42  ;;  %v1195_v14 = vmul.f32 %v4842_v33, %v4842_v33 }
 0x1e3   : > { %4039 = vrsqrt.f32 %v1217_v24  ;;  %v1140_v48 = vpop.xlane.xlu1 %1139  ;;  %v1138_v23 = vpop.xlane.xlu0 %1137 }
 0x1e4   : > { %v1162_v2 = vmul.f32 0.0078125, %v1140_v48  ;;  %v1161_v6 = vmul.f32 0.0078125, %v1138_v23  ;;  %4041 = vrsqrt.f32 %v1224_v8  ;;  %v4034_v48 = vpop.eup %4033  ;;  %v1170_v8 = vsub.f32 %v4733_v25, %v4820_v34 }
 0x1e5   : > { %4043 = vrsqrt.f32 %v1223_v26  ;;  %v1174_v26 = vsub.f32 %v4698_v7, %v4808_v3  ;;  %v1169_v25 = vsub.f32 %v4735_v51, %v4822_v43  ;;  %v1176_v51 = vsub.f32 %v4713_v0, %v4824_v29 }
 0x1e6   : > { %v1210_v28 = vsub.f32 %v1162_v2, %v1194_v40  ;;  %v1209_v41 = vsub.f32 %v1161_v6, %v1193_v11  ;;  %v4036_v40 = vpop.eup %4035 }
 0x1e7   : > { %v1144_v35 = vpop.xlane.xlu1 %1143  ;;  %v1142_v19 = vpop.xlane.xlu0 %1141 }
 0x1e8   : > { %v1226_v63 = vadd.f32 1e-05, %v1210_v28  ;;  %v1225_v18 = vadd.f32 1e-05, %v1209_v41  ;;  %v1164_v24 = vmul.f32 0.0078125, %v1144_v35  ;;  %v1163_v59 = vmul.f32 0.0078125, %v1142_v19 }
 0x1e9   : > { %v1171_v28 = vsub.f32 %v4686_v1, %v4806_v56  ;;  %v1252_v19 = vmul.f32 %v4030_v60, %v1172_v53  ;;  %v1254_v1 = vmul.f32 %v4034_v48, %v1174_v26  ;;  %v1175_v53 = vsub.f32 %v4715_v36, %v4826_v27 }
 0x1ea   : > { %4045 = vrsqrt.f32 %v1226_v63  ;;  %v1212_v55 = vsub.f32 %v1164_v24, %v1196_v15  ;;  %v1211_v23 = vsub.f32 %v1163_v59, %v1195_v14  ;;  %v1173_v59 = vsub.f32 %v4700_v4, %v4812_v20 }
 0x1eb   : > { %4047 = vrsqrt.f32 %v1225_v18  ;;  %v1083_v11 = vpop.xlane.xlu1 %1082  ;;  %v1081_v2 = vpop.xlane.xlu0 %1080  ;;  %v1251_v35 = vmul.f32 %v4032_v39, %v1171_v28  ;;  %v1178_v27 = vsub.f32 %v4727_v12, %v4836_v17  ;;  %v1177_v36 = vsub.f32 %v4729_v5, %v4838_v13 }
 0x1ec   : > { %v4038_v6 = vpop.eup %4037  ;;  %v1228_v41 = vadd.f32 1e-05, %v1212_v55  ;;  %v1227_v34 = vadd.f32 1e-05, %v1211_v23  ;;  %v1253_v18 = vmul.f32 %v4036_v40, %v1173_v59  ;;  %v4864_v56 = vmul.f32 0.0078125, %v1083_v11 }
 0x1ed   : > { %v4040_v15 = vpop.eup %4039  ;;  %v1250_v14 = vmul.f32 %v4038_v6, %v1170_v8  ;;  %v4866_v7 = vmul.f32 0.0078125, %v1081_v2  ;;  %v1282_v20 = vpack.c.bf16 %v1252_v19, %v1251_v35 }
 0x1ee   : > { %v1249_v45 = vmul.f32 %v4040_v15, %v1169_v25  ;;  %4049 = vrsqrt.f32 %v1228_v41  ;;  %v4042_v3 = vpop.eup %4041  ;;  %v1283_v24 = vpack.c.bf16 %v1254_v1, %v1253_v18  ;;  %v1198_v40 = vmul.f32 %v4864_v56, %v4864_v56 }
 0x1ef   : > { %v1087_v63 = vpop.xlane.xlu1 %1086  ;;  %v1085_v58 = vpop.xlane.xlu0 %1084  ;;  %4051 = vrsqrt.f32 %v1227_v34  ;;  %v1197_v8 = vmul.f32 %v4866_v7, %v4866_v7  ;;  %v1256_v26 = vmul.f32 %v4042_v3, %v1176_v51  ;;  %v1180_v1 = vsub.f32 %v4744_v52, %v4840_v42 }
 0x1f0   : > { %v1281_v4 = vpack.c.bf16 %v1250_v14, %v1249_v45  ;;  %v4044_v43 = vpop.eup %4043  ;;  %v1104_v60 = vmul.f32 0.0078125, %v1087_v63  ;;  %v4872_v39 = vmul.f32 0.0078125, %v1085_v58  ;;  %v1179_v3 = vsub.f32 %v4746_v22, %v4842_v33 }
 0x1f1   : > { %v1255_v28 = vmul.f32 %v4044_v43, %v1175_v53 }
 0x1f2   : > { %3783 = vmatprep.mubr.bf16.mxu1 %v1281_v4  ;;  %v1200_v41 = vmul.f32 %v1104_v60, %v1104_v60  ;;  %v1199_v15 = vmul.f32 %v4872_v39, %v4872_v39  ;;  %v1184_v33 = vsub.f32 %v4778_v16, %v1104_v60  ;;  %v3962_v16 = vld [vmem:[%s5843_s4 + $0x14] ss:$8 sps:$4 sm:$0xff]   ;;  %v3963_v60 = vld [vmem:[%s5843_s4 + $0x20] ss:$8 sps:$4 sm:$0xff]  }
 0x1f3   : > { %v1148_v48 = vpop.xlane.xlu1 %1147  ;;  %v1146_v55 = vpop.xlane.xlu0 %1145  ;;  %3784 = vmatmul.mubr.bf16.vlgmr.msra.gmra.mrb[0].mxu1 %v1282_v20  ;;  %v1284_v58 = vpack.c.bf16 %v1256_v26, %v1255_v28  ;;  %v3972_v28 = vld [vmem:[%s5843_s4 + $0x50] ss:$8 sps:$4 sm:$0xff]   ;;  %v3977_v26 = vld [vmem:[%s5843_s4 + $0x64] ss:$8 sps:$4 sm:$0xff]  }
 0x1f4   : > { %v4046_v23 = vpop.eup %4045  ;;  %v1166_v29 = vmul.f32 0.0078125, %v1148_v48  ;;  %v1165_v0 = vmul.f32 0.0078125, %v1146_v55  ;;  %3787 = vmatprep.mubr.bf16.mxu1 %v1283_v24  ;;  %v1182_v24 = vsub.f32 %v4769_v21, %v4864_v56  ;;  %v1181_v55 = vsub.f32 %v4771_v9, %v4866_v7  ;;  %v3959_v9 = vld [vmem:[%s5843_s4 + $0x4] ss:$8 sps:$4 sm:$0xff]   ;;  %v3957_v56 = vld [vmem:[%s5843_s4] ss:$8 sps:$4 sm:$0xff]  }
 0x1f5   : > { %v4048_v11 = vpop.eup %4047  ;;  %v1258_v14 = vmul.f32 %v4046_v23, %v1178_v27  ;;  %1774 = vmatprep.subr.bf16.mxu0 %v3959_v9  ;;  %v3965_v7 = vld [vmem:[%s5843_s4 + $0x24] ss:$8 sps:$4 sm:$0xff]   ;;  %v3966_v27 = vld [vmem:[%s5843_s4 + $0x30] ss:$8 sps:$4 sm:$0xff]  }
 0x1f6   : > { %v1214_v2 = vsub.f32 %v1166_v29, %v1198_v40  ;;  %v1213_v6 = vsub.f32 %v1165_v0, %v1197_v8  ;;  %v1257_v34 = vmul.f32 %v4048_v11, %v1177_v36  ;;  %v1183_v40 = vsub.f32 %v4780_v10, %v4872_v39  ;;  %1775 = vmatpush1.bf16.msra.mxu0 %v3957_v56  ;;  %v3960_v10 = vld [vmem:[%s5843_s4 + $0x10] ss:$8 sps:$4 sm:$0xff]   ;;  %v3968_v39 = vld [vmem:[%s5843_s4 + $0x34] ss:$8 sps:$4 sm:$0xff]   ;;  %v3971_v36 = vld [vmem:[%s5843_s4 + $0x44] ss:$8 sps:$4 sm:$0xff]  }
 0x1f7   : > { %v1152_v59 = vpop.xlane.xlu1 %1151  ;;  %v1150_v25 = vpop.xlane.xlu0 %1149  ;;  %1776 = vmatprep.subr.bf16.mxu0 %v3962_v16 }
 0x1f8   : > { %v1230_v35 = vadd.f32 1e-05, %v1214_v2  ;;  %v1229_v19 = vadd.f32 1e-05, %v1213_v6  ;;  %v1168_v63 = vmul.f32 0.0078125, %v1152_v59  ;;  %v1167_v17 = vmul.f32 0.0078125, %v1150_v25  ;;  %v4050_v12 = vpop.eup %4049 }
 0x1f9   : > { %v4052_v45 = vpop.eup %4051  ;;  %v1285_v18 = vpack.c.bf16 %v1258_v14, %v1257_v34  ;;  %v1260_v43 = vmul.f32 %v4050_v12, %v1180_v1  ;;  %v3969_v2 = vld [vmem:[%s5843_s4 + $0x40] ss:$8 sps:$4 sm:$0xff]   ;;  %v3974_v6 = vld [vmem:[%s5843_s4 + $0x54] ss:$8 sps:$4 sm:$0xff]   ;;  %v3978_v59 = vld [vmem:[%s5843_s4 + $0x70] ss:$8 sps:$4 sm:$0xff]  }
 0x1fa   : > { %4053 = vrsqrt.f32 %v1230_v35  ;;  %v1216_v5 = vsub.f32 %v1168_v63, %v1200_v41  ;;  %v1215_v13 = vsub.f32 %v1167_v17, %v1199_v15  ;;  %v1259_v20 = vmul.f32 %v4052_v45, %v1179_v3  ;;  %1777 = vmatpush1.bf16.msra.mxu0 %v3960_v10  ;;  %v3975_v41 = vld [vmem:[%s5843_s4 + $0x60] ss:$8 sps:$4 sm:$0xff]   ;;  %v3980_v15 = vld [vmem:[%s5843_s4 + $0x74] ss:$8 sps:$4 sm:$0xff]  }
 0x1fb   : > { %4055 = vrsqrt.f32 %v1229_v19  ;;  %3788 = vmatmul.mubr.bf16.gmra.mrb[4].mxu1 %v1284_v58  ;;  %1778 = vmatprep.subr.bf16.mxu0 %v3965_v7  ;;  %v1580_v35 = vsub.s32 1, %v4438_v61 }
 0x1fc   : > { %v1232_v4 = vadd.f32 1e-05, %v1216_v5  ;;  %v1231_v51 = vadd.f32 1e-05, %v1215_v13  ;;  %3791 = vmatprep.mubr.bf16.mxu1 %v1285_v18  ;;  %v1286_v53 = vpack.c.bf16 %v1260_v43, %v1259_v20 }
 0x1fe   : > { %4057 = vrsqrt.f32 %v1232_v4  ;;  %1779 = vmatpush1.bf16.msra.mxu0 %v3963_v60 }
 0x1ff   : > { %4059 = vrsqrt.f32 %v1231_v51  ;;  %1780 = vmatprep.subr.bf16.mxu0 %v3968_v39 }
 0x202   : > { %1781 = vmatpush1.bf16.msra.mxu0 %v3966_v27 }
 0x203   : > { %3792 = vmatmul.mubr.bf16.gmra.mrb[8].mxu1 %v1286_v53  ;;  %1782 = vmatprep.subr.bf16.mxu0 %v3971_v36 }
 0x204   : > { %v4054_v48 = vpop.eup %4053 }
 0x205   : > { %v4056_v52 = vpop.eup %4055  ;;  %v1262_v42 = vmul.f32 %v4054_v48, %v1182_v24 }
 0x206   : > { %v1261_v22 = vmul.f32 %v4056_v52, %v1181_v55  ;;  %1783 = vmatpush1.bf16.msra.mxu0 %v3969_v2  ;;  %v5929_v2 = vld [vmem:[#allocation9_spill] sm:$0xff] }
 0x207   : > { %1784 = vmatprep.subr.bf16.mxu0 %v3974_v6 }
 0x208   : > { %v4058_v23 = vpop.eup %4057  ;;  %v1287_v8 = vpack.c.bf16 %v1262_v42, %v1261_v22  ;;  %v5927_v42 = vld [vmem:[#allocation4_spill] sm:$0xff] }
 0x209   : > { %v4060_v29 = vpop.eup %4059  ;;  %v1264_v0 = vmul.f32 %v4058_v23, %v1184_v33 }
 0x20a   : > { %3795 = vmatprep.mubr.bf16.mxu1 %v1287_v8  ;;  %v1263_v11 = vmul.f32 %v4060_v29, %v1183_v40  ;;  %1785 = vmatpush1.bf16.msra.mxu0 %v3972_v28  ;;  %v4977_v29 = vld [vmem:[%s5846_s7] sm:$0x7f] }
 0x20b   : > { %1786 = vmatprep.subr.bf16.mxu0 %v3977_v26  ;;  %v5930_v28 = vld [vmem:[#allocation14_spill] sm:$0xff] }
 0x20c   : > { %v1288_v21 = vpack.c.bf16 %v1264_v0, %v1263_v11 }
 0x20e   : > { %3796 = vmatmul.mubr.bf16.gmra.mrb[12].mxu1 %v1288_v21  ;;  %1787 = vmatpush1.bf16.msra.mxu0 %v3975_v41  ;;  %v5931_v41 = vld [vmem:[#allocation7_spill] sm:$0xff] }
 0x20f   : > { %1788 = vmatprep.subr.bf16.mxu0 %v3980_v15 }
 0x212   : > { %1789 = vmatpush1.bf16.msra.mxu0 %v3978_v59  ;;  %v5932_v59 = vld [vmem:[#allocation5_spill] sm:$0xff] }
 0x2c6   : > { %v3785_v25 = vpop.f32.mrb[0].mxu1 }
 0x2c7   : > { %v4943_v34 = vpop.f32.mrb[1].mxu1  ;;  %v1436_v19 = vrot.slane %v3785_v25, 7  ;;  %v1468_v63 = vrot.slane %v3785_v25, 1  ;;  %v1500_v13 = vmul.f32 %v3785_v25, %v4416_v49 }
 0x2c8   : > { %v3786_v14 = vpop.f32.mrb[2].mxu1  ;;  %v1434_v58 = vrot.slane %v4943_v34, 7  ;;  %v1466_v1 = vrot.slane %v4943_v34, 1 }
 0x2c9   : > { %v1437_v17 = vrot.slane %v3786_v14, 7  ;;  %v1469_v12 = vrot.slane %v3786_v14, 1  ;;  %v1374_v5 = vpop.f32.mrb[3].mxu1  ;;  %v1501_v51 = vmul.f32 %v3786_v14, %v4380_v31 }
 0x2ca   : > { %v1435_v45 = vrot.slane %v1374_v5, 7  ;;  %v1467_v18 = vrot.slane %v1374_v5, 1  ;;  %v1499_v53 = vmul.f32 %v1374_v5, %v4412_v47  ;;  %v5928_v47 = vld [vmem:[#allocation6_spill] sm:$0xff] }
 0x2cb   : > { %v1462_v3 = vsel %vm602_vm2, %v1436_v19, %v1437_v17  ;;  %v1494_v4 = vsel %vm635_vm3, %v1468_v63, %v1469_v12 }
 0x2cc   : > { %v1517_v20 = vmul.f32 %v1462_v3, %v4382_v32  ;;  %v1463_v43 = vsel %vm602_vm2, %v1435_v45, %v1436_v19  ;;  %v1464_v49 = vsel %vm602_vm2, %v1434_v58, %v1435_v45  ;;  %v1495_v24 = vsel %vm635_vm3, %v1467_v18, %v1468_v63 }
 0x2cd   : > { %v4968_v31 = vsel %vm635_vm3, %v1466_v1, %v1467_v18  ;;  %v1515_v32 = vmul.f32 %v1464_v49, %v4378_v30  ;;  %v1516_v48 = vmul.f32 %v1463_v43, %v4440_v62  ;;  %v1548_v22 = vmul.f32 %v1494_v4, %v5927_v42  ;;  %v5935_v43 = vld [vmem:[#allocation25_spill] sm:$0xff] }
 0x2ce   : > { %v1533_v55 = vadd.f32 %v1517_v20, %v1501_v51  ;;  %v3789_v52 = vpop.f32.mrb[4].mxu1  ;;  %v1547_v40 = vmul.f32 %v1495_v24, %v5928_v47  ;;  %v4982_v30 = vrot.slane %v4977_v29, %v1580_v35  ;;  %v5934_v51 = vld [vmem:[#allocation23_spill] sm:$0xff] }
 0x2cf   : > { %v1531_v33 = vadd.f32 %v1515_v32, %v1499_v53  ;;  %v1532_v23 = vadd.f32 %v1516_v48, %v1500_v13  ;;  %v1387_v8 = vpop.f32.mrb[5].mxu1  ;;  %v1440_v62 = vrot.slane %v3789_v52, 7  ;;  %v1472_v60 = vrot.slane %v3789_v52, 1  ;;  %v5933_v13 = vld [vmem:[#allocation11_spill] sm:$0xff]  ;;  %v5936_v48 = vld [vmem:[#allocation13_spill] sm:$0xff] }
 0x2d0   : > { %v1438_v0 = vrot.slane %v1387_v8, 7  ;;  %v1470_v11 = vrot.slane %v1387_v8, 1  ;;  %v3790_v21 = vpop.f32.mrb[6].mxu1  ;;  %v1504_v6 = vmul.f32 %v3789_v52, %v5929_v2  ;;  %v1502_v26 = vmul.f32 %v1387_v8, %v5930_v28  ;;  %v5937_v2 = vld [vmem:[#allocation15_spill] sm:$0xff] }
 0x2d1   : > { %v4984_v9 = vadd.f32 %v1547_v40, %v1531_v33  ;;  %v1564_v56 = vadd.f32 %v1548_v22, %v1532_v23  ;;  %v1441_v16 = vrot.slane %v3790_v21, 7  ;;  %v1473_v10 = vrot.slane %v3790_v21, 1  ;;  %v1390_v7 = vpop.f32.mrb[7].mxu1 }
 0x2d2   : > { %v1461_v39 = vsel %vm602_vm2, %v1437_v17, %v1438_v0  ;;  %v1493_v27 = vsel %vm635_vm3, %v1469_v12, %v1470_v11  ;;  %v1439_v36 = vrot.slane %v1390_v7, 7  ;;  %v1505_v45 = vmul.f32 %v3790_v21, %v5933_v13  ;;  %v5940_v13 = vld [vmem:[#allocation12_spill] sm:$0xff] }
 0x2d3   : > { %v1518_v15 = vmul.f32 %v1461_v39, %v5931_v41  ;;  %v1549_v25 = vmul.f32 %v1493_v27, %v5932_v59  ;;  %v1458_v14 = vsel %vm602_vm2, %v1440_v62, %v1441_v16  ;;  %v1490_v19 = vsel %vm635_vm3, %v1472_v60, %v1473_v10 }
 0x2d4   : > { %v1459_v63 = vsel %vm602_vm2, %v1439_v36, %v1440_v62  ;;  %v1460_v17 = vsel %vm602_vm2, %v1438_v0, %v1439_v36  ;;  %v1521_v18 = vmul.f32 %v1458_v14, %v4406_v44  ;;  %v1471_v3 = vrot.slane %v1390_v7, 1 }
 0x2d5   : > { %v1534_v12 = vadd.f32 %v1518_v15, %v1502_v26  ;;  %v1565_v5 = vadd.f32 %v1549_v25, %v1533_v55  ;;  %v1503_v4 = vmul.f32 %v1390_v7, %v4392_v37  ;;  %v1519_v20 = vmul.f32 %v1460_v17, %v5934_v51  ;;  %v5938_v15 = vld [vmem:[#allocation8_spill] sm:$0xff] }
 0x2d6   : > { %v1520_v49 = vmul.f32 %v1459_v63, %v5935_v43  ;;  %v3793_v53 = vpop.f32.mrb[8].mxu1  ;;  %v1537_v32 = vadd.f32 %v1521_v18, %v1505_v45  ;;  %v1552_v52 = vmul.f32 %v1490_v19, %v5936_v48  ;;  %v1491_v55 = vsel %vm635_vm3, %v1471_v3, %v1472_v60  ;;  %v5941_v18 = vld [vmem:[#allocation3_spill] sm:$0xff] }
 0x2d7   : > { %v1585_v24 = vadd.f32 %v4982_v30, %v1565_v5  ;;  %v1403_v42 = vpop.f32.mrb[9].mxu1  ;;  %v1492_v44 = vsel %vm635_vm3, %v1470_v11, %v1471_v3  ;;  %v1535_v22 = vadd.f32 %v1519_v20, %v1503_v4  ;;  %v1551_v47 = vmul.f32 %v1491_v55, %v4410_v46  ;;  %v5942_v20 = vld [vmem:[#allocation18_spill] sm:$0xff]  ;;  %v5944_v55 = vld [vmem:[#allocation27_spill] sm:$0xff] }
 0x2d8   : > { %v1536_v33 = vadd.f32 %v1520_v49, %v1504_v6  ;;  %v5013_v37 = vpop.f32.mrb[10].mxu1  ;;  %v1550_v23 = vmul.f32 %v1492_v44, %v4394_v38  ;;  %v1444_v40 = vrot.slane %v3793_v53, 7  ;;  %v1442_v8 = vrot.slane %v1403_v42, 7 }
 0x2d9   : > { %v1406_v62 = vpop.f32.mrb[11].mxu1  ;;  %v1476_v21 = vrot.slane %v3793_v53, 1  ;;  %v1474_v7 = vrot.slane %v1403_v42, 1  ;;  %v1445_v60 = vrot.slane %v5013_v37, 7  ;;  %v1567_v27 = vadd.f32 %v1551_v47, %v1535_v22  ;;  %v5945_v22 = vld [vmem:[#allocation21_spill] sm:$0xff]  ;;  %v5947_v47 = vld [vmem:[#allocation10_spill] sm:$0xff] }
 0x2da   : > { %v5017_v0 = vadd.f32 %v1552_v52, %v1536_v33  ;;  %v1566_v39 = vadd.f32 %v1550_v23, %v1534_v12  ;;  %v1457_v11 = vsel %vm602_vm2, %v1441_v16, %v1442_v8  ;;  %v1477_v36 = vrot.slane %v5013_v37, 1 }
 0x2db   : > { %v1489_v38 = vsel %vm635_vm3, %v1473_v10, %v1474_v7  ;;  %v1506_v46 = vmul.f32 %v1403_v42, %v4418_v50  ;;  %v1522_v6 = vmul.f32 %v1457_v11, %v5937_v2  ;;  %v1454_v28 = vsel %vm602_vm2, %v1444_v40, %v1445_v60  ;;  %v5939_v10 = vld [vmem:[#allocation17_spill] sm:$0xff]  ;;  %v5943_v42 = vld [vmem:[#allocation16_spill] sm:$0xff] }
 0x2dc   : > { %v1586_v26 = vadd.f32 %v4982_v30, %v1566_v39  ;;  %v1587_v41 = vadd.f32 %v4982_v30, %v1567_v27  ;;  %v1553_v59 = vmul.f32 %v1489_v38, %v5938_v15  ;;  %v1486_v16 = vsel %vm635_vm3, %v1476_v21, %v1477_v36 }
 0x2dd   : > { %v1584_v25 = vadd.f32 %v4982_v30, %v1564_v56  ;;  %v1538_v14 = vadd.f32 %v1522_v6, %v1506_v46  ;;  %v1509_v50 = vmul.f32 %v5013_v37, %v5939_v10  ;;  %v1525_v19 = vmul.f32 %v1454_v28, %v4432_v57  ;;  %v5946_v37 = vld [vmem:[#allocation20_spill] sm:$0xff] }
 0x2de   : > { %v5038_v63 = vpack.c.bf16 %v1587_v41, %v1586_v26  ;;  %v1569_v17 = vadd.f32 %v1553_v59, %v1537_v32  ;;  %v1443_v12 = vrot.slane %v1406_v62, 7  ;;  %v1475_v5 = vrot.slane %v1406_v62, 1  ;;  %v5948_v41 = vld [vmem:[#allocation19_spill] sm:$0xff]  ;;  %v5949_v59 = vld [vmem:[#allocation26_spill] sm:$0xff] }
 0x2df   : > { %v1498_v45 = vmul.f32 %v4943_v34, %v5940_v13  ;;  %v1546_v3 = vmul.f32 %v4968_v31, %v5941_v18  ;;  %v1541_v4 = vadd.f32 %v1525_v19, %v1509_v50  ;;  %v5044_v56 = vpack.c.bf16 %v1585_v24, %v1584_v25  ;;  %v5950_v25 = vld [vmem:[#allocation22_spill] sm:$0xff]  ;;  %v5955_v34 = vld [vmem:[#allocation36_spill] sm:$0xff] }
 0x2e0   : > { %v1508_v43 = vmul.f32 %v3793_v53, %v5942_v20  ;;  %v1455_v57 = vsel %vm602_vm2, %v1443_v12, %v1444_v40  ;;  %v1456_v49 = vsel %vm602_vm2, %v1442_v8, %v1443_v12  ;;  %v1487_v32 = vsel %vm635_vm3, %v1475_v5, %v1476_v21 }
 0x2e1   : > { %v3797_v51 = vpop.f32.mrb[12].mxu1  ;;  %v1488_v52 = vsel %vm635_vm3, %v1474_v7, %v1475_v5  ;;  %v1507_v31 = vmul.f32 %v1406_v62, %v4426_v54  ;;  %v1523_v24 = vmul.f32 %v1456_v49, %v5943_v42  ;;  %v1524_v44 = vmul.f32 %v1455_v57, %v5944_v55  ;;  %v5952_v49 = vld [vmem:[#allocation2_spill] sm:$0xff] }
 0x2e2   : > { %v1419_v48 = vpop.f32.mrb[13].mxu1  ;;  %v1556_v33 = vmul.f32 %v1486_v16, %v5945_v22  ;;  %v1554_v23 = vmul.f32 %v1488_v52, %v5946_v37  ;;  %v1555_v40 = vmul.f32 %v1487_v32, %v5947_v47  ;;  %v1448_v8 = vrot.slane %v3797_v51, 7  ;;  %v5956_v22 = vld [vmem:[#allocation24_spill] sm:$0xff] }
 0x2e3   : > { %v3798_v53 = vpop.f32.mrb[14].mxu1  ;;  %v1539_v21 = vadd.f32 %v1523_v24, %v1507_v31  ;;  %v1540_v27 = vadd.f32 %v1524_v44, %v1508_v43  ;;  %v1446_v11 = vrot.slane %v1419_v48, 7  ;;  %v1478_v38 = vrot.slane %v1419_v48, 1  ;;  %v5951_v43 = vld [vmem:[#allocation30_spill] sm:$0xff]  ;;  %v5954_v31 = vld [vmem:[#allocation28_spill] sm:$0xff] }
 0x2e4   : > { %v1422_v39 = vpop.f32.mrb[15].mxu1  ;;  %v1570_v7 = vadd.f32 %v1554_v23, %v1538_v14  ;;  %v1480_v46 = vrot.slane %v3797_v51, 1  ;;  %v1449_v54 = vrot.slane %v3798_v53, 7  ;;  %v1481_v62 = vrot.slane %v3798_v53, 1 }
 0x2e5   : > { %v1571_v2 = vadd.f32 %v1555_v40, %v1539_v21  ;;  %v1572_v6 = vadd.f32 %v1556_v33, %v1540_v27  ;;  %v1453_v28 = vsel %vm602_vm2, %v1445_v60, %v1446_v11  ;;  %v1485_v26 = vsel %vm635_vm3, %v1477_v36, %v1478_v38  ;;  %v5958_v40 = vld [vmem:[#allocation32_spill] sm:$0xff]  ;;  %v5959_v27 = vld [vmem:[#allocation35_spill] sm:$0xff] }
 0x2e6   : > { %v1510_v15 = vmul.f32 %v1419_v48, %v5948_v41  ;;  %v1526_v16 = vmul.f32 %v1453_v28, %v5949_v59  ;;  %v1557_v10 = vmul.f32 %v1485_v26, %v5950_v25  ;;  %v1450_v14 = vsel %vm602_vm2, %v1448_v8, %v1449_v54 }
 0x2e7   : > { %v1590_v50 = vadd.f32 %v4982_v30, %v1570_v7  ;;  %v1591_v19 = vadd.f32 %v4982_v30, %v1571_v2  ;;  %v1465_v60 = vsel %vm602_vm2, %v1449_v54, %v1434_v58  ;;  %v1482_v36 = vsel %vm635_vm3, %v1480_v46, %v1481_v62  ;;  %v5953_v58 = vld [vmem:[#allocation31_spill] sm:$0xff]  ;;  %v5960_v7 = vld [vmem:[#allocation33_spill] sm:$0xff] }
 0x2e8   : > { %v1583_v12 = vadd.f32 %v4982_v30, %v4984_v9  ;;  %v1542_v5 = vadd.f32 %v1526_v16, %v1510_v15  ;;  %v1573_v13 = vadd.f32 %v1557_v10, %v1541_v4  ;;  %v1497_v18 = vsel %vm635_vm3, %v1481_v62, %v1466_v1 }
 0x2e9   : > { %v5084_v20 = vpack.c.bf16 %v1591_v19, %v1590_v50  ;;  %v1513_v57 = vmul.f32 %v3798_v53, %v5951_v43  ;;  %v1514_v32 = vmul.f32 %v1465_v60, %v5952_v49  ;;  %v1529_v48 = vmul.f32 %v1450_v14, %v5953_v58 }
 0x2ea   : > { %v1589_v52 = vadd.f32 %v4982_v30, %v1569_v17  ;;  %v1512_v42 = vmul.f32 %v3797_v51, %v5954_v31  ;;  %v1447_v9 = vrot.slane %v1422_v39, 7  ;;  %v1479_v24 = vrot.slane %v1422_v39, 1 }
 0x2eb   : > { %v1530_v4 = vadd.f32 %v1514_v32, %v1498_v45  ;;  %v1545_v55 = vadd.f32 %v1529_v48, %v1513_v57  ;;  %v1561_v44 = vmul.f32 %v1497_v18, %v5955_v34  ;;  %v1511_v1 = vmul.f32 %v1422_v39, %v5956_v22  ;;  %v5957_v45 = vld [vmem:[#allocation29_spill] sm:$0xff] }
 0x2ec   : > { %v1451_v33 = vsel %vm602_vm2, %v1447_v9, %v1448_v8  ;;  %v1452_v53 = vsel %vm602_vm2, %v1446_v11, %v1447_v9  ;;  %v1483_v37 = vsel %vm635_vm3, %v1479_v24, %v1480_v46  ;;  %v1484_v17 = vsel %vm635_vm3, %v1478_v38, %v1479_v24 }
 0x2ed   : > { %v1562_v51 = vadd.f32 %v1546_v3, %v1530_v4  ;;  %v1577_v23 = vadd.f32 %v1561_v44, %v1545_v55  ;;  %v1527_v47 = vmul.f32 %v1452_v53, %v5957_v45  ;;  %v1528_v21 = vmul.f32 %v1451_v33, %v5958_v40  ;;  %v5961_v3 = vld [vmem:[#allocation34_spill] sm:$0xff] }
 0x2ee   : > { %v1588_v39 = vadd.f32 %v4982_v30, %v5017_v0  ;;  %v1560_v8 = vmul.f32 %v1482_v36, %v5959_v27  ;;  %v1558_v54 = vmul.f32 %v1484_v17, %v5960_v7  ;;  %v1615_v11 = vmul.bf16 %v5044_v56, %v5044_v56 }
 0x2ef   : > { %v1582_v46 = vadd.f32 %v4982_v30, %v1562_v51  ;;  %v1543_v62 = vadd.f32 %v1527_v47, %v1511_v1  ;;  %v1544_v38 = vadd.f32 %v1528_v21, %v1512_v42  ;;  %v1559_v2 = vmul.f32 %v1483_v37, %v5961_v3 }
 0x2f0   : > { %v1593_v28 = vadd.f32 %v4982_v30, %v1573_v13  ;;  %v1574_v26 = vadd.f32 %v1558_v54, %v1542_v5  ;;  %v1623_v41 = vmul.bf16 %v1615_v11, %v5044_v56  ;;  %v5113_v15 = vpack.c.bf16 %v1589_v52, %v1588_v39 }
 0x2f1   : > { %v1597_v0 = vadd.f32 %v4982_v30, %v1577_v23  ;;  %v1598_v59 = vpack.c.bf16 %v1583_v12, %v1582_v46  ;;  %v1575_v16 = vadd.f32 %v1559_v2, %v1543_v62  ;;  %v1576_v25 = vadd.f32 %v1560_v8, %v1544_v38 }
 0x2f2   : > { %v1592_v10 = vadd.f32 %v4982_v30, %v1572_v6  ;;  %v1594_v14 = vadd.f32 %v4982_v30, %v1574_v26  ;;  %v1631_v36 = vmul.bf16 1027030327, %v1623_v41  ;;  %v1616_v5 = vmul.bf16 %v5038_v63, %v5038_v63 }
 0x2f3   : > { %v1595_v50 = vadd.f32 %v4982_v30, %v1575_v16  ;;  %v1596_v19 = vadd.f32 %v4982_v30, %v1576_v25  ;;  %v1614_v60 = vmul.bf16 %v1598_v59, %v1598_v59  ;;  %v1617_v52 = vmul.bf16 %v5113_v15, %v5113_v15 }
 0x2f4   : > { %v5124_v43 = vpack.c.bf16 %v1593_v28, %v1592_v10  ;;  %v1639_v49 = vadd.bf16 %v1631_v36, %v5044_v56  ;;  %v1624_v32 = vmul.bf16 %v1616_v5, %v5038_v63  ;;  %v1618_v4 = vmul.bf16 %v5084_v20, %v5084_v20 }
 0x2f5   : > { %v5122_v13 = vpack.c.bf16 %v1595_v50, %v1594_v14  ;;  %v1622_v18 = vmul.bf16 %v1614_v60, %v1598_v59  ;;  %v5126_v12 = vpack.c.bf16 %v1597_v0, %v1596_v19  ;;  %v1625_v42 = vmul.bf16 %v1617_v52, %v5113_v15 }
 0x2f6   : > { %v1647_v30 = vmul.bf16 1061961548, %v1639_v49  ;;  %v1632_v48 = vmul.bf16 1027030327, %v1624_v32  ;;  %v1606_v34 = vmul.bf16 1056980736, %v1598_v59  ;;  %v1626_v1 = vmul.bf16 %v1618_v4, %v5084_v20 }
 0x2f7   : > { %v1630_v57 = vmul.bf16 1027030327, %v1622_v18  ;;  %v1633_v24 = vmul.bf16 1027030327, %v1625_v42  ;;  %v1619_v51 = vmul.bf16 %v5124_v43, %v5124_v43  ;;  %v5962_v23 = vmov 0   ;;  %v3983_v42 = vld [vmem:[%s5842_s3 + $0x50] sm:$0xff]  }
 0x2f8   : > { %v1640_v31 = vadd.bf16 %v1632_v48, %v5038_v63  ;;  %v1634_v17 = vmul.bf16 1027030327, %v1626_v1  ;;  %v1607_v47 = vmul.bf16 1056980736, %v5044_v56  ;;  %v1620_v54 = vmul.bf16 %v5122_v13, %v5122_v13  ;;  %v3987_v4 = vld [vmem:[%s5842_s3 + $0x70] sm:$0xff]  }
 0x2f9   : > { %v1638_v6 = vadd.bf16 %v1630_v57, %v1598_v59  ;;  %v1641_v22 = vadd.bf16 %v1633_v24, %v5113_v15  ;;  %v1627_v21 = vmul.bf16 %v1619_v51, %v5124_v43  ;;  %v1608_v56 = vmul.bf16 1056980736, %v5038_v63  ;;  %v3986_v24 = vld [vmem:[%s5842_s3 + $0x68] sm:$0xff]  }
 0x2fa   : > { %v1648_v9 = vmul.bf16 1061961548, %v1640_v31  ;;  %v1642_v40 = vadd.bf16 %v1634_v17, %v5084_v20  ;;  %v1628_v62 = vmul.bf16 %v1620_v54, %v5122_v13  ;;  %v1621_v26 = vmul.bf16 %v5126_v12, %v5126_v12  ;;  %v3981_v31 = vld [vmem:[%s5842_s3 + $0x40] sm:$0xff]  }
 0x2fb   : > { %v1646_v58 = vmul.bf16 1061961548, %v1638_v6  ;;  %v1649_v37 = vmul.bf16 1061961548, %v1641_v22  ;;  %v1635_v7 = vmul.bf16 1027030327, %v1627_v21  ;;  %3799 = vmatprep.subr.bf16.mxu1 %v3981_v31 }
 0x2fc   : > { %v1650_v8 = vmul.bf16 1061961548, %v1642_v40  ;;  %v1636_v28 = vmul.bf16 1027030327, %v1628_v62  ;;  %v1609_v63 = vmul.bf16 1056980736, %v5113_v15  ;;  %v1629_v59 = vmul.bf16 %v1621_v26, %v5126_v12  ;;  %3800 = vmatpush3.bf16.msra.mxu1 %v3981_v31 }
 0x2fd   : > { %4061 = vtanh.bf16 %v1646_v58  ;;  %v1643_v46 = vadd.bf16 %v1635_v7, %v5124_v43  ;;  %v1610_v19 = vmul.bf16 1056980736, %v5084_v20  ;;  %v1611_v57 = vmul.bf16 1056980736, %v5124_v43 }
 0x2fe   : > { %4063 = vtanh.bf16 %v1647_v30  ;;  %v1644_v0 = vadd.bf16 %v1636_v28, %v5122_v13  ;;  %v1637_v14 = vmul.bf16 1027030327, %v1629_v59  ;;  %v1612_v32 = vmul.bf16 1056980736, %v5122_v13  ;;  %v3982_v13 = vld [vmem:[%s5842_s3 + $0x48] sm:$0xff]  }
 0x2ff   : > { %4065 = vtanh.bf16 %v1648_v9  ;;  %v1651_v2 = vmul.bf16 1061961548, %v1643_v46  ;;  %v1613_v43 = vmul.bf16 1056980736, %v5126_v12  ;;  %3801 = vmatprep.subr.bf16.mxu1 %v3982_v13  ;;  %v3985_v9 = vld [vmem:[%s5842_s3 + $0x60] sm:$0xff]  }
 0x300   : > { %4067 = vtanh.bf16 %v1649_v37  ;;  %v1652_v10 = vmul.bf16 1061961548, %v1644_v0  ;;  %v1645_v15 = vadd.bf16 %v1637_v14, %v5126_v12  ;;  %3802 = vmatpush3.bf16.msra.mxu1 %v3982_v13  ;;  %v3984_v12 = vld [vmem:[%s5842_s3 + $0x58] sm:$0xff]  }
 0x301   : > { %4069 = vtanh.bf16 %v1650_v8  ;;  %3803 = vmatprep.subr.bf16.mxu1 %v3983_v42 }
 0x302   : > { %4071 = vtanh.bf16 %v1651_v2  ;;  %v1653_v5 = vmul.bf16 1061961548, %v1645_v15 }
 0x303   : > { %4073 = vtanh.bf16 %v1652_v10 }
 0x304   : > { %4075 = vtanh.bf16 %v1653_v5  ;;  %3804 = vmatpush3.bf16.msra.mxu1 %v3983_v42 }
 0x305   : > { %3805 = vmatprep.subr.bf16.mxu1 %v3984_v12 }
 0x308   : > { %v4062_v55 = vpop.eup %4061  ;;  %3806 = vmatpush3.bf16.msra.mxu1 %v3984_v12 }
 0x309   : > { %v1662_v44 = vadd.bf16 1065369472, %v4062_v55  ;;  %v4064_v53 = vpop.eup %4063  ;;  %3807 = vmatprep.subr.bf16.mxu1 %v3985_v9  ;;  %v3988_v55 = vld [vmem:[%s5842_s3 + $0x78] sm:$0xff]  }
 0x30a   : > { %v1663_v45 = vadd.bf16 1065369472, %v4064_v53  ;;  %v4066_v27 = vpop.eup %4065 }
 0x30b   : > { %v5138_v33 = vmul.bf16 %v1662_v44, %v1606_v34  ;;  %v1664_v11 = vadd.bf16 1065369472, %v4066_v27  ;;  %v4068_v3 = vpop.eup %4067  ;;  %v1889_v34 = vsub.s32 2, %v4438_v61  ;;  %v1989_v44 = vsub.s32 4, %v4438_v61 }
 0x30c   : > { %v5147_v39 = vmul.bf16 %v1663_v45, %v1607_v47  ;;  %v1665_v41 = vadd.bf16 1065369472, %v4068_v3  ;;  %v4070_v25 = vpop.eup %4069  ;;  %3808 = vmatpush3.bf16.msra.mxu1 %v3985_v9 }
 0x30d   : > { %1807 = vmatmul.mubr.bf16.vlgmr.msra.gmra.mrb[16].mxu0 %v5138_v33  ;;  %v5156_v38 = vmul.bf16 %v1664_v11, %v1608_v56  ;;  %v1666_v50 = vadd.bf16 1065369472, %v4070_v25  ;;  %v4072_v36 = vpop.eup %4071  ;;  %3809 = vmatprep.subr.bf16.mxu1 %v3986_v24  ;;  %v5216_v22 = vrot.slane %v4977_v29, %v1889_v34  ;;  %v5219_v53 = vrot.slane %v4977_v29, %v1989_v44 }
 0x30e   : > { %1816 = vmatprep.mubr.bf16.mxu0 %v5962_v23  ;;  %v5165_v16 = vmul.bf16 %v1665_v41, %v1609_v63  ;;  %v1667_v18 = vadd.bf16 1065369472, %v4072_v36  ;;  %v4074_v49 = vpop.eup %4073 }
 0x30f   : > { %v5171_v60 = vmul.bf16 %v1666_v50, %v1610_v19  ;;  %v1668_v20 = vadd.bf16 1065369472, %v4074_v49  ;;  %v4076_v30 = vpop.eup %4075 }
 0x310   : > { %v5176_v6 = vmul.bf16 %v1667_v18, %v1611_v57  ;;  %v1669_v48 = vadd.bf16 1065369472, %v4076_v30  ;;  %3810 = vmatpush3.bf16.msra.mxu1 %v3986_v24 }
 0x311   : > { %v5181_v58 = vmul.bf16 %v1668_v20, %v1612_v32  ;;  %3811 = vmatprep.subr.bf16.mxu1 %v3987_v4 }
 0x312   : > { %v5186_v52 = vmul.bf16 %v1669_v48, %v1613_v43 }
 0x314   : > { %3812 = vmatpush3.bf16.msra.mxu1 %v3987_v4 }
 0x315   : > { %1817 = vmatmul.mubr.bf16.gmra.mrb[20].mxu0 %v5147_v39  ;;  %3813 = vmatprep.subr.bf16.mxu1 %v3988_v55 }
 0x316   : > { %1826 = vmatprep.mubr.bf16.mxu0 %v5962_v23 }
 0x318   : > { %3814 = vmatpush3.bf16.msra.mxu1 %v3988_v55 }
 0x31d   : > { %1827 = vmatmul.mubr.bf16.gmra.mrb[24].mxu0 %v5156_v38 }
 0x31e   : > { %1836 = vmatprep.mubr.bf16.mxu0 %v5962_v23 }
 0x325   : > { %1837 = vmatmul.mubr.bf16.gmra.mrb[28].mxu0 %v5165_v16 }
 0x326   : > { %1846 = vmatprep.mubr.bf16.mxu0 %v5962_v23 }
 0x32d   : > { %1847 = vmatmul.mubr.bf16.gmra.mrb[32].mxu0 %v5171_v60 }
 0x32e   : > { %1856 = vmatprep.mubr.bf16.mxu0 %v5962_v23 }
 0x335   : > { %1857 = vmatmul.mubr.bf16.gmra.mrb[36].mxu0 %v5176_v6 }
 0x336   : > { %1866 = vmatprep.mubr.bf16.mxu0 %v5962_v23 }
 0x33d   : > { %1867 = vmatmul.mubr.bf16.gmra.mrb[40].mxu0 %v5181_v58 }
 0x33e   : > { %1876 = vmatprep.mubr.bf16.mxu0 %v5962_v23 }
 0x345   : > { %1877 = vmatmul.mubr.bf16.gmra.mrb[44].mxu0 %v5186_v52 }
 0x3e0   : > { %v1808_v1 = vpop.f32.mrb[16].mxu0 }
 0x3e1   : > { %v1810_v37 = vpop.f32.mrb[17].mxu0  ;;  %v1891_v51 = vadd.f32 %v5216_v22, %v1808_v1 }
 0x3e2   : > { %v1812_v17 = vpop.f32.mrb[18].mxu0  ;;  %v1991_v47 = vadd.f32 %v5219_v53, %v1810_v37 }
 0x3e3   : > { %v1892_v23 = vadd.f32 %v5216_v22, %v1812_v17  ;;  %v1814_v45 = vpop.f32.mrb[19].mxu0 }
 0x3e4   : > { %v1992_v40 = vadd.f32 %v5219_v53, %v1814_v45 }
 0x3e5   : > { %v5225_v21 = vpack.c.bf16 %v1892_v23, %v1891_v51 }
 0x3e6   : > { %v5227_v27 = vpack.c.bf16 %v1992_v40, %v1991_v47 }
 0x3e7   : > { %v1923_v8 = vmul.bf16 %v5225_v21, %v5225_v21 }
 0x3e8   : > { %v2023_v29 = vmul.bf16 %v5227_v27, %v5227_v27  ;;  %v1818_v7 = vpop.f32.mrb[20].mxu0 }
 0x3e9   : > { %v1931_v54 = vmul.bf16 %v1923_v8, %v5225_v21  ;;  %v1820_v11 = vpop.f32.mrb[21].mxu0  ;;  %v1893_v3 = vadd.f32 %v5216_v22, %v1818_v7 }
 0x3ea   : > { %v2031_v56 = vmul.bf16 %v2023_v29, %v5227_v27  ;;  %v1822_v46 = vpop.f32.mrb[22].mxu0  ;;  %v1993_v41 = vadd.f32 %v5219_v53, %v1820_v11 }
 0x3eb   : > { %v1939_v62 = vmul.bf16 1027030327, %v1931_v54  ;;  %v1894_v2 = vadd.f32 %v5216_v22, %v1822_v46  ;;  %v1824_v28 = vpop.f32.mrb[23].mxu0 }
 0x3ec   : > { %v2039_v26 = vmul.bf16 1027030327, %v2031_v56  ;;  %v1994_v63 = vadd.f32 %v5219_v53, %v1824_v28 }
 0x3ed   : > { %v5239_v0 = vpack.c.bf16 %v1894_v2, %v1893_v3  ;;  %v1947_v59 = vadd.bf16 %v1939_v62, %v5225_v21  ;;  %v1915_v62 = vmul.bf16 1056980736, %v5225_v21  ;;  %v384_v2 = vld [vmem:[%s5845_s6] sm:$0x3] }
 0x3ee   : > { %v2047_v25 = vadd.bf16 %v2039_v26, %v5227_v27  ;;  %v5243_v10 = vpack.c.bf16 %v1994_v63, %v1993_v41  ;;  %v2015_v63 = vmul.bf16 1056980736, %v5227_v27 }
 0x3ef   : > { %v1924_v14 = vmul.bf16 %v5239_v0, %v5239_v0  ;;  %v1955_v50 = vmul.bf16 1061961548, %v1947_v59 }
 0x3f0   : > { %v2024_v19 = vmul.bf16 %v5243_v10, %v5243_v10  ;;  %v1828_v15 = vpop.f32.mrb[24].mxu0  ;;  %v2055_v36 = vmul.bf16 1061961548, %v2047_v25 }
 0x3f1   : > { %v1932_v5 = vmul.bf16 %v1924_v14, %v5239_v0  ;;  %v1830_v18 = vpop.f32.mrb[25].mxu0  ;;  %4077 = vtanh.bf16 %v1955_v50  ;;  %v1895_v32 = vadd.f32 %v5216_v22, %v1828_v15 }
 0x3f2   : > { %v2032_v57 = vmul.bf16 %v2024_v19, %v5243_v10  ;;  %v1832_v49 = vpop.f32.mrb[26].mxu0  ;;  %4079 = vtanh.bf16 %v2055_v36  ;;  %v1995_v31 = vadd.f32 %v5219_v53, %v1830_v18  ;;  %v5963_v36 = vsub.s32 0, %v4438_v61 }
 0x3f3   : > { %v1940_v20 = vmul.bf16 1027030327, %v1932_v5  ;;  %v1896_v30 = vadd.f32 %v5216_v22, %v1832_v49  ;;  %v1834_v48 = vpop.f32.mrb[27].mxu0 }
 0x3f4   : > { %v2040_v43 = vmul.bf16 1027030327, %v2032_v57  ;;  %v1996_v13 = vadd.f32 %v5219_v53, %v1834_v48  ;;  %v5288_v5 = vrot.slane %v384_v2, %v5963_v36 }
 0x3f5   : > { %v1948_v42 = vadd.bf16 %v1940_v20, %v5239_v0  ;;  %v5256_v12 = vpack.c.bf16 %v1896_v30, %v1895_v32 }
 0x3f6   : > { %v2048_v9 = vadd.bf16 %v2040_v43, %v5243_v10  ;;  %v5259_v24 = vpack.c.bf16 %v1996_v13, %v1995_v31 }
 0x3f7   : > { %v1956_v4 = vmul.bf16 1061961548, %v1948_v42  ;;  %v1925_v55 = vmul.bf16 %v5256_v12, %v5256_v12 }
 0x3f8   : > { %v2025_v34 = vmul.bf16 %v5259_v24, %v5259_v24  ;;  %v1838_v44 = vpop.f32.mrb[28].mxu0  ;;  %v2056_v1 = vmul.bf16 1061961548, %v2048_v9 }
 0x3f9   : > { %4081 = vtanh.bf16 %v1956_v4  ;;  %v1933_v37 = vmul.bf16 %v1925_v55, %v5256_v12  ;;  %v1840_v17 = vpop.f32.mrb[29].mxu0  ;;  %v1897_v47 = vadd.f32 %v5216_v22, %v1838_v44 }
 0x3fa   : > { %v2033_v51 = vmul.bf16 %v2025_v34, %v5259_v24  ;;  %v1842_v23 = vpop.f32.mrb[30].mxu0  ;;  %4083 = vtanh.bf16 %v2056_v1  ;;  %v1997_v54 = vadd.f32 %v5219_v53, %v1840_v17 }
 0x3fb   : > { %v1941_v45 = vmul.bf16 1027030327, %v1933_v37  ;;  %v1898_v40 = vadd.f32 %v5216_v22, %v1842_v23  ;;  %v1844_v8 = vpop.f32.mrb[31].mxu0  ;;  %v1916_v37 = vmul.bf16 1056980736, %v5239_v0 }
 0x3fc   : > { %v4078_v29 = vpop.eup %4077  ;;  %v2041_v7 = vmul.bf16 1027030327, %v2033_v51  ;;  %v1998_v11 = vadd.f32 %v5219_v53, %v1844_v8 }
 0x3fd   : > { %v4080_v56 = vpop.eup %4079  ;;  %v5271_v46 = vpack.c.bf16 %v1898_v40, %v1897_v47  ;;  %v1971_v3 = vadd.bf16 1065369472, %v4078_v29  ;;  %v1949_v28 = vadd.bf16 %v1941_v45, %v5256_v12  ;;  %v2016_v40 = vmul.bf16 1056980736, %v5243_v10 }
 0x3fe   : > { %v2049_v26 = vadd.bf16 %v2041_v7, %v5259_v24  ;;  %v5279_v41 = vpack.c.bf16 %v1998_v11, %v1997_v54  ;;  %v2071_v59 = vadd.bf16 1065369472, %v4080_v56 }
 0x3ff   : > { %v1926_v25 = vmul.bf16 %v5271_v46, %v5271_v46  ;;  %v1979_v14 = vmul.bf16 %v1971_v3, %v1915_v62  ;;  %v1957_v50 = vmul.bf16 1061961548, %v1949_v28 }
 0x400   : > { %v2026_v21 = vmul.bf16 %v5279_v41, %v5279_v41  ;;  %v1848_v19 = vpop.f32.mrb[32].mxu0  ;;  %v2079_v15 = vmul.bf16 %v2071_v59, %v2015_v63  ;;  %v2057_v18 = vmul.bf16 1061961548, %v2049_v26  ;;  %v1917_v63 = vmul.bf16 1056980736, %v5256_v12 }
 0x401   : > { %v1934_v57 = vmul.bf16 %v1926_v25, %v5271_v46  ;;  %v1850_v49 = vpop.f32.mrb[33].mxu0  ;;  %3815 = vmatprep.mubr.bf16.mxu1 %v1979_v14  ;;  %4085 = vtanh.bf16 %v1957_v50  ;;  %v1899_v20 = vadd.f32 %v5216_v22, %v1848_v19 }
 0x402   : > { %v2034_v27 = vmul.bf16 %v2026_v21, %v5279_v41  ;;  %v1852_v32 = vpop.f32.mrb[34].mxu0  ;;  %v2518_v30 = vunpack.c.h.bf16 %v2079_v15  ;;  %v2517_v48 = vunpack.c.l.bf16 %v2079_v15  ;;  %v1999_v31 = vadd.f32 %v5219_v53, %v1850_v49 }
 0x403   : > { %v1942_v43 = vmul.bf16 1027030327, %v1934_v57  ;;  %v1900_v13 = vadd.f32 %v5216_v22, %v1852_v32  ;;  %v1854_v42 = vpop.f32.mrb[35].mxu0  ;;  %4087 = vtanh.bf16 %v2057_v18 }
 0x404   : > { %v4082_v9 = vpop.eup %4081  ;;  %v2042_v4 = vmul.bf16 1027030327, %v2034_v27  ;;  %v2000_v55 = vadd.f32 %v5219_v53, %v1854_v42  ;;  %v2538_v34 = vmul.f32 %v5288_v5, %v2518_v30  ;;  %v2537_v44 = vmul.f32 %v5288_v5, %v2517_v48 }
 0x405   : > { %v4084_v1 = vpop.eup %4083  ;;  %v5299_v17 = vpack.c.bf16 %v1900_v13, %v1899_v20  ;;  %v1972_v51 = vadd.bf16 1065369472, %v4082_v9  ;;  %v1950_v23 = vadd.bf16 %v1942_v43, %v5271_v46  ;;  %v2017_v48 = vmul.bf16 1056980736, %v5259_v24 }
 0x406   : > { %v2050_v45 = vadd.bf16 %v2042_v4, %v5279_v41  ;;  %v5303_v47 = vpack.c.bf16 %v2000_v55, %v1999_v31  ;;  %2555 = vadd.xlane.f32.xlu1 %v2538_v34  ;;  %2553 = vadd.xlane.f32.xlu0 %v2537_v44  ;;  %v2072_v8 = vadd.bf16 1065369472, %v4084_v1 }
 0x407   : > { %v1927_v29 = vmul.bf16 %v5299_v17, %v5299_v17  ;;  %v1980_v7 = vmul.bf16 %v1972_v51, %v1916_v37  ;;  %v1958_v54 = vmul.bf16 1061961548, %v1950_v23 }
 0x408   : > { %v2027_v0 = vmul.bf16 %v5303_v47, %v5303_v47  ;;  %v1858_v11 = vpop.f32.mrb[36].mxu0  ;;  %v2080_v56 = vmul.bf16 %v2072_v8, %v2016_v40  ;;  %v2058_v2 = vmul.bf16 1061961548, %v2050_v45 }
 0x409   : > { %v1935_v62 = vmul.bf16 %v1927_v29, %v5299_v17  ;;  %v1860_v3 = vpop.f32.mrb[37].mxu0  ;;  %3816 = vmatmul.mubr.bf16.vlgmr.msra.gmra.mrb[16].mxu1 %v1980_v7  ;;  %4089 = vtanh.bf16 %v1958_v54  ;;  %v1901_v25 = vadd.f32 %v5216_v22, %v1858_v11 }
 0x40a   : > { %v2035_v28 = vmul.bf16 %v2027_v0, %v5303_v47  ;;  %v1862_v10 = vpop.f32.mrb[38].mxu0  ;;  %v2519_v26 = vunpack.c.l.bf16 %v2080_v56  ;;  %v2001_v14 = vadd.f32 %v5219_v53, %v1860_v3  ;;  %v2520_v57 = vunpack.c.h.bf16 %v2080_v56 }
 0x40b   : > { %v1943_v59 = vmul.bf16 1027030327, %v1935_v62  ;;  %v1902_v50 = vadd.f32 %v5216_v22, %v1862_v10  ;;  %v1864_v21 = vpop.f32.mrb[39].mxu0  ;;  %4091 = vtanh.bf16 %v2058_v2  ;;  %v1918_v56 = vmul.bf16 1056980736, %v5271_v46 }
 0x40c   : > { %v4086_v19 = vpop.eup %4085  ;;  %v2043_v15 = vmul.bf16 1027030327, %v2035_v28  ;;  %v2002_v36 = vadd.f32 %v5219_v53, %v1864_v21  ;;  %v2539_v18 = vmul.f32 %v5288_v5, %v2519_v26  ;;  %v2540_v55 = vmul.f32 %v5288_v5, %v2520_v57 }
 0x40d   : > { %v5318_v49 = vpack.c.bf16 %v1902_v50, %v1901_v25  ;;  %v1973_v27 = vadd.bf16 1065369472, %v4086_v19  ;;  %v1951_v12 = vadd.bf16 %v1943_v59, %v5299_v17 }
 0x40e   : > { %v4088_v20 = vpop.eup %4087  ;;  %v2051_v32 = vadd.bf16 %v2043_v15, %v5303_v47  ;;  %v5322_v30 = vpack.c.bf16 %v2002_v36, %v2001_v14  ;;  %2557 = vadd.xlane.f32.xlu0 %v2539_v18 }
 0x40f   : > { %v1928_v43 = vmul.bf16 %v5318_v49, %v5318_v49  ;;  %v1981_v31 = vmul.bf16 %v1973_v27, %v1917_v63  ;;  %v2073_v13 = vadd.bf16 1065369472, %v4088_v20  ;;  %v1959_v42 = vmul.bf16 1061961548, %v1951_v12 }
 0x410   : > { %v2028_v9 = vmul.bf16 %v5322_v30, %v5322_v30  ;;  %v1868_v4 = vpop.f32.mrb[40].mxu0  ;;  %v2059_v34 = vmul.bf16 1061961548, %v2051_v32  ;;  %v2018_v12 = vmul.bf16 1056980736, %v5279_v41 }
 0x411   : > { %v1936_v44 = vmul.bf16 %v1928_v43, %v5318_v49  ;;  %v1870_v1 = vpop.f32.mrb[41].mxu0  ;;  %3819 = vmatprep.mubr.bf16.mxu1 %v1981_v31  ;;  %v2081_v37 = vmul.bf16 %v2073_v13, %v2017_v48  ;;  %4093 = vtanh.bf16 %v1959_v42  ;;  %v1903_v45 = vadd.f32 %v5216_v22, %v1868_v4 }
 0x412   : > { %v2036_v24 = vmul.bf16 %v2028_v9, %v5322_v30  ;;  %2559 = vadd.xlane.f32.xlu0 %v2540_v55  ;;  %v1872_v51 = vpop.f32.mrb[42].mxu0  ;;  %4095 = vtanh.bf16 %v2059_v34  ;;  %v2003_v0 = vadd.f32 %v5219_v53, %v1870_v1  ;;  %v1919_v41 = vmul.bf16 1056980736, %v5299_v17 }
 0x413   : > { %v1944_v23 = vmul.bf16 1027030327, %v1936_v44  ;;  %v1904_v40 = vadd.f32 %v5216_v22, %v1872_v51  ;;  %v1874_v8 = vpop.f32.mrb[43].mxu0  ;;  %v2521_v29 = vunpack.c.l.bf16 %v2081_v37  ;;  %v2522_v28 = vunpack.c.h.bf16 %v2081_v37 }
 0x414   : > { %v4090_v7 = vpop.eup %4089  ;;  %v2044_v54 = vmul.bf16 1027030327, %v2036_v24  ;;  %v2004_v11 = vadd.f32 %v5219_v53, %v1874_v8  ;;  %v2019_v1 = vmul.bf16 1056980736, %v5303_v47 }
 0x415   : > { %v5337_v62 = vpack.c.bf16 %v1904_v40, %v1903_v45  ;;  %v2541_v3 = vmul.f32 %v5288_v5, %v2521_v29  ;;  %v1974_v2 = vadd.bf16 1065369472, %v4090_v7  ;;  %v1952_v63 = vadd.bf16 %v1944_v23, %v5318_v49 }
 0x416   : > { %v2052_v10 = vadd.bf16 %v2044_v54, %v5322_v30  ;;  %v5341_v26 = vpack.c.bf16 %v2004_v11, %v2003_v0  ;;  %v4092_v14 = vpop.eup %4091  ;;  %v2542_v18 = vmul.f32 %v5288_v5, %v2522_v28 }
 0x417   : > { %v1929_v59 = vmul.bf16 %v5337_v62, %v5337_v62  ;;  %2561 = vadd.xlane.f32.xlu0 %v2541_v3  ;;  %v1982_v25 = vmul.bf16 %v1974_v2, %v1918_v56  ;;  %v1960_v21 = vmul.bf16 1061961548, %v1952_v63  ;;  %v2074_v31 = vadd.bf16 1065369472, %v4092_v14 }
 0x418   : > { %v2029_v46 = vmul.bf16 %v5341_v26, %v5341_v26  ;;  %v1878_v50 = vpop.f32.mrb[44].mxu0  ;;  %v2060_v19 = vmul.bf16 1061961548, %v2052_v10 }
 0x419   : > { %v1937_v15 = vmul.bf16 %v1929_v59, %v5337_v62  ;;  %v1880_v36 = vpop.f32.mrb[45].mxu0  ;;  %3820 = vmatmul.mubr.bf16.gmra.mrb[20].mxu1 %v1982_v25  ;;  %4097 = vtanh.bf16 %v1960_v21  ;;  %v1905_v32 = vadd.f32 %v5216_v22, %v1878_v50  ;;  %v2082_v45 = vmul.bf16 %v2074_v31, %v2018_v12 }
 0x41a   : > { %v2037_v57 = vmul.bf16 %v2029_v46, %v5341_v26  ;;  %v1882_v27 = vpop.f32.mrb[46].mxu0  ;;  %v2005_v9 = vadd.f32 %v5219_v53, %v1880_v36  ;;  %4099 = vtanh.bf16 %v2060_v19  ;;  %v1920_v25 = vmul.bf16 1056980736, %v5318_v49 }
 0x41b   : > { %v1945_v20 = vmul.bf16 1027030327, %v1937_v15  ;;  %2563 = vadd.xlane.f32.xlu0 %v2542_v18  ;;  %v1906_v48 = vadd.f32 %v5216_v22, %v1882_v27  ;;  %v1884_v43 = vpop.f32.mrb[47].mxu0  ;;  %v2523_v28 = vunpack.c.l.bf16 %v2082_v45  ;;  %v2524_v50 = vunpack.c.h.bf16 %v2082_v45 }
 0x41c   : > { %v4094_v13 = vpop.eup %4093  ;;  %v2045_v42 = vmul.bf16 1027030327, %v2037_v57  ;;  %v2006_v4 = vadd.f32 %v5219_v53, %v1884_v43  ;;  %v2020_v21 = vmul.bf16 1056980736, %v5322_v30  ;;  %v2021_v43 = vmul.bf16 1056980736, %v5341_v26 }
 0x41d   : > { %v4096_v55 = vpop.eup %4095  ;;  %v5356_v34 = vpack.c.bf16 %v1906_v48, %v1905_v32  ;;  %v1975_v44 = vadd.bf16 1065369472, %v4094_v13  ;;  %v1953_v51 = vadd.bf16 %v1945_v20, %v5337_v62  ;;  %v2543_v18 = vmul.f32 %v5288_v5, %v2523_v28 }
 0x41e   : > { %v2053_v37 = vadd.bf16 %v2045_v42, %v5341_v26  ;;  %v5361_v22 = vpack.c.bf16 %v2006_v4, %v2005_v9  ;;  %v2075_v24 = vadd.bf16 1065369472, %v4096_v55  ;;  %v2544_v12 = vmul.f32 %v5288_v5, %v2524_v50 }
 0x41f   : > { %v1930_v23 = vmul.bf16 %v5356_v34, %v5356_v34  ;;  %v1983_v53 = vmul.bf16 %v1975_v44, %v1919_v41  ;;  %v1961_v29 = vmul.bf16 1061961548, %v1953_v51  ;;  %v1921_v13 = vmul.bf16 1056980736, %v5337_v62 }
 0x420   : > { %v2061_v40 = vmul.bf16 1061961548, %v2053_v37  ;;  %v2030_v8 = vmul.bf16 %v5361_v22, %v5361_v22  ;;  %v2083_v17 = vmul.bf16 %v2075_v24, %v2019_v1  ;;  %v1922_v24 = vmul.bf16 1056980736, %v5356_v34 }
 0x421   : > { %v1938_v47 = vmul.bf16 %v1930_v23, %v5356_v34  ;;  %3823 = vmatprep.mubr.bf16.mxu1 %v1983_v53  ;;  %v2022_v23 = vmul.bf16 1056980736, %v5361_v22 }
 0x422   : > { %4101 = vtanh.bf16 %v2061_v40  ;;  %v2038_v7 = vmul.bf16 %v2030_v8, %v5361_v22  ;;  %v2526_v54 = vunpack.c.h.bf16 %v2083_v17  ;;  %v2525_v0 = vunpack.c.l.bf16 %v2083_v17 }
 0x423   : > { %v1946_v11 = vmul.bf16 1027030327, %v1938_v47  ;;  %4103 = vtanh.bf16 %v1961_v29 }
 0x424   : > { %v2046_v56 = vmul.bf16 1027030327, %v2038_v7  ;;  %v2546_v3 = vmul.f32 %v5288_v5, %v2526_v54  ;;  %v2545_v2 = vmul.f32 %v5288_v5, %v2525_v0  ;;  %v4098_v10 = vpop.eup %4097  ;;  %v3991_v7 = vld [vmem:[%s5844_s5 + $0x10] sm:$0xff]   ;;  %v3993_v54 = vld [vmem:[%s5844_s5 + $0x20] sm:$0xff]   ;;  %v3994_v0 = vld [vmem:[%s5844_s5 + $0x28] sm:$0xff]  }
 0x425   : > { %v1954_v63 = vadd.bf16 %v1946_v11, %v5356_v34  ;;  %v1976_v14 = vadd.bf16 1065369472, %v4098_v10  ;;  %v4100_v46 = vpop.eup %4099  ;;  %v3989_v34 = vld [vmem:[%s5844_s5] sm:$0xff]   ;;  %v3995_v11 = vld [vmem:[%s5844_s5 + $0x30] sm:$0xff]  }
 0x426   : > { %v2054_v59 = vadd.bf16 %v2046_v56, %v5361_v22  ;;  %2571 = vadd.xlane.f32.xlu1 %v2546_v3  ;;  %2569 = vadd.xlane.f32.xlu0 %v2545_v2  ;;  %v2076_v57 = vadd.bf16 1065369472, %v4100_v46  ;;  %v3990_v22 = vld [vmem:[%s5844_s5 + $0x8] sm:$0xff]   ;;  %v3996_v56 = vld [vmem:[%s5844_s5 + $0x38] sm:$0xff]   ;;  %v5415_v3 = vld [vmem:[%s5847_s8] ss:$0 sm:$0xff] }
 0x427   : > { %v1962_v19 = vmul.bf16 1061961548, %v1954_v63  ;;  %v1984_v36 = vmul.bf16 %v1976_v14, %v1920_v25  ;;  %3831 = vmatprep.subr.bf16.mxu1 %v3989_v34 }
 0x428   : > { %v2062_v15 = vmul.bf16 1061961548, %v2054_v59  ;;  %v2084_v27 = vmul.bf16 %v2076_v57, %v2020_v21  ;;  %3832 = vmatpush3.bf16.msra.mxu1 %v3989_v34 }
 0x429   : > { %4105 = vtanh.bf16 %v1962_v19  ;;  %3824 = vmatmul.mubr.bf16.gmra.mrb[24].mxu1 %v1984_v36  ;;  %3833 = vmatprep.subr.bf16.mxu1 %v3990_v22 }
 0x42a   : > { %4107 = vtanh.bf16 %v2062_v15  ;;  %2565 = vadd.xlane.f32.xlu0 %v2543_v18  ;;  %v2527_v20 = vunpack.c.l.bf16 %v2084_v27  ;;  %v2528_v30 = vunpack.c.h.bf16 %v2084_v27 }
 0x42c   : > { %v2547_v48 = vmul.f32 %v5288_v5, %v2527_v20  ;;  %v2548_v55 = vmul.f32 %v5288_v5, %v2528_v30  ;;  %3834 = vmatpush3.bf16.msra.mxu1 %v3990_v22 }
 0x42d   : > { %v4102_v49 = vpop.eup %4101  ;;  %3835 = vmatprep.subr.bf16.mxu1 %v3991_v7 }
 0x42e   : > { %v4104_v32 = vpop.eup %4103  ;;  %2567 = vadd.xlane.f32.xlu0 %v2544_v12  ;;  %v2077_v31 = vadd.bf16 1065369472, %v4102_v49  ;;  %2573 = vadd.xlane.f32.xlu1 %v2547_v48 }
 0x42f   : > { %v1977_v42 = vadd.bf16 1065369472, %v4104_v32 }
 0x430   : > { %v2085_v9 = vmul.bf16 %v2077_v31, %v2021_v43  ;;  %3836 = vmatpush3.bf16.msra.mxu1 %v3991_v7 }
 0x431   : > { %v1985_v4 = vmul.bf16 %v1977_v42, %v1921_v13 }
 0x432   : > { %v2529_v41 = vunpack.c.l.bf16 %v2085_v9  ;;  %2575 = vadd.xlane.f32.xlu1 %v2548_v55  ;;  %v2530_v26 = vunpack.c.h.bf16 %v2085_v9 }
 0x433   : > { %3827 = vmatprep.mubr.bf16.mxu1 %v1985_v4 }
 0x434   : > { %v4106_v44 = vpop.eup %4105  ;;  %v2549_v1 = vmul.f32 %v5288_v5, %v2529_v41  ;;  %v2550_v40 = vmul.f32 %v5288_v5, %v2530_v26 }
 0x435   : > { %v4108_v37 = vpop.eup %4107  ;;  %v1978_v51 = vadd.bf16 1065369472, %v4106_v44 }
 0x436   : > { %v2078_v62 = vadd.bf16 1065369472, %v4108_v37  ;;  %2577 = vadd.xlane.f32.xlu1 %v2549_v1 }
 0x437   : > { %v1986_v53 = vmul.bf16 %v1978_v51, %v1922_v24 }
 0x438   : > { %v2086_v45 = vmul.bf16 %v2078_v62, %v2022_v23 }
 0x439   : > { %3828 = vmatmul.mubr.bf16.gmra.mrb[28].mxu1 %v1986_v53 }
 0x43a   : > { %v2531_v8 = vunpack.c.l.bf16 %v2086_v45  ;;  %2579 = vadd.xlane.f32.xlu1 %v2550_v40  ;;  %v2532_v29 = vunpack.c.h.bf16 %v2086_v45 }
 0x43c   : > { %v2551_v17 = vmul.f32 %v5288_v5, %v2531_v8  ;;  %v2552_v47 = vmul.f32 %v5288_v5, %v2532_v29  ;;  %v3992_v5 = vld [vmem:[%s5844_s5 + $0x18] sm:$0xff]  }
 0x43d   : > { %3837 = vmatprep.subr.bf16.mxu1 %v3992_v5 }
 0x43e   : > { %2581 = vadd.xlane.f32.xlu1 %v2551_v17  ;;  %3838 = vmatpush3.bf16.msra.mxu1 %v3992_v5 }
 0x43f   : > { %3839 = vmatprep.subr.bf16.mxu1 %v3993_v54 }
 0x442   : > { %2583 = vadd.xlane.f32.xlu1 %v2552_v47  ;;  %3840 = vmatpush3.bf16.msra.mxu1 %v3993_v54 }
 0x443   : > { %3841 = vmatprep.subr.bf16.mxu1 %v3994_v0 }
 0x446   : > { %3842 = vmatpush3.bf16.msra.mxu1 %v3994_v0 }
 0x447   : > { %3843 = vmatprep.subr.bf16.mxu1 %v3995_v11 }
 0x44a   : > { %3844 = vmatpush3.bf16.msra.mxu1 %v3995_v11 }
 0x44b   : > { %3845 = vmatprep.subr.bf16.mxu1 %v3996_v56 }
 0x44e   : > { %3846 = vmatpush3.bf16.msra.mxu1 %v3996_v56 }
 0x493   : > { %v2556_v2 = vpop.xlane.xlu1 %2555  ;;  %v2554_v28 = vpop.xlane.xlu0 %2553 }
 0x494   : > { %v2586_v10 = vadd.f32 %v5415_v3, %v2556_v2  ;;  %v2585_v63 = vadd.f32 %v5415_v3, %v2554_v28 }
 0x496   : > { %v2625_v59 = vsel %vm2617_vm4, %v2586_v10, -inf  ;;  %v2618_v25 = vsel %vm2617_vm4, %v2585_v63, -inf }
 0x497   : > { %v2626_v14 = vrot.slane %v2625_v59, 4  ;;  %v2619_v46 = vrot.slane %v2618_v25, 4 }
 0x499   : > { %v2627_v50 = vmax.f32 %v2625_v59, %v2626_v14  ;;  %v2620_v21 = vmax.f32 %v2618_v25, %v2619_v46 }
 0x49b   : > { %v2628_v19 = vrot.slane %v2627_v50, 2  ;;  %v2621_v15 = vrot.slane %v2620_v21, 2  ;;  %v2558_v36 = vpop.xlane.xlu0 %2557 }
 0x49c   : > { %v2587_v18 = vadd.f32 %v5415_v3, %v2558_v36 }
 0x49d   : > { %v2629_v57 = vmax.f32 %v2627_v50, %v2628_v19  ;;  %v2622_v27 = vmax.f32 %v2620_v21, %v2621_v15 }
 0x49e   : > { %v2632_v12 = vsel %vm2617_vm4, %v2587_v18, -inf }
 0x49f   : > { %v2630_v20 = vrot.slane %v2629_v57, 1  ;;  %v2623_v49 = vrot.slane %v2622_v27, 1  ;;  %v2633_v32 = vrot.slane %v2632_v12, 4  ;;  %v2560_v48 = vpop.xlane.xlu0 %2559 }
 0x4a0   : > { %v2588_v30 = vadd.f32 %v5415_v3, %v2560_v48 }
 0x4a1   : > { %v2631_v43 = vmax.f32 %v2629_v57, %v2630_v20  ;;  %v2624_v31 = vmax.f32 %v2622_v27, %v2623_v49  ;;  %v2634_v13 = vmax.f32 %v2632_v12, %v2633_v32 }
 0x4a2   : > { %v2639_v42 = vsel %vm2617_vm4, %v2588_v30, -inf }
 0x4a3   : > { %v2731_v9 = vsub.f32 %v2586_v10, %v2631_v43  ;;  %v2730_v4 = vsub.f32 %v2585_v63, %v2624_v31  ;;  %v2635_v55 = vrot.slane %v2634_v13, 2  ;;  %v2640_v41 = vrot.slane %v2639_v42, 4 }
 0x4a4   : > { %v2562_v44 = vpop.xlane.xlu0 %2561 }
 0x4a5   : > { %v2748_v1 = vmul.f32 1.442695, %v2731_v9  ;;  %v2746_v37 = vmul.f32 1.442695, %v2730_v4  ;;  %v2636_v24 = vmax.f32 %v2634_v13, %v2635_v55  ;;  %v2641_v51 = vmax.f32 %v2639_v42, %v2640_v41 }
 0x4a6   : > { %v2589_v26 = vadd.f32 %v5415_v3, %v2562_v44 }
 0x4a7   : > { %4109 = vpow2.f32 %v2748_v1  ;;  %v2637_v23 = vrot.slane %v2636_v24, 1  ;;  %v2642_v62 = vrot.slane %v2641_v51, 2 }
 0x4a8   : > { %4111 = vpow2.f32 %v2746_v37  ;;  %v2646_v53 = vsel %vm2617_vm4, %v2589_v26, -inf  ;;  %v2564_v45 = vpop.xlane.xlu0 %2563  ;;  %v2106_v37 = vsub.s32 3, %v4438_v61 }
 0x4a9   : > { %v2638_v40 = vmax.f32 %v2636_v24, %v2637_v23  ;;  %v2643_v8 = vmax.f32 %v2641_v51, %v2642_v62  ;;  %v2647_v17 = vrot.slane %v2646_v53, 4  ;;  %v2590_v29 = vadd.f32 %v5415_v3, %v2564_v45 }
 0x4ab   : > { %v2732_v47 = vsub.f32 %v2587_v18, %v2638_v40  ;;  %v2644_v34 = vrot.slane %v2643_v8, 1  ;;  %v2648_v22 = vmax.f32 %v2646_v53, %v2647_v17  ;;  %v2653_v7 = vsel %vm2617_vm4, %v2590_v29, -inf }
 0x4ac   : > { %v2654_v5 = vrot.slane %v2653_v7, 4 }
 0x4ad   : > { %v2750_v54 = vmul.f32 1.442695, %v2732_v47  ;;  %v2645_v0 = vmax.f32 %v2643_v8, %v2644_v34  ;;  %v2649_v11 = vrot.slane %v2648_v22, 2 }
 0x4ae   : > { %v2655_v56 = vmax.f32 %v2653_v7, %v2654_v5 }
 0x4af   : > { %4113 = vpow2.f32 %v2750_v54  ;;  %v2733_v2 = vsub.f32 %v2588_v30, %v2645_v0  ;;  %v2650_v28 = vmax.f32 %v2648_v22, %v2649_v11 }
 0x4b0   : > { %v2656_v10 = vrot.slane %v2655_v56, 2 }
 0x4b1   : > { %v5429_v63 = vpop.eup %4109  ;;  %v2752_v59 = vmul.f32 1.442695, %v2733_v2  ;;  %v2651_v25 = vrot.slane %v2650_v28, 1  ;;  %v4194_v2 = vld [vmem:[%s5846_s7] sm:$0x7f] }
 0x4b2   : > { %v5431_v14 = vpop.eup %4111  ;;  %v2785_v46 = vsel %vm2617_vm4, %v5429_v63, 0.0  ;;  %v2657_v50 = vmax.f32 %v2655_v56, %v2656_v10 }
 0x4b3   : > { %v2786_v21 = vrot.slane %v2785_v46, 4  ;;  %v2778_v19 = vsel %vm2617_vm4, %v5431_v14, 0.0  ;;  %4115 = vpow2.f32 %v2752_v59  ;;  %v2652_v15 = vmax.f32 %v2650_v28, %v2651_v25  ;;  %v2572_v36 = vpop.xlane.xlu1 %2571  ;;  %v2570_v18 = vpop.xlane.xlu0 %2569 }
 0x4b4   : > { %v2779_v57 = vrot.slane %v2778_v19, 4  ;;  %v2658_v27 = vrot.slane %v2657_v50, 1  ;;  %v5438_v12 = vadd.f32 %v5415_v3, %v2572_v36  ;;  %v5441_v20 = vadd.f32 %v5415_v3, %v2570_v18 }
 0x4b5   : > { %v2787_v49 = vadd.f32 %v2786_v21, %v2785_v46  ;;  %v2734_v32 = vsub.f32 %v2589_v26, %v2652_v15  ;;  %v5465_v28 = vrot.slane %v4194_v2, %v2106_v37 }
 0x4b6   : > { %v2780_v48 = vadd.f32 %v2779_v57, %v2778_v19  ;;  %v2659_v30 = vmax.f32 %v2657_v50, %v2658_v27  ;;  %v2681_v43 = vsel %vm2617_vm4, %v5438_v12, -inf  ;;  %v2674_v31 = vsel %vm2617_vm4, %v5441_v20, -inf }
 0x4b7   : > { %v2788_v13 = vrot.slane %v2787_v49, 2  ;;  %v2754_v42 = vmul.f32 1.442695, %v2734_v32  ;;  %v2682_v9 = vrot.slane %v2681_v43, 4  ;;  %v2675_v4 = vrot.slane %v2674_v31, 4  ;;  %v2566_v55 = vpop.xlane.xlu0 %2565 }
 0x4b8   : > { %v2781_v41 = vrot.slane %v2780_v48, 2  ;;  %v2735_v44 = vsub.f32 %v2590_v29, %v2659_v30  ;;  %v5448_v1 = vadd.f32 %v5415_v3, %v2566_v55 }
 0x4b9   : > { %v5451_v24 = vpop.eup %4113  ;;  %v2789_v51 = vadd.f32 %v2788_v13, %v2787_v49  ;;  %4117 = vpow2.f32 %v2754_v42  ;;  %v2683_v26 = vmax.f32 %v2681_v43, %v2682_v9  ;;  %v2676_v23 = vmax.f32 %v2674_v31, %v2675_v4 }
 0x4ba   : > { %v2792_v62 = vsel %vm2617_vm4, %v5451_v24, 0.0  ;;  %v2756_v53 = vmul.f32 1.442695, %v2735_v44  ;;  %v2660_v45 = vsel %vm2617_vm4, %v5448_v1, -inf  ;;  %v2782_v47 = vadd.f32 %v2781_v41, %v2780_v48 }
 0x4bb   : > { %v2793_v40 = vrot.slane %v2792_v62, 4  ;;  %v2684_v8 = vrot.slane %v2683_v26, 2  ;;  %v2677_v17 = vrot.slane %v2676_v23, 2  ;;  %v2568_v29 = vpop.xlane.xlu0 %2567  ;;  %v2790_v34 = vrot.slane %v2789_v51, 1  ;;  %v2574_v56 = vpop.xlane.xlu1 %2573 }
 0x4bc   : > { %4119 = vpow2.f32 %v2756_v53  ;;  %v2661_v22 = vrot.slane %v2660_v45, 4  ;;  %v5458_v7 = vadd.f32 %v5415_v3, %v2568_v29  ;;  %v5472_v46 = vadd.f32 %v5415_v3, %v2574_v56 }
 0x4bd   : > { %v5460_v5 = vpop.eup %4115  ;;  %v2794_v54 = vadd.f32 %v2793_v40, %v2792_v62  ;;  %v2685_v0 = vmax.f32 %v2683_v26, %v2684_v8  ;;  %v2678_v11 = vmax.f32 %v2676_v23, %v2677_v17  ;;  %v2783_v15 = vrot.slane %v2782_v47, 1 }
 0x4be   : > { %v2799_v10 = vsel %vm2617_vm4, %v5460_v5, 0.0  ;;  %v2662_v59 = vmax.f32 %v2660_v45, %v2661_v22  ;;  %v2667_v25 = vsel %vm2617_vm4, %v5458_v7, -inf  ;;  %v2688_v57 = vsel %vm2617_vm4, %v5472_v46, -inf }
 0x4bf   : > { %v2800_v50 = vrot.slane %v2799_v10, 4  ;;  %v2686_v21 = vrot.slane %v2685_v0, 1  ;;  %v2679_v19 = vrot.slane %v2678_v11, 1  ;;  %v2668_v18 = vrot.slane %v2667_v25, 4  ;;  %v2576_v43 = vpop.xlane.xlu1 %2575 }
 0x4c0   : > { %v2663_v36 = vrot.slane %v2662_v59, 2  ;;  %v5476_v27 = vadd.f32 %v2790_v34, %v2789_v51  ;;  %v2795_v49 = vrot.slane %v2794_v54, 2  ;;  %v2689_v42 = vrot.slane %v2688_v57, 4 }
 0x4c1   : > { %v2801_v32 = vadd.f32 %v2800_v50, %v2799_v10  ;;  %v2687_v48 = vmax.f32 %v2685_v0, %v2686_v21  ;;  %v2680_v30 = vmax.f32 %v2678_v11, %v2679_v19  ;;  %v2669_v13 = vmax.f32 %v2667_v25, %v2668_v18 }
 0x4c2   : > { %v2664_v31 = vmax.f32 %v2662_v59, %v2663_v36  ;;  %v5479_v9 = vadd.f32 %v5415_v3, %v2576_v43  ;;  %v2784_v37 = vadd.f32 %v2783_v15, %v2782_v47  ;;  %v2690_v62 = vmax.f32 %v2688_v57, %v2689_v42 }
 0x4c3   : > { %v5481_v4 = vpop.eup %4117  ;;  %v2802_v55 = vrot.slane %v2801_v32, 2  ;;  %v2739_v41 = vsub.f32 %v5438_v12, %v2687_v48  ;;  %v2738_v44 = vsub.f32 %v5441_v20, %v2680_v30  ;;  %v2670_v23 = vrot.slane %v2669_v13, 2  ;;  %v2578_v17 = vpop.xlane.xlu1 %2577 }
 0x4c4   : > { %v2806_v51 = vsel %vm2617_vm4, %v5481_v4, 0.0  ;;  %v2665_v26 = vrot.slane %v2664_v31, 1  ;;  %v5487_v53 = vadd.f32 %v2795_v49, %v2794_v54  ;;  %v2691_v12 = vrot.slane %v2690_v62, 2 }
 0x4c5   : > { %v2807_v45 = vrot.slane %v2806_v51, 4  ;;  %v2764_v40 = vmul.f32 1.442695, %v2739_v41  ;;  %v2762_v8 = vmul.f32 1.442695, %v2738_v44  ;;  %v2671_v22 = vmax.f32 %v2669_v13, %v2670_v23 }
 0x4c6   : > { %v5489_v29 = vpop.eup %4119  ;;  %v2666_v34 = vmax.f32 %v2664_v31, %v2665_v26  ;;  %v2695_v20 = vsel %vm2617_vm4, %v5479_v9, -inf  ;;  %v5493_v47 = vadd.f32 %v2802_v55, %v2801_v32  ;;  %v2692_v59 = vmax.f32 %v2690_v62, %v2691_v12 }
 0x4c7   : > { %v2808_v0 = vadd.f32 %v2807_v45, %v2806_v51  ;;  %v2813_v11 = vsel %vm2617_vm4, %v5489_v29, 0.0  ;;  %4121 = vpow2.f32 %v2764_v40  ;;  %v2672_v2 = vrot.slane %v2671_v22, 1  ;;  %v2580_v21 = vpop.xlane.xlu1 %2579 }
 0x4c8   : > { %v2814_v54 = vrot.slane %v2813_v11, 4  ;;  %4123 = vpow2.f32 %v2762_v8  ;;  %v2736_v56 = vsub.f32 %v5448_v1, %v2666_v34  ;;  %v2696_v25 = vrot.slane %v2695_v20, 4 }
 0x4c9   : > { %v2809_v10 = vrot.slane %v2808_v0, 2  ;;  %v5499_v50 = vadd.f32 %v5415_v3, %v2578_v17  ;;  %v2673_v36 = vmax.f32 %v2671_v22, %v2672_v2  ;;  %v5502_v18 = vadd.f32 %v5415_v3, %v2580_v21 }
 0x4ca   : > { %v2815_v19 = vadd.f32 %v2814_v54, %v2813_v11  ;;  %v2758_v15 = vmul.f32 1.442695, %v2736_v56  ;;  %v2797_v57 = vrot.slane %v5487_v53, 1  ;;  %v2693_v49 = vrot.slane %v2692_v59, 1 }
 0x4cb   : > { %v2697_v32 = vmax.f32 %v2695_v20, %v2696_v25  ;;  %v2702_v1 = vsel %vm2617_vm4, %v5499_v50, -inf  ;;  %v2737_v30 = vsub.f32 %v5458_v7, %v2673_v36  ;;  %v2804_v31 = vrot.slane %v5493_v47, 1  ;;  %v2582_v41 = vpop.xlane.xlu1 %2581 }
 0x4cc   : > { %v2816_v48 = vrot.slane %v2815_v19, 2  ;;  %4125 = vpow2.f32 %v2758_v15  ;;  %v2703_v43 = vrot.slane %v2702_v1, 4  ;;  %v2694_v13 = vmax.f32 %v2692_v59, %v2693_v49 }
 0x4cd   : > { %v2698_v42 = vrot.slane %v2697_v32, 2  ;;  %v2709_v55 = vsel %vm2617_vm4, %v5502_v18, -inf  ;;  %v5511_v44 = vadd.f32 %v2809_v10, %v2808_v0  ;;  %v2760_v51 = vmul.f32 1.442695, %v2737_v30 }
 0x4ce   : > { %v2704_v26 = vmax.f32 %v2702_v1, %v2703_v43  ;;  %v2710_v23 = vrot.slane %v2709_v55, 4  ;;  %v2740_v62 = vsub.f32 %v5472_v46, %v2694_v13  ;;  %v5515_v40 = vadd.f32 %v5415_v3, %v2582_v41 }
 0x4cf   : > { %v2699_v45 = vmax.f32 %v2697_v32, %v2698_v42  ;;  %4127 = vrcp.f32 %v2784_v37  ;;  %v5517_v7 = vadd.f32 %v2816_v48, %v2815_v19  ;;  %v2584_v56 = vpop.xlane.xlu1 %2583 }
 0x4d0   : > { %4129 = vpow2.f32 %v2760_v51  ;;  %v2705_v8 = vrot.slane %v2704_v26, 2  ;;  %v2711_v17 = vmax.f32 %v2709_v55, %v2710_v23  ;;  %v2766_v22 = vmul.f32 1.442695, %v2740_v62 }
 0x4d1   : > { %v5519_v34 = vpop.eup %4121  ;;  %v2700_v12 = vrot.slane %v2699_v45, 1  ;;  %v2716_v20 = vsel %vm2617_vm4, %v5515_v40, -inf  ;;  %4131 = vrcp.f32 %v5476_v27  ;;  %v2811_v27 = vrot.slane %v5511_v44, 1 }
 0x4d2   : > { %v5524_v46 = vpop.eup %4123  ;;  %v2841_v0 = vsel %vm2617_vm4, %v5519_v34, 0.0  ;;  %v2706_v37 = vmax.f32 %v2704_v26, %v2705_v8  ;;  %v2712_v11 = vrot.slane %v2711_v17, 2  ;;  %v2717_v54 = vrot.slane %v2716_v20, 4 }
 0x4d3   : > { %v2842_v2 = vrot.slane %v2841_v0, 4  ;;  %v2834_v10 = vsel %vm2617_vm4, %v5524_v46, 0.0  ;;  %4133 = vpow2.f32 %v2766_v22  ;;  %v2701_v59 = vmax.f32 %v2699_v45, %v2700_v12 }
 0x4d4   : > { %v2835_v25 = vrot.slane %v2834_v10, 4  ;;  %v2707_v21 = vrot.slane %v2706_v37, 1  ;;  %v2713_v19 = vmax.f32 %v2711_v17, %v2712_v11  ;;  %v2718_v15 = vmax.f32 %v2716_v20, %v2717_v54 }
 0x4d5   : > { %v2818_v36 = vrot.slane %v5517_v7, 1  ;;  %v2741_v49 = vsub.f32 %v5479_v9, %v2701_v59  ;;  %v5534_v32 = vadd.f32 %v5415_v3, %v2584_v56  ;;  %v5538_v42 = vadd.f32 %v2842_v2, %v2841_v0 }
 0x4d6   : > { %v5536_v1 = vpop.eup %4125  ;;  %v2836_v48 = vadd.f32 %v2835_v25, %v2834_v10  ;;  %v2708_v30 = vmax.f32 %v2706_v37, %v2707_v21  ;;  %v2714_v43 = vrot.slane %v2713_v19, 1  ;;  %v2719_v13 = vrot.slane %v2718_v15, 2 }
 0x4d7   : > { %v2820_v55 = vsel %vm2617_vm4, %v5536_v1, 0.0  ;;  %v2768_v41 = vmul.f32 1.442695, %v2741_v49  ;;  %v2723_v51 = vsel %vm2617_vm4, %v5534_v32, -inf  ;;  %v2798_v17 = vadd.f32 %v2797_v57, %v5487_v53 }
 0x4d8   : > { %v2837_v26 = vrot.slane %v2836_v48, 2  ;;  %v2821_v9 = vrot.slane %v2820_v55, 4  ;;  %v2742_v3 = vsub.f32 %v5499_v50, %v2708_v30  ;;  %v2715_v23 = vmax.f32 %v2713_v19, %v2714_v43 }
 0x4d9   : > { %v4128_v62 = vpop.eup %4127  ;;  %4135 = vpow2.f32 %v2768_v41  ;;  %v2720_v45 = vmax.f32 %v2718_v15, %v2719_v13  ;;  %v2724_v8 = vrot.slane %v2723_v51, 4  ;;  %v2805_v37 = vadd.f32 %v2804_v31, %v5493_v47 }
 0x4da   : > { %v5548_v22 = vpop.eup %4129  ;;  %v2822_v12 = vadd.f32 %v2821_v9, %v2820_v55  ;;  %v2770_v20 = vmul.f32 1.442695, %v2742_v3  ;;  %v2743_v0 = vsub.f32 %v5502_v18, %v2715_v23  ;;  %v2906_v56 = vmul.f32 %v4128_v62, %v5431_v14 }
 0x4db   : > { %v4132_v11 = vpop.eup %4131  ;;  %v2827_v50 = vsel %vm2617_vm4, %v5548_v22, 0.0  ;;  %v2721_v54 = vrot.slane %v2720_v45, 1  ;;  %v2725_v2 = vmax.f32 %v2723_v51, %v2724_v8  ;;  %v2838_v10 = vadd.f32 %v2837_v26, %v2836_v48 }
 0x4dc   : > { %v2823_v59 = vrot.slane %v2822_v12, 2  ;;  %v2828_v25 = vrot.slane %v2827_v50, 4  ;;  %4137 = vpow2.f32 %v2770_v20  ;;  %v3817_v53 = vpop.f32.mrb[16].mxu1  ;;  %v2772_v21 = vmul.f32 1.442695, %v2743_v0  ;;  %2924 = vperm.xlu0 %3939, %v2906_v56  }
 0x4dd   : > { %v5555_v57 = vpop.eup %4133  ;;  %v2722_v19 = vmax.f32 %v2720_v45, %v2721_v54  ;;  %v2907_v47 = vmul.f32 %v4132_v11, %v5429_v63  ;;  %v2726_v18 = vrot.slane %v2725_v2, 2  ;;  %v2190_v31 = vpop.f32.mrb[17].mxu1  ;;  %4139 = vrcp.f32 %v2798_v17 }
 0x4de   : > { %v5558_v15 = vadd.f32 %v2823_v59, %v2822_v12  ;;  %v2829_v49 = vadd.f32 %v2828_v25, %v2827_v50  ;;  %v2848_v14 = vsel %vm2617_vm4, %v5555_v57, 0.0  ;;  %v3818_v48 = vpop.f32.mrb[18].mxu1  ;;  %4141 = vpow2.f32 %v2772_v21 }
 0x4df   : > { %v2849_v30 = vrot.slane %v2848_v14, 4  ;;  %v2744_v43 = vsub.f32 %v5515_v40, %v2722_v19  ;;  %2929 = vperm.xlu1 %3940, %v2907_v47   ;;  %v2727_v13 = vmax.f32 %v2725_v2, %v2726_v18  ;;  %v2193_v55 = vpop.f32.mrb[19].mxu1  ;;  %v2844_v41 = vrot.slane %v5538_v42, 2 }
 0x4e0   : > { %v2839_v63 = vrot.slane %v2838_v10, 1  ;;  %v2830_v51 = vrot.slane %v2829_v49, 2  ;;  %4143 = vrcp.f32 %v2805_v37  ;;  %v2812_v23 = vadd.f32 %v2811_v27, %v5511_v44 }
 0x4e1   : > { %v2850_v26 = vadd.f32 %v2849_v30, %v2848_v14  ;;  %v2774_v9 = vmul.f32 1.442695, %v2744_v43  ;;  %v2728_v3 = vrot.slane %v2727_v13, 1  ;;  %v2825_v62 = vrot.slane %v5558_v15, 1 }
 0x4e2   : > { %v2199_v45 = vadd.f32 %v3817_v53, %v5465_v28  ;;  %v2202_v8 = vadd.f32 %v3818_v48, %v5465_v28  ;;  %v2194_v40 = vadd.f32 %v2193_v55, %v5465_v28  ;;  %v2191_v20 = vadd.f32 %v2190_v31, %v5465_v28 }
 0x4e3   : > { %v5569_v17 = vpop.eup %4135  ;;  %4145 = vpow2.f32 %v2774_v9  ;;  %v2729_v12 = vmax.f32 %v2727_v13, %v2728_v3  ;;  %v2819_v0 = vadd.f32 %v2818_v36, %v5517_v7  ;;  %v2831_v37 = vadd.f32 %v2830_v51, %v2829_v49 }
 0x4e4   : > { %v2855_v44 = vsel %vm2617_vm4, %v5569_v17, 0.0  ;;  %4147 = vrcp.f32 %v2812_v23  ;;  %v5577_v27 = vpack.c.bf16 %v2202_v8, %v2199_v45  ;;  %v2851_v11 = vrot.slane %v2850_v26, 2 }
 0x4e5   : > { %v2856_v50 = vrot.slane %v2855_v44, 4  ;;  %v2745_v54 = vsub.f32 %v5534_v32, %v2729_v12  ;;  %v5580_v56 = vpack.c.bf16 %v2194_v40, %v2191_v20  ;;  %4149 = vrcp.f32 %v2819_v0 }
 0x4e6   : > { %v5582_v2 = vpop.eup %4137  ;;  %v2270_v59 = vmul.bf16 %v5577_v27, %v5577_v27  ;;  %v2845_v7 = vadd.f32 %v2844_v41, %v5538_v42  ;;  %v2840_v36 = vadd.f32 %v2839_v63, %v2838_v10  ;;  %v2832_v14 = vrot.slane %v2831_v37, 1 }
 0x4e7   : > { %v2857_v25 = vadd.f32 %v2856_v50, %v2855_v44  ;;  %v2862_v53 = vsel %vm2617_vm4, %v5582_v2, 0.0  ;;  %v2776_v21 = vmul.f32 1.442695, %v2745_v54  ;;  %v2269_v19 = vmul.bf16 %v5580_v56, %v5580_v56  ;;  %v4140_v32 = vpop.eup %4139 }
 0x4e8   : > { %v2863_v47 = vrot.slane %v2862_v53, 4  ;;  %v2278_v18 = vmul.bf16 %v2270_v59, %v5577_v27  ;;  %v2846_v31 = vrot.slane %v2845_v7, 1  ;;  %4151 = vrcp.f32 %v2840_v36  ;;  %v5592_v49 = vpop.eup %4141 }
 0x4e9   : > { %4153 = vpow2.f32 %v2776_v21  ;;  %v2908_v42 = vmul.f32 %v4140_v32, %v5451_v24  ;;  %v2277_v10 = vmul.bf16 %v2269_v19, %v5580_v56  ;;  %v2869_v43 = vsel %vm2617_vm4, %v5592_v49, 0.0 }
 0x4ea   : > { %v4144_v48 = vpop.eup %4143  ;;  %v2864_v30 = vadd.f32 %v2863_v47, %v2862_v53  ;;  %v2286_v13 = vmul.bf16 1027030327, %v2278_v18  ;;  %v2847_v55 = vadd.f32 %v2846_v31, %v2845_v7  ;;  %v2870_v41 = vrot.slane %v2869_v43, 4 }
 0x4eb   : > { %2934 = vperm.xlu1 %3940, %v2908_v42   ;;  %v2909_v63 = vmul.f32 %v4144_v48, %v5460_v5  ;;  %v2826_v51 = vadd.f32 %v2825_v62, %v5558_v15  ;;  %v2858_v9 = vrot.slane %v2857_v25, 2  ;;  %v2852_v23 = vadd.f32 %v2851_v11, %v2850_v26 }
 0x4ec   : > { %v2294_v3 = vadd.bf16 %v2286_v13, %v5577_v27  ;;  %4155 = vrcp.f32 %v2847_v55  ;;  %v3821_v24 = vpop.f32.mrb[20].mxu1  ;;  %v2865_v8 = vrot.slane %v2864_v30, 2  ;;  %v2871_v40 = vadd.f32 %v2870_v41, %v2869_v43 }
 0x4ed   : > { %v5601_v45 = vpop.eup %4145  ;;  %v2285_v12 = vmul.bf16 1027030327, %v2277_v10  ;;  %v2206_v20 = vpop.f32.mrb[21].mxu1  ;;  %v2833_v0 = vadd.f32 %v2832_v14, %v2831_v37  ;;  %4157 = vrcp.f32 %v2826_v51  ;;  %v2853_v15 = vrot.slane %v2852_v23, 1 }
 0x4ee   : > { %v4148_v44 = vpop.eup %4147  ;;  %v2876_v50 = vsel %vm2617_vm4, %v5601_v45, 0.0  ;;  %v2302_v5 = vmul.bf16 1061961548, %v2294_v3  ;;  %v3822_v54 = vpop.f32.mrb[22].mxu1  ;;  %v2215_v26 = vadd.f32 %v3821_v24, %v5465_v28  ;;  %v2207_v37 = vadd.f32 %v2206_v20, %v5465_v28 }
 0x4ef   : > { %v2877_v62 = vrot.slane %v2876_v50, 4  ;;  %2939 = vperm.xlu1 %3940, %v2909_v63   ;;  %v2910_v59 = vmul.f32 %v4148_v44, %v5481_v4  ;;  %v2218_v11 = vadd.f32 %v3822_v54, %v5465_v28  ;;  %v2209_v7 = vpop.f32.mrb[23].mxu1  ;;  %v4150_v36 = vpop.eup %4149  ;;  %v2854_v21 = vadd.f32 %v2853_v15, %v2852_v23 }
 0x4f0   : > { %4159 = vtanh.bf16 %v2302_v5  ;;  %v2210_v53 = vadd.f32 %v2209_v7, %v5465_v28  ;;  %v2859_v47 = vadd.f32 %v2858_v9, %v2857_v25  ;;  %v2872_v31 = vrot.slane %v2871_v40, 2 }
 0x4f1   : > { %v2878_v19 = vadd.f32 %v2877_v62, %v2876_v50  ;;  %v5610_v32 = vpack.c.bf16 %v2218_v11, %v2215_v26  ;;  %4161 = vrcp.f32 %v2833_v0  ;;  %v2866_v14 = vadd.f32 %v2865_v8, %v2864_v30 }
 0x4f2   : > { %v4152_v18 = vpop.eup %4151  ;;  %v5612_v4 = vpack.c.bf16 %v2210_v53, %v2207_v37  ;;  %4163 = vrcp.f32 %v2854_v21  ;;  %v2911_v48 = vmul.f32 %v4150_v36, %v5489_v29  ;;  %v2860_v13 = vrot.slane %v2859_v47, 1 }
 0x4f3   : > { %v5614_v42 = vpop.eup %4153  ;;  %v2879_v10 = vrot.slane %v2878_v19, 2  ;;  %2944 = vperm.xlu1 %3940, %v2910_v59   ;;  %v2272_v43 = vmul.bf16 %v5610_v32, %v5610_v32  ;;  %v2867_v41 = vrot.slane %v2866_v14, 1  ;;  %v2293_v63 = vadd.bf16 %v2285_v12, %v5580_v56 }
 0x4f4   : > { %v2883_v55 = vsel %vm2617_vm4, %v5614_v42, 0.0  ;;  %v2271_v25 = vmul.bf16 %v5612_v4, %v5612_v4  ;;  %v2861_v3 = vadd.f32 %v2860_v13, %v2859_v47  ;;  %v2873_v20 = vadd.f32 %v2872_v31, %v2871_v40 }
 0x4f5   : > { %v2880_v30 = vadd.f32 %v2879_v10, %v2878_v19  ;;  %v2884_v51 = vrot.slane %v2883_v55, 4  ;;  %v2280_v9 = vmul.bf16 %v2272_v43, %v5610_v32  ;;  %v2868_v23 = vadd.f32 %v2867_v41, %v2866_v14 }
 0x4f6   : > { %v4156_v24 = vpop.eup %4155  ;;  %v2279_v29 = vmul.bf16 %v2271_v25, %v5612_v4  ;;  %v2301_v8 = vmul.bf16 1061961548, %v2293_v63  ;;  %v2914_v50 = vmul.f32 %v4152_v18, %v5524_v46  ;;  %4165 = vrcp.f32 %v2861_v3 }
 0x4f7   : > { %v2885_v0 = vadd.f32 %v2884_v51, %v2883_v55  ;;  %2949 = vperm.xlu1 %3940, %v2911_v48   ;;  %v2915_v44 = vmul.f32 %v4156_v24, %v5519_v34  ;;  %v2288_v5 = vmul.bf16 1027030327, %v2280_v9  ;;  %v4158_v54 = vpop.eup %4157  ;;  %v2881_v12 = vrot.slane %v2880_v30, 1 }
 0x4f8   : > { %v2287_v15 = vmul.bf16 1027030327, %v2279_v29  ;;  %v2874_v62 = vrot.slane %v2873_v20, 1  ;;  %4167 = vrcp.f32 %v2868_v23  ;;  %v2912_v34 = vmul.f32 %v4158_v54, %v5536_v1 }
 0x4f9   : > { %v2886_v59 = vrot.slane %v2885_v0, 2  ;;  %2969 = vperm.xlu0 %3939, %v2915_v44   ;;  %4169 = vtanh.bf16 %v2301_v8  ;;  %v2296_v46 = vadd.bf16 %v2288_v5, %v5610_v32  ;;  %v2882_v53 = vadd.f32 %v2881_v12, %v2880_v30  ;;  %v3997_v8 = vld [vmem:[%s5842_s3 + $0x80] sm:$0xff]  }
 0x4fa   : > { %v2875_v26 = vadd.f32 %v2874_v62, %v2873_v20  ;;  %v2295_v11 = vadd.bf16 %v2287_v15, %v5612_v4 }
 0x4fb   : > { %v4160_v40 = vpop.eup %4159  ;;  %v2887_v36 = vadd.f32 %v2886_v59, %v2885_v0  ;;  %2964 = vperm.xlu1 %3940, %v2914_v50   ;;  %v2304_v31 = vmul.bf16 1061961548, %v2296_v46  ;;  %v2261_v0 = vmul.bf16 1056980736, %v5580_v56  ;;  %v4209_v50 = vmov 0.0  }
 0x4fc   : > { %v4162_v7 = vpop.eup %4161  ;;  %4171 = vrcp.f32 %v2875_v26  ;;  %v2303_v21 = vmul.bf16 1061961548, %v2295_v11  ;;  %v3825_v18 = vpop.f32.mrb[24].mxu1  ;;  %v2318_v23 = vadd.bf16 1065369472, %v4160_v40  ;;  %3863 = vmatprep.subr.bf16.mxu0 %v4209_v50  ;;  %3883 = vmatprep.subr.bf16.mxu1 %v4209_v50  ;;  %v3998_v26 = vld [vmem:[%s5842_s3 + $0x88] sm:$0xff]  }
 0x4fd   : > { %v4164_v37 = vpop.eup %4163  ;;  %v2888_v19 = vrot.slane %v2887_v36, 1  ;;  %v2222_v14 = vpop.f32.mrb[25].mxu1  ;;  %v2913_v10 = vmul.f32 %v4162_v7, %v5548_v22  ;;  %v2231_v1 = vadd.f32 %v3825_v18, %v5465_v28  ;;  %3864 = vmatpush3.bf16.msra.mxu0 %v3997_v8  ;;  %3879 = vmatprep.mubr.msk.bf16.mxu0 %vm4210_vm5, %v4209_v50 }
 0x4fe   : > { %v2916_v47 = vmul.f32 %v4164_v37, %v5555_v57  ;;  %4173 = vtanh.bf16 %v2303_v21  ;;  %v3826_v48 = vpop.f32.mrb[26].mxu1  ;;  %v2223_v25 = vadd.f32 %v2222_v14, %v5465_v28  ;;  %3865 = vmatprep.subr.bf16.mxu0 %v4209_v50 }
 0x4ff   : > { %2954 = vperm.xlu1 %3940, %v2912_v34   ;;  %4175 = vtanh.bf16 %v2304_v31  ;;  %v2234_v43 = vadd.f32 %v3826_v48, %v5465_v28  ;;  %v2225_v13 = vpop.f32.mrb[27].mxu1  ;;  %v2889_v55 = vadd.f32 %v2888_v19, %v2887_v36  ;;  %v3999_v31 = vld [vmem:[%s5842_s3 + $0x90] sm:$0xff]  }
 0x500   : > { %2974 = vperm.xlu0 %3939, %v2916_v47   ;;  %4177 = vrcp.f32 %v2882_v53  ;;  %v2226_v57 = vadd.f32 %v2225_v13, %v5465_v28  ;;  %v4166_v41 = vpop.eup %4165 }
 0x501   : > { %v5637_v63 = vpack.c.bf16 %v2234_v43, %v2231_v1  ;;  %v2917_v22 = vmul.f32 %v4166_v41, %v5569_v17  ;;  %4179 = vrcp.f32 %v2889_v55  ;;  %3866 = vmatpush3.bf16.msra.mxu0 %v3998_v26  ;;  %v2264_v1 = vmul.bf16 1056980736, %v5610_v32  ;;  %v4000_v32 = vld [vmem:[%s5842_s3 + $0x98] sm:$0xff]  }
 0x502   : > { %v4168_v30 = vpop.eup %4167  ;;  %v5640_v51 = vpack.c.bf16 %v2226_v57, %v2223_v25  ;;  %3867 = vmatprep.subr.bf16.mxu0 %v4209_v50 }
 0x503   : > { %2959 = vperm.xlu1 %3940, %v2913_v10   ;;  %v2274_v9 = vmul.bf16 %v5637_v63, %v5637_v63  ;;  %v2918_v24 = vmul.f32 %v4168_v30, %v5582_v2  ;;  %v2262_v2 = vmul.bf16 1056980736, %v5577_v27  ;;  %v2263_v27 = vmul.bf16 1056980736, %v5612_v4 }
 0x504   : > { %v4170_v3 = vpop.eup %4169  ;;  %2979 = vperm.xlu0 %3939, %v2917_v22   ;;  %v2273_v29 = vmul.bf16 %v5640_v51, %v5640_v51 }
 0x505   : > { %v2282_v17 = vmul.bf16 %v2274_v9, %v5637_v63  ;;  %v2317_v44 = vadd.bf16 1065369472, %v4170_v3  ;;  %v2326_v59 = vmul.bf16 %v2318_v23, %v2262_v2  ;;  %3868 = vmatpush3.bf16.msra.mxu0 %v3999_v31  ;;  %v2265_v23 = vmul.bf16 1056980736, %v5640_v51 }
 0x506   : > { %v4172_v20 = vpop.eup %4171  ;;  %v2281_v5 = vmul.bf16 %v2273_v29, %v5640_v51  ;;  %3869 = vmatprep.subr.bf16.mxu0 %v4209_v50  ;;  %v2266_v2 = vmul.bf16 1056980736, %v5637_v63 }
 0x507   : > { %v2290_v54 = vmul.bf16 1027030327, %v2282_v17  ;;  %v2325_v12 = vmul.bf16 %v2317_v44, %v2261_v0  ;;  %v2919_v56 = vmul.f32 %v4172_v20, %v5592_v49  ;;  %v4001_v44 = vld [vmem:[%s5842_s3 + $0xa0] sm:$0xff]  }
 0x508   : > { %2984 = vperm.xlu0 %3939, %v2918_v24   ;;  %v2289_v62 = vmul.bf16 1027030327, %v2281_v5 }
 0x509   : > { %v4174_v15 = vpop.eup %4173  ;;  %3847 = vmatprep.mubr.bf16.mxu1 %v2325_v12  ;;  %v2298_v36 = vadd.bf16 %v2290_v54, %v5637_v63  ;;  %3870 = vmatpush3.bf16.msra.mxu0 %v4000_v32  ;;  %v4003_v63 = vld [vmem:[%s5842_s3 + $0xb0] sm:$0xff]  }
 0x50a   : > { %v4176_v11 = vpop.eup %4175  ;;  %v2319_v7 = vadd.bf16 1065369472, %v4174_v15  ;;  %3848 = vmatmul.mubr.bf16.vlgmr.msra.gmra.mrb[32].mxu1 %v2326_v59  ;;  %v2297_v34 = vadd.bf16 %v2289_v62, %v5640_v51  ;;  %3871 = vmatprep.subr.bf16.mxu0 %v4209_v50  ;;  %v4002_v51 = vld [vmem:[%s5842_s3 + $0xa8] sm:$0xff]  }
 0x50b   : > { %v4178_v40 = vpop.eup %4177  ;;  %v2306_v53 = vmul.bf16 1061961548, %v2298_v36  ;;  %v2320_v19 = vadd.bf16 1065369472, %v4176_v11  ;;  %v4004_v11 = vld [vmem:[%s5842_s3 + $0xb8] sm:$0xff]   ;;  %v2601_v36 = vunpack.c.l.bf16 %v5138_v33 }
 0x50c   : > { %v3829_v46 = vpop.f32.mrb[28].mxu1  ;;  %v2327_v37 = vmul.bf16 %v2319_v7, %v2263_v27  ;;  %2989 = vperm.xlu0 %3939, %v2919_v56   ;;  %v2920_v49 = vmul.f32 %v4178_v40, %v5601_v45  ;;  %v2305_v47 = vmul.bf16 1061961548, %v2297_v34  ;;  %v4180_v18 = vpop.eup %4179 }
 0x50d   : > { %v2238_v21 = vpop.f32.mrb[29].mxu1  ;;  %4181 = vtanh.bf16 %v2306_v53  ;;  %v2247_v14 = vadd.f32 %v3829_v46, %v5465_v28  ;;  %v2921_v13 = vmul.f32 %v4180_v18, %v5614_v42  ;;  %v2328_v25 = vmul.bf16 %v2320_v19, %v2264_v1  ;;  %3872 = vmatpush3.bf16.msra.mxu0 %v4001_v44 }
 0x50e   : > { %v3830_v4 = vpop.f32.mrb[30].mxu1  ;;  %3851 = vmatprep.mubr.bf16.mxu1 %v2327_v37  ;;  %4183 = vtanh.bf16 %v2305_v47  ;;  %v2239_v45 = vadd.f32 %v2238_v21, %v5465_v28  ;;  %3873 = vmatprep.subr.bf16.mxu0 %v4209_v50  ;;  %v2602_v37 = vunpack.c.h.bf16 %v5138_v33 }
 0x50f   : > { %v2250_v10 = vadd.f32 %v3830_v4, %v5465_v28  ;;  %v2241_v48 = vpop.f32.mrb[31].mxu1 }
 0x510   : > { %v2242_v43 = vadd.f32 %v2241_v48, %v5465_v28  ;;  %2994 = vperm.xlu0 %3939, %v2920_v49   ;;  %v2603_v48 = vunpack.c.l.bf16 %v5147_v39 }
 0x511   : > { %v2260_v55 = vpack.c.bf16 %v2250_v10, %v2247_v14  ;;  %3874 = vmatpush3.bf16.msra.mxu0 %v4002_v51 }
 0x512   : > { %v2259_v57 = vpack.c.bf16 %v2242_v43, %v2239_v45  ;;  %3852 = vmatmul.mubr.bf16.gmra.mrb[36].mxu1 %v2328_v25  ;;  %3875 = vmatprep.subr.bf16.mxu0 %v4209_v50  ;;  %v2604_v25 = vunpack.c.h.bf16 %v5147_v39  ;;  %v2606_v39 = vunpack.c.h.bf16 %v5156_v38 }
 0x513   : > { %v2276_v41 = vmul.bf16 %v2260_v55, %v2260_v55  ;;  %v2268_v40 = vmul.bf16 1056980736, %v2260_v55 }
 0x514   : > { %v2275_v30 = vmul.bf16 %v2259_v57, %v2259_v57  ;;  %2999 = vperm.xlu0 %3939, %v2921_v13   ;;  %v2267_v56 = vmul.bf16 1056980736, %v2259_v57 }
 0x515   : > { %v2284_v22 = vmul.bf16 %v2276_v41, %v2260_v55  ;;  %3876 = vmatpush3.bf16.msra.mxu0 %v4003_v63 }
 0x516   : > { %v2283_v9 = vmul.bf16 %v2275_v30, %v2259_v57  ;;  %3877 = vmatprep.subr.bf16.mxu0 %v4209_v50 }
 0x517   : > { %v2292_v28 = vmul.bf16 1027030327, %v2284_v22 }
 0x518   : > { %v2291_v3 = vmul.bf16 1027030327, %v2283_v9  ;;  %v4182_v42 = vpop.eup %4181 }
 0x519   : > { %v2300_v24 = vadd.bf16 %v2292_v28, %v2260_v55  ;;  %v4184_v29 = vpop.eup %4183  ;;  %v2322_v8 = vadd.bf16 1065369472, %v4182_v42  ;;  %3878 = vmatpush3.bf16.msra.mxu0 %v4004_v11  ;;  %v2605_v28 = vunpack.c.l.bf16 %v5156_v38 }
 0x51a   : > { %v2299_v20 = vadd.bf16 %v2291_v3, %v2259_v57  ;;  %v2321_v17 = vadd.bf16 1065369472, %v4184_v29 }
 0x51b   : > { %v2308_v0 = vmul.bf16 1061961548, %v2300_v24  ;;  %v2330_v12 = vmul.bf16 %v2322_v8, %v2266_v2 }
 0x51c   : > { %v2307_v5 = vmul.bf16 1061961548, %v2299_v20  ;;  %v2329_v54 = vmul.bf16 %v2321_v17, %v2265_v23 }
 0x51d   : > { %4185 = vtanh.bf16 %v2308_v0 }
 0x51e   : > { %4187 = vtanh.bf16 %v2307_v5  ;;  %3855 = vmatprep.mubr.bf16.mxu1 %v2329_v54 }
 0x51f   : > { %3856 = vmatmul.mubr.bf16.gmra.mrb[40].mxu1 %v2330_v12 }
 0x528   : > { %v4186_v15 = vpop.eup %4185 }
 0x529   : > { %v4188_v62 = vpop.eup %4187  ;;  %v2324_v59 = vadd.bf16 1065369472, %v4186_v15  ;;  %v2610_v15 = vunpack.c.h.bf16 %v5171_v60 }
 0x52a   : > { %v2323_v26 = vadd.bf16 1065369472, %v4188_v62 }
 0x52b   : > { %v2332_v7 = vmul.bf16 %v2324_v59, %v2268_v40 }
 0x52c   : > { %v2331_v27 = vmul.bf16 %v2323_v26, %v2267_v56 }
 0x52e   : > { %3859 = vmatprep.mubr.bf16.mxu1 %v2331_v27  ;;  %v2609_v27 = vunpack.c.l.bf16 %v5171_v60 }
 0x52f   : > { %3860 = vmatmul.mubr.bf16.gmra.mrb[44].mxu1 %v2332_v7  ;;  %v2607_v7 = vunpack.c.l.bf16 %v5165_v16 }
 0x530   : > { %3899 = vmatprep.mubr.msk.bf16.mxu1 %vm4210_vm5, %v4209_v50 }
 0x55b   : > { %v2925_v34 = vpop.permute.xlu0 %2924 }
 0x55c   : > { %v3002_v46 = vmul.f32 %v2925_v34, %v2601_v36 }
 0x55e   : > { %v2930_v53 = vpop.permute.xlu1 %2929  ;;  %v3018_v49 = vrot.slane %v3002_v46, 4 }
 0x55f   : > { %v3003_v21 = vmul.f32 %v2930_v53, %v2602_v37 }
 0x560   : > { %v3019_v19 = vadd.f32 %v3018_v49, %v3002_v46 }
 0x561   : > { %v3024_v47 = vrot.slane %v3003_v21, 4 }
 0x562   : > { %v3020_v4 = vrot.slane %v3019_v19, 2 }
 0x563   : > { %v3025_v18 = vadd.f32 %v3024_v47, %v3003_v21 }
 0x564   : > { %v3021_v14 = vadd.f32 %v3020_v4, %v3019_v19  ;;  %v2608_v19 = vunpack.c.h.bf16 %v5165_v16  ;;  %v2612_v16 = vunpack.c.h.bf16 %v5176_v6 }
 0x565   : > { %v3026_v31 = vrot.slane %v3025_v18, 2 }
 0x566   : > { %v3022_v43 = vrot.slane %v3021_v14, 1 }
 0x567   : > { %v3027_v10 = vadd.f32 %v3026_v31, %v3025_v18 }
 0x568   : > { %v3023_v30 = vadd.f32 %v3022_v43, %v3021_v14 }
 0x569   : > { %v3028_v13 = vrot.slane %v3027_v10, 1 }
 0x56a   : > { %v2935_v1 = vpop.permute.xlu1 %2934  ;;  %v3131_v23 = vpack.c.bf16 %v3023_v30, %v3023_v30 }
 0x56b   : > { %v3004_v45 = vmul.f32 %v2935_v1, %v2603_v48  ;;  %v3029_v22 = vadd.f32 %v3028_v13, %v3027_v10  ;;  %v2611_v48 = vunpack.c.l.bf16 %v5176_v6 }
 0x56c   : > { %v3167_v51 = vunpack.c.l.b16 %v3131_v23 }
 0x56d   : > { %v3030_v55 = vrot.slane %v3004_v45, 4  ;;  %v3132_v8 = vpack.c.bf16 %v3029_v22, %v3029_v22 }
 0x56e   : > { %v2940_v33 = vpop.permute.xlu1 %2939 }
 0x56f   : > { %v3031_v57 = vadd.f32 %v3030_v55, %v3004_v45  ;;  %v3005_v41 = vmul.f32 %v2940_v33, %v2604_v25  ;;  %v3168_v63 = vunpack.c.l.b16 %v3132_v8 }
 0x571   : > { %v3032_v32 = vrot.slane %v3031_v57, 2  ;;  %v3036_v9 = vrot.slane %v3005_v41, 4  ;;  %v3184_v53 = vsel %vm3183_vm6, %v3168_v63, %v3167_v51 }
 0x572   : > { %v2945_v3 = vpop.permute.xlu1 %2944 }
 0x573   : > { %v3033_v42 = vadd.f32 %v3032_v32, %v3031_v57  ;;  %v3037_v24 = vadd.f32 %v3036_v9, %v3005_v41  ;;  %v3006_v29 = vmul.f32 %v2945_v3, %v2605_v28 }
 0x575   : > { %v3034_v20 = vrot.slane %v3033_v42, 1  ;;  %v3038_v17 = vrot.slane %v3037_v24, 2  ;;  %v3042_v0 = vrot.slane %v3006_v29, 4 }
 0x576   : > { %v2950_v44 = vpop.permute.xlu1 %2949 }
 0x577   : > { %v3035_v2 = vadd.f32 %v3034_v20, %v3033_v42  ;;  %v3039_v5 = vadd.f32 %v3038_v17, %v3037_v24  ;;  %v3043_v54 = vadd.f32 %v3042_v0, %v3006_v29  ;;  %v3007_v12 = vmul.f32 %v2950_v44, %v2606_v39 }
 0x578   : > { %v2970_v62 = vpop.permute.xlu0 %2969 }
 0x579   : > { %v3133_v59 = vpack.c.bf16 %v3035_v2, %v3035_v2  ;;  %v3040_v56 = vrot.slane %v3039_v5, 1  ;;  %v3044_v26 = vrot.slane %v3043_v54, 2  ;;  %v3048_v11 = vrot.slane %v3007_v12, 4 }
 0x57a   : > { %v3011_v40 = vmul.f32 %v2970_v62, %v2610_v15  ;;  %v2965_v38 = vpop.permute.xlu1 %2964 }
 0x57b   : > { %v3169_v36 = vunpack.c.l.b16 %v3133_v59  ;;  %v3041_v34 = vadd.f32 %v3040_v56, %v3039_v5  ;;  %v3045_v46 = vadd.f32 %v3044_v26, %v3043_v54  ;;  %v3049_v37 = vadd.f32 %v3048_v11, %v3007_v12 }
 0x57c   : > { %v3072_v49 = vrot.slane %v3011_v40, 4  ;;  %v3010_v21 = vmul.f32 %v2965_v38, %v2609_v27  ;;  %v2613_v56 = vunpack.c.l.bf16 %v5181_v58 }
 0x57d   : > { %v3186_v47 = vsel %vm3185_vm7, %v3169_v36, %v3184_v53  ;;  %v3134_v18 = vpack.c.bf16 %v3041_v34, %v3041_v34  ;;  %v3046_v4 = vrot.slane %v3045_v46, 1  ;;  %v3050_v31 = vrot.slane %v3049_v37, 2 }
 0x57e   : > { %v3073_v60 = vadd.f32 %v3072_v49, %v3011_v40  ;;  %v3066_v14 = vrot.slane %v3010_v21, 4  ;;  %v2955_v10 = vpop.permute.xlu1 %2954 }
 0x57f   : > { %v2975_v1 = vpop.permute.xlu0 %2974  ;;  %v3170_v45 = vunpack.c.l.b16 %v3134_v18  ;;  %v3047_v43 = vadd.f32 %v3046_v4, %v3045_v46  ;;  %v3051_v13 = vadd.f32 %v3050_v31, %v3049_v37  ;;  %v3008_v55 = vmul.f32 %v2955_v10, %v2607_v7 }
 0x580   : > { %v3074_v25 = vrot.slane %v3073_v60, 2  ;;  %v3067_v33 = vadd.f32 %v3066_v14, %v3010_v21  ;;  %v3012_v57 = vmul.f32 %v2975_v1, %v2611_v48  ;;  %v2614_v18 = vunpack.c.h.bf16 %v5181_v58 }
 0x581   : > { %v3188_v41 = vsel %vm3187_vm8, %v3170_v45, %v3186_v47  ;;  %v3135_v30 = vpack.c.bf16 %v3047_v43, %v3047_v43  ;;  %v3052_v22 = vrot.slane %v3051_v13, 1  ;;  %v3054_v32 = vrot.slane %v3008_v55, 4 }
 0x582   : > { %v3075_v9 = vadd.f32 %v3074_v25, %v3073_v60  ;;  %v3068_v28 = vrot.slane %v3067_v33, 2  ;;  %v3078_v3 = vrot.slane %v3012_v57, 4  ;;  %v2960_v42 = vpop.permute.xlu1 %2959 }
 0x583   : > { %v3171_v24 = vunpack.c.l.b16 %v3135_v30  ;;  %v3053_v29 = vadd.f32 %v3052_v22, %v3051_v13  ;;  %v3055_v23 = vadd.f32 %v3054_v32, %v3008_v55  ;;  %v3009_v8 = vmul.f32 %v2960_v42, %v2608_v19  ;;  %v2980_v39 = vpop.permute.xlu0 %2979 }
 0x584   : > { %v3076_v20 = vrot.slane %v3075_v9, 1  ;;  %v3069_v17 = vadd.f32 %v3068_v28, %v3067_v33  ;;  %v3079_v0 = vadd.f32 %v3078_v3, %v3012_v57  ;;  %v3013_v63 = vmul.f32 %v2980_v39, %v2612_v16 }
 0x585   : > { %v3190_v6 = vsel %vm3189_vm9, %v3171_v24, %v3188_v41  ;;  %v3136_v44 = vpack.c.bf16 %v3053_v29, %v3053_v29  ;;  %v3056_v2 = vrot.slane %v3055_v23, 2  ;;  %v3060_v5 = vrot.slane %v3009_v8, 4 }
 0x586   : > { %v3077_v54 = vadd.f32 %v3076_v20, %v3075_v9  ;;  %v3070_v12 = vrot.slane %v3069_v17, 1  ;;  %v3080_v51 = vrot.slane %v3079_v0, 2  ;;  %v3084_v27 = vrot.slane %v3013_v63, 4 }
 0x587   : > { %v3172_v15 = vunpack.c.l.b16 %v3136_v44  ;;  %v3057_v62 = vadd.f32 %v3056_v2, %v3055_v23  ;;  %v3061_v59 = vadd.f32 %v3060_v5, %v3009_v8  ;;  %v2985_v38 = vpop.permute.xlu0 %2984  ;;  %v2615_v22 = vunpack.c.l.bf16 %v5186_v52 }
 0x588   : > { %v3140_v26 = vpack.c.bf16 %v3077_v54, %v3077_v54  ;;  %v3071_v11 = vadd.f32 %v3070_v12, %v3069_v17  ;;  %v3081_v40 = vadd.f32 %v3080_v51, %v3079_v0  ;;  %v3014_v46 = vmul.f32 %v2985_v38, %v2613_v56 }
 0x589   : > { %v3192_v7 = vsel %vm3191_vm10, %v3172_v15, %v3190_v6  ;;  %v3058_v36 = vrot.slane %v3057_v62, 1  ;;  %v3062_v34 = vrot.slane %v3061_v59, 2  ;;  %v3085_v49 = vadd.f32 %v3084_v27, %v3013_v63 }
 0x58a   : > { %v3139_v37 = vpack.c.bf16 %v3071_v11, %v3071_v11  ;;  %v3082_v53 = vrot.slane %v3081_v40, 1  ;;  %v3090_v47 = vrot.slane %v3014_v46, 4  ;;  %v3176_v4 = vunpack.c.l.b16 %v3140_v26 }
 0x58b   : > { %v3059_v21 = vadd.f32 %v3058_v36, %v3057_v62  ;;  %v3063_v19 = vadd.f32 %v3062_v34, %v3061_v59  ;;  %v3086_v14 = vrot.slane %v3085_v49, 2  ;;  %v2990_v10 = vpop.permute.xlu0 %2989  ;;  %v2616_v0 = vunpack.c.h.bf16 %v5186_v52 }
 0x58c   : > { %v3175_v31 = vunpack.c.l.b16 %v3139_v37  ;;  %v3083_v60 = vadd.f32 %v3082_v53, %v3081_v40  ;;  %v3091_v45 = vadd.f32 %v3090_v47, %v3014_v46  ;;  %v3015_v43 = vmul.f32 %v2990_v10, %v2614_v18 }
 0x58d   : > { %v3137_v48 = vpack.c.bf16 %v3059_v21, %v3059_v21  ;;  %v3064_v1 = vrot.slane %v3063_v19, 1  ;;  %v3087_v55 = vadd.f32 %v3086_v14, %v3085_v49 }
 0x58e   : > { %v3141_v13 = vpack.c.bf16 %v3083_v60, %v3083_v60  ;;  %v3092_v57 = vrot.slane %v3091_v45, 2  ;;  %v3096_v16 = vrot.slane %v3015_v43, 4  ;;  %v3197_v41 = vsel %vm3183_vm6, %v3176_v4, %v3175_v31 }
 0x58f   : > { %v3173_v25 = vunpack.c.l.b16 %v3137_v48  ;;  %v3065_v33 = vadd.f32 %v3064_v1, %v3063_v19  ;;  %v3088_v58 = vrot.slane %v3087_v55, 1  ;;  %v2995_v32 = vpop.permute.xlu0 %2994  ;;  %v5738_v1 = vld [vmem:[%s5847_s8] ss:$0 sm:$0xff] }
 0x590   : > { %v3177_v30 = vunpack.c.l.b16 %v3141_v13  ;;  %v3093_v3 = vadd.f32 %v3092_v57, %v3091_v45  ;;  %v3097_v42 = vadd.f32 %v3096_v16, %v3015_v43  ;;  %v3016_v23 = vmul.f32 %v2995_v32, %v2615_v22 }
 0x591   : > { %v3194_v9 = vsel %vm3193_vm11, %v3173_v25, %v3192_v7  ;;  %v3138_v28 = vpack.c.bf16 %v3065_v33, %v3065_v33  ;;  %v3089_v29 = vadd.f32 %v3088_v58, %v3087_v55 }
 0x592   : > { %v3198_v24 = vsel %vm3185_vm7, %v3177_v30, %v3197_v41  ;;  %v3094_v20 = vrot.slane %v3093_v3, 1  ;;  %v3098_v17 = vrot.slane %v3097_v42, 2  ;;  %v3102_v6 = vrot.slane %v3016_v23, 4 }
 0x593   : > { %v3174_v8 = vunpack.c.l.b16 %v3138_v28  ;;  %v3142_v39 = vpack.c.bf16 %v3089_v29, %v3089_v29  ;;  %v3000_v44 = vpop.permute.xlu0 %2999 }
 0x594   : > { %v3095_v5 = vadd.f32 %v3094_v20, %v3093_v3  ;;  %v3099_v54 = vadd.f32 %v3098_v17, %v3097_v42  ;;  %v3017_v12 = vmul.f32 %v3000_v44, %v2616_v0  ;;  %v3103_v63 = vadd.f32 %v3102_v6, %v3016_v23  ;;  %v4005_v0 = vld [vmem:[%s5842_s3 + $0xc0] sm:$0xff]  }
 0x595   : > { %v3196_v2 = vsel %vm3195_vm12, %v3174_v8, %v3194_v9  ;;  %v3178_v51 = vunpack.c.l.b16 %v3142_v39  ;;  %3884 = vmatpush3.bf16.msra.mxu1 %v4005_v0 }
 0x596   : > { %v3143_v15 = vpack.c.bf16 %v3095_v5, %v3095_v5  ;;  %v3100_v62 = vrot.slane %v3099_v54, 1  ;;  %v3108_v59 = vrot.slane %v3017_v12, 4  ;;  %v3104_v26 = vrot.slane %v3103_v63, 2  ;;  %3885 = vmatprep.subr.bf16.mxu1 %v4209_v50 }
 0x597   : > { %v3199_v56 = vsel %vm3187_vm8, %v3178_v51, %v3198_v24 }
 0x598   : > { %v3179_v11 = vunpack.c.l.b16 %v3143_v15  ;;  %v3101_v40 = vadd.f32 %v3100_v62, %v3099_v54  ;;  %v3109_v27 = vadd.f32 %v3108_v59, %v3017_v12  ;;  %v3105_v52 = vadd.f32 %v3104_v26, %v3103_v63  ;;  %v4006_v63 = vld [vmem:[%s5842_s3 + $0xc8] sm:$0xff]   ;;  %v4007_v15 = vld [vmem:[%s5842_s3 + $0xd0] sm:$0xff]   ;;  %v4008_v62 = vld [vmem:[%s5842_s3 + $0xd8] sm:$0xff]  }
 0x599   : > { %3886 = vmatpush3.bf16.msra.mxu1 %v4006_v63  ;;  %v4009_v59 = vld [vmem:[%s5842_s3 + $0xe0] sm:$0xff]   ;;  %v4011_v26 = vld [vmem:[%s5842_s3 + $0xf0] sm:$0xff]  }
 0x59a   : > { %v3200_v38 = vsel %vm3189_vm9, %v3179_v11, %v3199_v56  ;;  %v3144_v7 = vpack.c.bf16 %v3101_v40, %v3101_v40  ;;  %v3110_v36 = vrot.slane %v3109_v27, 2  ;;  %v3106_v34 = vrot.slane %v3105_v52, 1  ;;  %3887 = vmatprep.subr.bf16.mxu1 %v4209_v50  ;;  %v4010_v56 = vld [vmem:[%s5842_s3 + $0xe8] sm:$0xff]   ;;  %v4012_v11 = vld [vmem:[%s5842_s3 + $0xf8] sm:$0xff]  }
 0x59b   : > { %v3149_v40 = vsub.s32 5, %v4438_v61 }
 0x59c   : > { %v3180_v46 = vunpack.c.l.b16 %v3144_v7  ;;  %v3111_v37 = vadd.f32 %v3110_v36, %v3109_v27  ;;  %v3107_v53 = vadd.f32 %v3106_v34, %v3105_v52  ;;  %v4196_v27 = vld [vmem:[%s5846_s7] sm:$0x7f] }
 0x59d   : > { %3888 = vmatpush3.bf16.msra.mxu1 %v4007_v15  ;;  %v3150_v52 = vrot.slane %v4196_v27, %v3149_v40 }
 0x59e   : > { %v3201_v49 = vsel %vm3191_vm10, %v3180_v46, %v3200_v38  ;;  %v3112_v21 = vrot.slane %v3111_v37, 1  ;;  %v3145_v19 = vpack.c.bf16 %v3107_v53, %v3107_v53  ;;  %3889 = vmatprep.subr.bf16.mxu1 %v4209_v50 }
 0x5a0   : > { %v3113_v47 = vadd.f32 %v3112_v21, %v3111_v37  ;;  %v3181_v18 = vunpack.c.l.b16 %v3145_v19 }
 0x5a1   : > { %3890 = vmatpush3.bf16.msra.mxu1 %v4008_v62 }
 0x5a2   : > { %v3146_v4 = vpack.c.bf16 %v3113_v47, %v3113_v47  ;;  %v3202_v31 = vsel %vm3193_vm11, %v3181_v18, %v3201_v49  ;;  %3891 = vmatprep.subr.bf16.mxu1 %v4209_v50 }
 0x5a4   : > { %v3182_v60 = vunpack.c.l.b16 %v3146_v4 }
 0x5a5   : > { %3892 = vmatpush3.bf16.msra.mxu1 %v4009_v59 }
 0x5a6   : > { %v3203_v14 = vsel %vm3195_vm12, %v3182_v60, %v3202_v31  ;;  %3893 = vmatprep.subr.bf16.mxu1 %v4209_v50 }
 0x5a7   : > { %v3204_v10 = vpack.c.b16 %v3203_v14, %v3196_v2  ;;  %v3324_v14 = vsub.s32 6, %v4438_v61 }
 0x5a9   : > { %3880 = vmatmul.mubr.bf16.vlgmr.msra.gmra.mrb[48].mxu0 %v3204_v10  ;;  %3894 = vmatpush3.bf16.msra.mxu1 %v4010_v56  ;;  %v3325_v10 = vrot.slane %v4196_v27, %v3324_v14 }
 0x5aa   : > { %3895 = vmatprep.subr.bf16.mxu1 %v4209_v50 }
 0x5ad   : > { %3896 = vmatpush3.bf16.msra.mxu1 %v4011_v26 }
 0x5ae   : > { %3897 = vmatprep.subr.bf16.mxu1 %v4209_v50 }
 0x5b1   : > { %3898 = vmatpush3.bf16.msra.mxu1 %v4012_v11 }
 0x5dd   : > { %v3849_v48 = vpop.f32.mrb[32].mxu1 }
 0x5de   : > { %v2446_v45 = vadd.f32 %v5738_v1, %v3849_v48  ;;  %v2437_v43 = vpop.f32.mrb[33].mxu1 }
 0x5df   : > { %v2438_v13 = vadd.f32 %v5738_v1, %v2437_v43  ;;  %v3850_v55 = vpop.f32.mrb[34].mxu1 }
 0x5e0   : > { %2503 = vst.msk [vmem:[%s5733_s27 + $0x10] sm:$0xff] %vm2500_vm13, %v2446_v45  ;;  %v2449_v25 = vadd.f32 %v5738_v1, %v3850_v55  ;;  %v2440_v33 = vpop.f32.mrb[35].mxu1 }
 0x5e1   : > { %2501 = vst.msk [vmem:[%s5733_s27] sm:$0xff] %vm2500_vm13, %v2438_v13  ;;  %v2441_v57 = vadd.f32 %v5738_v1, %v2440_v33 }
 0x5e2   : > { %2504 = vst.msk [vmem:[%s5733_s27 + $0x18] sm:$0xff] %vm2500_vm13, %v2449_v25 }
 0x5e3   : > { %2502 = vst.msk [vmem:[%s5733_s27 + $0x8] sm:$0xff] %vm2500_vm13, %v2441_v57 }
 0x5e5   : > { %v3853_v16 = vpop.f32.mrb[36].mxu1 }
 0x5e6   : > { %v2462_v41 = vadd.f32 %v5738_v1, %v3853_v16  ;;  %v2453_v30 = vpop.f32.mrb[37].mxu1 }
 0x5e7   : > { %v2454_v58 = vadd.f32 %v5738_v1, %v2453_v30  ;;  %v3854_v22 = vpop.f32.mrb[38].mxu1 }
 0x5e8   : > { %2507 = vst.msk [vmem:[%s5733_s27 + $0x30] sm:$0xff] %vm2500_vm13, %v2462_v41  ;;  %v2465_v32 = vadd.f32 %v5738_v1, %v3854_v22  ;;  %v2456_v9 = vpop.f32.mrb[39].mxu1 }
 0x5e9   : > { %2505 = vst.msk [vmem:[%s5733_s27 + $0x20] sm:$0xff] %vm2500_vm13, %v2454_v58  ;;  %v2457_v28 = vadd.f32 %v5738_v1, %v2456_v9 }
 0x5ea   : > { %2508 = vst.msk [vmem:[%s5733_s27 + $0x38] sm:$0xff] %vm2500_vm13, %v2465_v32 }
 0x5eb   : > { %2506 = vst.msk [vmem:[%s5733_s27 + $0x28] sm:$0xff] %vm2500_vm13, %v2457_v28 }
 0x5f2   : > { %v3857_v3 = vpop.f32.mrb[40].mxu1 }
 0x5f3   : > { %v2478_v42 = vadd.f32 %v5738_v1, %v3857_v3  ;;  %v2469_v24 = vpop.f32.mrb[41].mxu1  ;;  %v4197_v3 = vld [vmem:[%s5845_s6] sm:$0x3] }
 0x5f4   : > { %v2470_v29 = vadd.f32 %v5738_v1, %v2469_v24  ;;  %v3858_v23 = vpop.f32.mrb[42].mxu1 }
 0x5f5   : > { %2511 = vst.msk [vmem:[%s5733_s27 + $0x50] sm:$0xff] %vm2500_vm13, %v2478_v42  ;;  %v2481_v8 = vadd.f32 %v5738_v1, %v3858_v23  ;;  %v2472_v20 = vpop.f32.mrb[43].mxu1  ;;  %v3430_v42 = vrot.slane %v4197_v3, %v1580_v35 }
 0x5f6   : > { %2509 = vst.msk [vmem:[%s5733_s27 + $0x40] sm:$0xff] %vm2500_vm13, %v2470_v29  ;;  %v2473_v17 = vadd.f32 %v5738_v1, %v2472_v20 }
 0x5f7   : > { %2512 = vst.msk [vmem:[%s5733_s27 + $0x58] sm:$0xff] %vm2500_vm13, %v2481_v8 }
 0x5f8   : > { %2510 = vst.msk [vmem:[%s5733_s27 + $0x48] sm:$0xff] %vm2500_vm13, %v2473_v17 }
 0x602   : > { %v3861_v39 = vpop.f32.mrb[44].mxu1 }
 0x603   : > { %v2494_v6 = vadd.f32 %v5738_v1, %v3861_v39  ;;  %v2485_v44 = vpop.f32.mrb[45].mxu1 }
 0x604   : > { %v2486_v2 = vadd.f32 %v5738_v1, %v2485_v44  ;;  %v3862_v5 = vpop.f32.mrb[46].mxu1 }
 0x605   : > { %2515 = vst.msk [vmem:[%s5733_s27 + $0x70] sm:$0xff] %vm2500_vm13, %v2494_v6  ;;  %v2497_v54 = vadd.f32 %v5738_v1, %v3862_v5  ;;  %v2488_v12 = vpop.f32.mrb[47].mxu1 }
 0x606   : > { %2513 = vst.msk [vmem:[%s5733_s27 + $0x60] sm:$0xff] %vm2500_vm13, %v2486_v2  ;;  %v2489_v51 = vadd.f32 %v5738_v1, %v2488_v12 }
 0x607   : > { %2516 = vst.msk [vmem:[%s5733_s27 + $0x78] sm:$0xff] %vm2500_vm13, %v2497_v54 }
 0x608   : > { %2514 = vst.msk [vmem:[%s5733_s27 + $0x68] sm:$0xff] %vm2500_vm13, %v2489_v51 }
 0x67c   : > { %v3288_v38 = vpop.f32.mrb[48].mxu0 }
 0x67d   : > { %v3881_v7 = vpop.f32.mrb[49].mxu0  ;;  %v3289_v34 = vadd.f32 %v3288_v38, %v3150_v52 }
 0x67e   : > { %v3291_v36 = vpop.f32.mrb[50].mxu0 }
 0x67f   : > { %v3292_v46 = vadd.f32 %v3291_v36, %v3150_v52  ;;  %v3882_v37 = vpop.f32.mrb[51].mxu0 }
 0x681   : > { %v3295_v53 = vpack.c.bf16 %v3292_v46, %v3289_v34 }
 0x683   : > { %v3297_v49 = vmul.bf16 %v3295_v53, %v3295_v53  ;;  %v3296_v4 = vmul.bf16 1056980736, %v3295_v53 }
 0x685   : > { %v3298_v21 = vmul.bf16 %v3297_v49, %v3295_v53 }
 0x687   : > { %v3299_v19 = vmul.bf16 1027030327, %v3298_v21 }
 0x689   : > { %v3300_v47 = vadd.bf16 %v3299_v19, %v3295_v53 }
 0x68b   : > { %v3301_v50 = vmul.bf16 1061961548, %v3300_v47 }
 0x68d   : > { %4189 = vtanh.bf16 %v3301_v50 }
 0x698   : > { %v4190_v18 = vpop.eup %4189 }
 0x699   : > { %v3303_v31 = vadd.bf16 1065369472, %v4190_v18 }
 0x69b   : > { %v3304_v60 = vmul.bf16 %v3303_v31, %v3296_v4 }
 0x69d   : > { %3900 = vmatmul.mubr.bf16.vlgmr.msra.gmra.mrb[48].mxu1 %v3304_v60 }
 0x770   : > { %v3408_v48 = vpop.f32.mrb[48].mxu1 }
 0x771   : > { %v3901_v45 = vpop.f32.mrb[49].mxu1  ;;  %v3409_v13 = vadd.f32 %v3408_v48, %v3325_v10 }
 0x772   : > { %v3411_v43 = vpop.f32.mrb[50].mxu1 }
 0x773   : > { %v3412_v55 = vadd.f32 %v3411_v43, %v3325_v10  ;;  %v3902_v25 = vpop.f32.mrb[51].mxu1 }
 0x775   : > { %v3415_v33 = vpack.c.bf16 %v3412_v55, %v3409_v13 }
 0x777   : > { %v3417_v57 = vmul.bf16 %v3415_v33, %v3415_v33  ;;  %v3416_v32 = vmul.bf16 1056980736, %v3415_v33 }
 0x779   : > { %v3418_v16 = vmul.bf16 %v3417_v57, %v3415_v33 }
 0x77b   : > { %v3419_v41 = vmul.bf16 1027030327, %v3418_v16 }
 0x77d   : > { %v3420_v30 = vadd.bf16 %v3419_v41, %v3415_v33 }
 0x77f   : > { %v3421_v58 = vmul.bf16 1061961548, %v3420_v30 }
 0x781   : > { %4191 = vtanh.bf16 %v3421_v58 }
 0x78c   : > { %v4192_v22 = vpop.eup %4191 }
 0x78d   : > { %v3423_v9 = vadd.bf16 1065369472, %v4192_v22 }
 0x78f   : > { %v3424_v28 = vmul.bf16 %v3423_v9, %v3416_v32 }
 0x791   : > { %v3426_v24 = vunpack.c.h.bf16 %v3424_v28  ;;  %v3425_v29 = vunpack.c.l.bf16 %v3424_v28 }
 0x793   : > { %v3432_v23 = vmul.f32 %v3430_v42, %v3426_v24  ;;  %v3431_v8 = vmul.f32 %v3430_v42, %v3425_v29 }
 0x795   : > { %3435 = vadd.xlane.f32.xlu0 %v3432_v23  ;;  %3433 = vadd.xlane.f32.xlu1 %v3431_v8 }
 0x822   : > { %v3436_v20 = vpop.xlane.xlu0 %3435  ;;  %v3434_v17 = vpop.xlane.xlu1 %3433 }
 0x823   : > { %v3438_v0 = vadd.f32 %v5738_v1, %v3436_v20  ;;  %v3437_v39 = vadd.f32 %v5738_v1, %v3434_v17 }
 0x825   : > { %3443 = vrot.lane.b32.xlu1 %v3438_v0, %s4211_s11  ;;  %3441 = vrot.lane.b32.xlu0 %v3437_v39, %s4211_s11 }
 0x897   : > { %v3442_v61 = vpop.permute.xlu0 %3441  ;;  %v3444_v35 = vpop.permute.xlu1 %3443 }
 0x898   : > { %3448 = vst.msk [vmem:[%s375_s18] sm:$0xff] %vm3447_vm14, %v3442_v61  ;;  %3449 = vst.msk [vmem:[%s375_s18 + $0x8] sm:$0xff] %vm3447_vm14, %v3444_v35 }
 0x899 PF: > { %s21_s13 = sadd.s32 1, %s4204_s13  }
 0x89a   : > { %p18_p5 = scmp.ge.s32.totalorder %s21_s13, 4  }
 0x89c   :  { %20 = sbr.rel (!%p18_p5) target bundleno = 1 (0x1), region = 101 }

</bundles_post_ra>
